<compile_context>
chip_gen: v7x
topology: tpu7x:2x2x1
jax: 0.10.0
libtpu: 0.0.40
codegen_flags: <defaults>
</compile_context>

<pallas_src>
import numpy as np

import jax
import jax.numpy as jnp
from jax.experimental import pallas as pl
from jax.experimental.pallas import tpu as pltpu


# ----------------------------------------------------------------------------
# Wrapper-side weight repacking (pure glue, done once per forward/trace)
# ----------------------------------------------------------------------------
def _banded_conv_weights(w, w_in, w_out):
    """Conv weight (Cout, Cin, KH, KW) -> banded matrices T of shape
    (KH, Cin*w_in, Cout*w_out) with T[i, ci*w_in + x + j, co*w_out + x] = w[co,ci,i,j].
    Then conv(x) rows (b, oh) = sum_i  x_rows(b, oh+i)  @  T[i]."""
    c_out, c_in, kh, kw = (int(d) for d in w.shape)
    i_g, j_g, ci_g, co_g, x_g = np.meshgrid(
        np.arange(kh), np.arange(kw), np.arange(c_in), np.arange(c_out),
        np.arange(w_out), indexing="ij")
    plane = i_g.ravel()
    rows = (ci_g * w_in + x_g + j_g).ravel()
    cols = (co_g * w_out + x_g).ravel()
    vals = w[co_g.ravel(), ci_g.ravel(), i_g.ravel(), j_g.ravel()]
    t = jnp.zeros((kh, c_in * w_in, c_out * w_out), jnp.float32)
    return t.at[plane, rows, cols].set(vals.astype(jnp.float32))


def _row_tap_selectors(bt, h_in, h_out, kh):
    """(kh, bt*h_out, bt*h_in) 0/1 matrices: S[i] @ act selects rows (b, y+i)."""
    s = np.zeros((kh, bt * h_out, bt * h_in), np.float32)
    for i in range(kh):
        for b in range(bt):
            for y in range(h_out):
                s[i, b * h_out + y, b * h_in + y + i] = 1.0
    return s


def _pool_w_selectors(c, w):
    """(2, c*w, c*(w//2)) 0/1 matrices: act @ S[p] picks lane (co, 2k+p) -> (co, k)."""
    wh = w // 2
    s = np.zeros((2, c * w, c * wh), np.float32)
    for p in range(2):
        for ci in range(c):
            for k in range(wh):
                s[p, ci * w + 2 * k + p, ci * wh + k] = 1.0
    return s


def _pool_h_selectors(bt, h):
    """(2, bt*(h//2), bt*h) 0/1 matrices: S[p] @ act picks row (b, 2t+p) -> (b, t)."""
    hh = h // 2
    s = np.zeros((2, bt * hh, bt * h), np.float32)
    for p in range(2):
        for b in range(bt):
            for t in range(hh):
                s[p, b * hh + t, b * h + 2 * t + p] = 1.0
    return s


def _pool_h_flatten_selectors(bt, h):
    """(2*(h//2), bt, bt*h): S[2y+p] @ act -> rows b, picking row (b, 2y+p)."""
    hh = h // 2
    s = np.zeros((2 * hh, bt, bt * h), np.float32)
    for y in range(hh):
        for p in range(2):
            for b in range(bt):
                s[2 * y + p, b, b * h + 2 * y + p] = 1.0
    return s


def _build_kernel_constants(params, bt):
    f32 = jnp.float32
    # conv1: 1 -> 6, 5x5, 28x28 -> 24x24
    e1 = jnp.asarray(_row_tap_selectors(bt, 28, 24, 5))            # (5, bt*24, bt*28)
    t1 = _banded_conv_weights(params["conv1_w"], 28, 24)           # (5, 28, 144)
    b1 = jnp.repeat(params["conv1_b"].astype(f32), 24).reshape(1, 144)
    s1w = jnp.asarray(_pool_w_selectors(6, 24))                    # (2, 144, 72)
    s1h = jnp.asarray(_pool_h_selectors(bt, 24))                   # (2, bt*12, bt*24)
    # conv2: 6 -> 16, 5x5, 12x12 -> 8x8   (output lanes = 16*8 = 128, lane-dense)
    r2 = jnp.asarray(_row_tap_selectors(bt, 12, 8, 5))             # (5, bt*8, bt*12)
    t2 = _banded_conv_weights(params["conv2_w"], 12, 8)            # (5, 72, 128)
    b2 = jnp.repeat(params["conv2_b"].astype(f32), 8).reshape(1, 128)
    s2w = jnp.asarray(_pool_w_selectors(16, 8))                    # (2, 128, 64)
    s2f = jnp.asarray(_pool_h_flatten_selectors(bt, 8))            # (8, bt, bt*8)
    # fc1: permute rows from torch flatten order (co, ph, pw) to our (ph, co, pw)
    # layout, pad out-features 120 -> 128 lanes.
    ph, co, pw = np.meshgrid(np.arange(4), np.arange(16), np.arange(4), indexing="ij")
    perm = (co * 16 + ph * 4 + pw).ravel()
    w1 = jnp.zeros((256, 128), f32).at[:, :120].set(params["fc1_w"].astype(f32)[perm, :])
    c1 = jnp.zeros((1, 128), f32).at[0, :120].set(params["fc1_b"].astype(f32))
    w2 = jnp.zeros((128, 128), f32).at[:120, :84].set(params["fc2_w"].astype(f32))
    c2 = jnp.zeros((1, 128), f32).at[0, :84].set(params["fc2_b"].astype(f32))
    w3 = jnp.zeros((128, 128), f32).at[:84, :10].set(params["fc3_w"].astype(f32))
    c3 = jnp.zeros((1, 128), f32).at[0, :10].set(params["fc3_b"].astype(f32))
    return (e1, t1, b1, s1w, s1h, r2, t2, b2, s2w, s2f, w1, c1, w2, c2, w3, c3)


# ----------------------------------------------------------------------------
# The fused Pallas kernel (one grid step = one batch tile, everything in VMEM)
# ----------------------------------------------------------------------------
def _lenet_kernel(x_ref, e1_ref, t1_ref, b1_ref, s1w_ref, s1h_ref,
                  r2_ref, t2_ref, b2_ref, s2w_ref, s2f_ref,
                  w1_ref, c1_ref, w2_ref, c2_ref, w3_ref, c3_ref, out_ref):
    f32 = jnp.float32

    def mm(a, b):
        return jnp.dot(a, b, preferred_element_type=f32)

    x2 = x_ref[...]                                            # (Bt*28, 28) rows=(b,h)

    # ---- conv1 + ReLU: rows=(b, oh), cols=(co, ow) ----
    acc1 = mm(mm(e1_ref[0], x2), t1_ref[0])
    for i in range(1, 5):
        acc1 = acc1 + mm(mm(e1_ref[i], x2), t1_ref[i])
    act1 = jnp.maximum(acc1 + b1_ref[...], 0.0)                # (Bt*24, 144)

    # ---- maxpool 2x2 (W via right-selection, H via left-selection) ----
    wmax1 = jnp.maximum(mm(act1, s1w_ref[0]), mm(act1, s1w_ref[1]))     # (Bt*24, 72)
    pool1 = jnp.maximum(mm(s1h_ref[0], wmax1), mm(s1h_ref[1], wmax1))   # (Bt*12, 72)

    # ---- conv2 + ReLU: rows=(b, oh), cols=(co, ow) -> exactly 128 lanes ----
    acc2 = mm(mm(r2_ref[0], pool1), t2_ref[0])
    for i in range(1, 5):
        acc2 = acc2 + mm(mm(r2_ref[i], pool1), t2_ref[i])
    act2 = jnp.maximum(acc2 + b2_ref[...], 0.0)                # (Bt*8, 128)

    # ---- maxpool 2x2: W, then H fused with the flatten + fc1 matmul ----
    wmax2 = jnp.maximum(mm(act2, s2w_ref[0]), mm(act2, s2w_ref[1]))     # (Bt*8, 64)

    tap0 = jnp.maximum(mm(s2f_ref[0], wmax2), mm(s2f_ref[1], wmax2))    # (Bt, 64)
    accf = mm(tap0, w1_ref[pl.ds(0, 64), :])
    for y in range(1, 4):
        tap = jnp.maximum(mm(s2f_ref[2 * y], wmax2), mm(s2f_ref[2 * y + 1], wmax2))
        accf = accf + mm(tap, w1_ref[pl.ds(64 * y, 64), :])

    # ---- FC chain (lane-dense, padded to 128 outputs) ----
    h1 = jnp.maximum(accf + c1_ref[...], 0.0)                  # (Bt, 128)
    h2 = jnp.maximum(mm(h1, w2_ref[...]) + c2_ref[...], 0.0)   # (Bt, 128)
    out_ref[...] = (mm(h2, w3_ref[...]) + c3_ref[...]).astype(out_ref.dtype)


def _const_spec(arr):
    nd = arr.ndim
    return pl.BlockSpec(arr.shape, lambda m, _nd=nd: (0,) * _nd)


def _flops_per_tile(bt):
    def mm(m, k, n):
        return 2 * m * k * n
    fl = 5 * (mm(bt * 24, bt * 28, 28) + mm(bt * 24, 28, 144))
    fl += 2 * mm(bt * 24, 144, 72) + 2 * mm(bt * 12, bt * 24, 72)
    fl += 5 * (mm(bt * 8, bt * 12, 72) + mm(bt * 8, 72, 128))
    fl += 2 * mm(bt * 8, 128, 64)
    fl += 8 * mm(bt, bt * 8, 64) + 4 * mm(bt, 64, 128)
    fl += 2 * mm(bt, 128, 128)
    return fl


# ----------------------------------------------------------------------------
# Forward pass (matches SimpleConvNet.forward), one pallas_call total
# ----------------------------------------------------------------------------
def simple_convnet_forward(params, x, *, batch_tile=8):
    B = x.shape[0]
    assert x.shape[1:] == (1, 28, 28), x.shape
    bt = batch_tile
    num_tiles = -(-B // bt)
    bp = num_tiles * bt

    consts = _build_kernel_constants(params, bt)

    x2 = x.astype(jnp.float32).reshape(B, 28, 28)
    if bp != B:
        x2 = jnp.concatenate([x2, jnp.zeros((bp - B, 28, 28), jnp.float32)], axis=0)
    x2 = x2.reshape(bp * 28, 28)

    in_specs = [pl.BlockSpec((bt * 28, 28), lambda m: (m, 0))]
    in_specs += [_const_spec(c) for c in consts]

    flops = int(_flops_per_tile(bt) * num_tiles)
    bytes_accessed = int(4 * (x2.size + sum(int(c.size) for c in consts) + bp * 128))

    out = pl.pallas_call(
        _lenet_kernel,
        out_shape=jax.ShapeDtypeStruct((bp, 128), jnp.float32),
        grid=(num_tiles,),
        in_specs=in_specs,
        out_specs=pl.BlockSpec((bt, 128), lambda m: (m, 0)),
        compiler_params=pltpu.CompilerParams(dimension_semantics=("parallel",)),
        cost_estimate=pl.CostEstimate(flops=flops, transcendentals=0,
                                      bytes_accessed=bytes_accessed),
    )(x2, *consts)

    return out[:B, :10]


# ----------------------------------------------------------------------------
# Parameters (deterministic, PyTorch-like uniform(-1/sqrt(fan_in), 1/sqrt(fan_in)))
# ----------------------------------------------------------------------------
def init_params(key):
    def u(key, shape, fan_in):
        bound = 1.0 / jnp.sqrt(jnp.float32(fan_in))
        return jax.random.uniform(key, shape, jnp.float32, -bound, bound)

    ks = jax.random.split(key, 10)
    return {
        "conv1_w": u(ks[0], (6, 1, 5, 5), 1 * 5 * 5),
        "conv1_b": u(ks[1], (6,), 1 * 5 * 5),
        "conv2_w": u(ks[2], (16, 6, 5, 5), 6 * 5 * 5),
        "conv2_b": u(ks[3], (16,), 6 * 5 * 5),
        # stored as (in, out); PyTorch Linear is y = x @ W.T + b with W:(out, in)
        "fc1_w": u(ks[4], (256, 120), 256),
        "fc1_b": u(ks[5], (120,), 256),
        "fc2_w": u(ks[6], (120, 84), 120),
        "fc2_b": u(ks[7], (84,), 120),
        "fc3_w": u(ks[8], (84, 10), 84),
        "fc3_b": u(ks[9], (10,), 84),
    }


# ----------------------------------------------------------------------------
# Pure-JAX reference (for a self-check of the fused kernel's semantics)
# ----------------------------------------------------------------------------
def _reference_forward(params, x):
    dn = ("NCHW", "OIHW", "NCHW")
    y = jax.lax.conv_general_dilated(x, params["conv1_w"], (1, 1), "VALID",
                                     dimension_numbers=dn)
    y = jax.nn.relu(y + params["conv1_b"][None, :, None, None])
    y = jax.lax.reduce_window(y, -jnp.inf, jax.lax.max, (1, 1, 2, 2), (1, 1, 2, 2), "VALID")
    y = jax.lax.conv_general_dilated(y, params["conv2_w"], (1, 1), "VALID",
                                     dimension_numbers=dn)
    y = jax.nn.relu(y + params["conv2_b"][None, :, None, None])
    y = jax.lax.reduce_window(y, -jnp.inf, jax.lax.max, (1, 1, 2, 2), (1, 1, 2, 2), "VALID")
    y = y.reshape(y.shape[0], -1)
    y = jax.nn.relu(y @ params["fc1_w"] + params["fc1_b"])
    y = jax.nn.relu(y @ params["fc2_w"] + params["fc2_b"])
    return y @ params["fc3_w"] + params["fc3_b"]


if __name__ == "__main__":
    key = jax.random.PRNGKey(0)
    k_params, k_x = jax.random.split(key)
    params = init_params(k_params)

    B = 2
    x = jax.random.normal(k_x, (B, 1, 28, 28), dtype=jnp.float32)

    fwd = jax.jit(simple_convnet_forward)
    out = jax.block_until_ready(fwd(params, x))
    assert out.shape == (B, 10), out.shape

    ref = jax.block_until_ready(_reference_forward(params, x))
    max_err = float(jnp.max(jnp.abs(out - ref)))
    assert max_err < 2e-2, f"mismatch vs reference: {max_err}"

    print("KERNEL_OK")
</pallas_src>

<mosaic_0001>
module attributes {stable_mosaic.version = 11 : i64} {
  func.func @_lenet_kernel(%arg0: i32, %arg1: memref<224x28xf32, #tpu.memory_space<vmem>>, %arg2: memref<5x192x224xf32, #tpu.memory_space<vmem>>, %arg3: memref<5x28x144xf32, #tpu.memory_space<vmem>>, %arg4: memref<1x144xf32, #tpu.memory_space<vmem>>, %arg5: memref<2x144x72xf32, #tpu.memory_space<vmem>>, %arg6: memref<2x96x192xf32, #tpu.memory_space<vmem>>, %arg7: memref<5x64x96xf32, #tpu.memory_space<vmem>>, %arg8: memref<5x72x128xf32, #tpu.memory_space<vmem>>, %arg9: memref<1x128xf32, #tpu.memory_space<vmem>>, %arg10: memref<2x128x64xf32, #tpu.memory_space<vmem>>, %arg11: memref<8x8x64xf32, #tpu.memory_space<vmem>>, %arg12: memref<256x128xf32, #tpu.memory_space<vmem>>, %arg13: memref<1x128xf32, #tpu.memory_space<vmem>>, %arg14: memref<128x128xf32, #tpu.memory_space<vmem>>, %arg15: memref<1x128xf32, #tpu.memory_space<vmem>>, %arg16: memref<128x128xf32, #tpu.memory_space<vmem>>, %arg17: memref<1x128xf32, #tpu.memory_space<vmem>>, %arg18: memref<8x128xf32, #tpu.memory_space<vmem>>) attributes {dimension_semantics = [#tpu.dimension_semantics<parallel>], iteration_bounds = array<i64: 1>, scalar_prefetch = 0 : i64, scratch_operands = 0 : i64, tpu.core_type = #tpu.core_type<tc>, window_params = [{transform_indices = @transform_0, window_bounds = array<i64: 224, 28>}, {pipeline_mode = #tpu.pipeline_mode<synchronous>, transform_indices = @transform_1, window_bounds = array<i64: 5, 192, 224>}, {pipeline_mode = #tpu.pipeline_mode<synchronous>, transform_indices = @transform_2, window_bounds = array<i64: 5, 28, 144>}, {pipeline_mode = #tpu.pipeline_mode<synchronous>, transform_indices = @transform_3, window_bounds = array<i64: 1, 144>}, {pipeline_mode = #tpu.pipeline_mode<synchronous>, transform_indices = @transform_4, window_bounds = array<i64: 2, 144, 72>}, {pipeline_mode = #tpu.pipeline_mode<synchronous>, transform_indices = @transform_5, window_bounds = array<i64: 2, 96, 192>}, {pipeline_mode = #tpu.pipeline_mode<synchronous>, transform_indices = @transform_6, window_bounds = array<i64: 5, 64, 96>}, {pipeline_mode = #tpu.pipeline_mode<synchronous>, transform_indices = @transform_7, window_bounds = array<i64: 5, 72, 128>}, {pipeline_mode = #tpu.pipeline_mode<synchronous>, transform_indices = @transform_8, window_bounds = array<i64: 1, 128>}, {pipeline_mode = #tpu.pipeline_mode<synchronous>, transform_indices = @transform_9, window_bounds = array<i64: 2, 128, 64>}, {pipeline_mode = #tpu.pipeline_mode<synchronous>, transform_indices = @transform_10, window_bounds = array<i64: 8, 8, 64>}, {pipeline_mode = #tpu.pipeline_mode<synchronous>, transform_indices = @transform_11, window_bounds = array<i64: 256, 128>}, {pipeline_mode = #tpu.pipeline_mode<synchronous>, transform_indices = @transform_12, window_bounds = array<i64: 1, 128>}, {pipeline_mode = #tpu.pipeline_mode<synchronous>, transform_indices = @transform_13, window_bounds = array<i64: 128, 128>}, {pipeline_mode = #tpu.pipeline_mode<synchronous>, transform_indices = @transform_14, window_bounds = array<i64: 1, 128>}, {pipeline_mode = #tpu.pipeline_mode<synchronous>, transform_indices = @transform_15, window_bounds = array<i64: 128, 128>}, {pipeline_mode = #tpu.pipeline_mode<synchronous>, transform_indices = @transform_16, window_bounds = array<i64: 1, 128>}, {transform_indices = @transform_17, window_bounds = array<i64: 8, 128>}]} {
    %c0 = arith.constant 0 : index
    %c0_0 = arith.constant 0 : index
    %0 = vector.load %arg1[%c0, %c0_0] : memref<224x28xf32, #tpu.memory_space<vmem>>, vector<224x28xf32>
    %c0_1 = arith.constant 0 : index
    %c0_2 = arith.constant 0 : index
    %c0_3 = arith.constant 0 : index
    %1 = vector.load %arg2[%c0_1, %c0_2, %c0_3] : memref<5x192x224xf32, #tpu.memory_space<vmem>>, vector<1x192x224xf32>
    %2 = vector.shape_cast %1 : vector<1x192x224xf32> to vector<192x224xf32>
    %cst = arith.constant dense<0.000000e+00> : vector<192x28xf32>
    %3 = tpu.matmul %2, %0, %cst {dimension_numbers = #tpu.dot_dimension_numbers<[1], [0], [0], [1], [0, 0, 1, 1], [], []>} : vector<192x224xf32>, vector<224x28xf32>, vector<192x28xf32> -> vector<192x28xf32>
    %c0_4 = arith.constant 0 : index
    %c0_5 = arith.constant 0 : index
    %c0_6 = arith.constant 0 : index
    %4 = vector.load %arg3[%c0_4, %c0_5, %c0_6] : memref<5x28x144xf32, #tpu.memory_space<vmem>>, vector<1x28x144xf32>
    %5 = vector.shape_cast %4 : vector<1x28x144xf32> to vector<28x144xf32>
    %cst_7 = arith.constant dense<0.000000e+00> : vector<192x144xf32>
    %6 = tpu.matmul %3, %5, %cst_7 {dimension_numbers = #tpu.dot_dimension_numbers<[1], [0], [0], [1], [0, 0, 1, 1], [], []>} : vector<192x28xf32>, vector<28x144xf32>, vector<192x144xf32> -> vector<192x144xf32>
    %c1 = arith.constant 1 : index
    %c0_8 = arith.constant 0 : index
    %c0_9 = arith.constant 0 : index
    %7 = vector.load %arg2[%c1, %c0_8, %c0_9] : memref<5x192x224xf32, #tpu.memory_space<vmem>>, vector<1x192x224xf32>
    %8 = vector.shape_cast %7 : vector<1x192x224xf32> to vector<192x224xf32>
    %cst_10 = arith.constant dense<0.000000e+00> : vector<192x28xf32>
    %9 = tpu.matmul %8, %0, %cst_10 {dimension_numbers = #tpu.dot_dimension_numbers<[1], [0], [0], [1], [0, 0, 1, 1], [], []>} : vector<192x224xf32>, vector<224x28xf32>, vector<192x28xf32> -> vector<192x28xf32>
    %c1_11 = arith.constant 1 : index
    %c0_12 = arith.constant 0 : index
    %c0_13 = arith.constant 0 : index
    %10 = vector.load %arg3[%c1_11, %c0_12, %c0_13] : memref<5x28x144xf32, #tpu.memory_space<vmem>>, vector<1x28x144xf32>
    %11 = vector.shape_cast %10 : vector<1x28x144xf32> to vector<28x144xf32>
    %cst_14 = arith.constant dense<0.000000e+00> : vector<192x144xf32>
    %12 = tpu.matmul %9, %11, %cst_14 {dimension_numbers = #tpu.dot_dimension_numbers<[1], [0], [0], [1], [0, 0, 1, 1], [], []>} : vector<192x28xf32>, vector<28x144xf32>, vector<192x144xf32> -> vector<192x144xf32>
    %13 = arith.addf %6, %12 : vector<192x144xf32>
    %c2 = arith.constant 2 : index
    %c0_15 = arith.constant 0 : index
    %c0_16 = arith.constant 0 : index
    %14 = vector.load %arg2[%c2, %c0_15, %c0_16] : memref<5x192x224xf32, #tpu.memory_space<vmem>>, vector<1x192x224xf32>
    %15 = vector.shape_cast %14 : vector<1x192x224xf32> to vector<192x224xf32>
    %cst_17 = arith.constant dense<0.000000e+00> : vector<192x28xf32>
    %16 = tpu.matmul %15, %0, %cst_17 {dimension_numbers = #tpu.dot_dimension_numbers<[1], [0], [0], [1], [0, 0, 1, 1], [], []>} : vector<192x224xf32>, vector<224x28xf32>, vector<192x28xf32> -> vector<192x28xf32>
    %c2_18 = arith.constant 2 : index
    %c0_19 = arith.constant 0 : index
    %c0_20 = arith.constant 0 : index
    %17 = vector.load %arg3[%c2_18, %c0_19, %c0_20] : memref<5x28x144xf32, #tpu.memory_space<vmem>>, vector<1x28x144xf32>
    %18 = vector.shape_cast %17 : vector<1x28x144xf32> to vector<28x144xf32>
    %cst_21 = arith.constant dense<0.000000e+00> : vector<192x144xf32>
    %19 = tpu.matmul %16, %18, %cst_21 {dimension_numbers = #tpu.dot_dimension_numbers<[1], [0], [0], [1], [0, 0, 1, 1], [], []>} : vector<192x28xf32>, vector<28x144xf32>, vector<192x144xf32> -> vector<192x144xf32>
    %20 = arith.addf %13, %19 : vector<192x144xf32>
    %c3 = arith.constant 3 : index
    %c0_22 = arith.constant 0 : index
    %c0_23 = arith.constant 0 : index
    %21 = vector.load %arg2[%c3, %c0_22, %c0_23] : memref<5x192x224xf32, #tpu.memory_space<vmem>>, vector<1x192x224xf32>
    %22 = vector.shape_cast %21 : vector<1x192x224xf32> to vector<192x224xf32>
    %cst_24 = arith.constant dense<0.000000e+00> : vector<192x28xf32>
    %23 = tpu.matmul %22, %0, %cst_24 {dimension_numbers = #tpu.dot_dimension_numbers<[1], [0], [0], [1], [0, 0, 1, 1], [], []>} : vector<192x224xf32>, vector<224x28xf32>, vector<192x28xf32> -> vector<192x28xf32>
    %c3_25 = arith.constant 3 : index
    %c0_26 = arith.constant 0 : index
    %c0_27 = arith.constant 0 : index
    %24 = vector.load %arg3[%c3_25, %c0_26, %c0_27] : memref<5x28x144xf32, #tpu.memory_space<vmem>>, vector<1x28x144xf32>
    %25 = vector.shape_cast %24 : vector<1x28x144xf32> to vector<28x144xf32>
    %cst_28 = arith.constant dense<0.000000e+00> : vector<192x144xf32>
    %26 = tpu.matmul %23, %25, %cst_28 {dimension_numbers = #tpu.dot_dimension_numbers<[1], [0], [0], [1], [0, 0, 1, 1], [], []>} : vector<192x28xf32>, vector<28x144xf32>, vector<192x144xf32> -> vector<192x144xf32>
    %27 = arith.addf %20, %26 : vector<192x144xf32>
    %c4 = arith.constant 4 : index
    %c0_29 = arith.constant 0 : index
    %c0_30 = arith.constant 0 : index
    %28 = vector.load %arg2[%c4, %c0_29, %c0_30] : memref<5x192x224xf32, #tpu.memory_space<vmem>>, vector<1x192x224xf32>
    %29 = vector.shape_cast %28 : vector<1x192x224xf32> to vector<192x224xf32>
    %cst_31 = arith.constant dense<0.000000e+00> : vector<192x28xf32>
    %30 = tpu.matmul %29, %0, %cst_31 {dimension_numbers = #tpu.dot_dimension_numbers<[1], [0], [0], [1], [0, 0, 1, 1], [], []>} : vector<192x224xf32>, vector<224x28xf32>, vector<192x28xf32> -> vector<192x28xf32>
    %c4_32 = arith.constant 4 : index
    %c0_33 = arith.constant 0 : index
    %c0_34 = arith.constant 0 : index
    %31 = vector.load %arg3[%c4_32, %c0_33, %c0_34] : memref<5x28x144xf32, #tpu.memory_space<vmem>>, vector<1x28x144xf32>
    %32 = vector.shape_cast %31 : vector<1x28x144xf32> to vector<28x144xf32>
    %cst_35 = arith.constant dense<0.000000e+00> : vector<192x144xf32>
    %33 = tpu.matmul %30, %32, %cst_35 {dimension_numbers = #tpu.dot_dimension_numbers<[1], [0], [0], [1], [0, 0, 1, 1], [], []>} : vector<192x28xf32>, vector<28x144xf32>, vector<192x144xf32> -> vector<192x144xf32>
    %34 = arith.addf %27, %33 : vector<192x144xf32>
    %c0_36 = arith.constant 0 : index
    %c0_37 = arith.constant 0 : index
    %35 = vector.load %arg4[%c0_36, %c0_37] : memref<1x144xf32, #tpu.memory_space<vmem>>, vector<1x144xf32>
    %36 = vector.broadcast %35 : vector<1x144xf32> to vector<192x144xf32>
    %37 = arith.addf %34, %36 : vector<192x144xf32>
    %cst_38 = arith.constant 0.000000e+00 : f32
    %38 = vector.broadcast %cst_38 : f32 to vector<192x144xf32>
    %39 = arith.maximumf %37, %38 : vector<192x144xf32>
    %c0_39 = arith.constant 0 : index
    %c0_40 = arith.constant 0 : index
    %c0_41 = arith.constant 0 : index
    %40 = vector.load %arg5[%c0_39, %c0_40, %c0_41] : memref<2x144x72xf32, #tpu.memory_space<vmem>>, vector<1x144x72xf32>
    %41 = vector.shape_cast %40 : vector<1x144x72xf32> to vector<144x72xf32>
    %cst_42 = arith.constant dense<0.000000e+00> : vector<192x72xf32>
    %42 = tpu.matmul %39, %41, %cst_42 {dimension_numbers = #tpu.dot_dimension_numbers<[1], [0], [0], [1], [0, 0, 1, 1], [], []>} : vector<192x144xf32>, vector<144x72xf32>, vector<192x72xf32> -> vector<192x72xf32>
    %c1_43 = arith.constant 1 : index
    %c0_44 = arith.constant 0 : index
    %c0_45 = arith.constant 0 : index
    %43 = vector.load %arg5[%c1_43, %c0_44, %c0_45] : memref<2x144x72xf32, #tpu.memory_space<vmem>>, vector<1x144x72xf32>
    %44 = vector.shape_cast %43 : vector<1x144x72xf32> to vector<144x72xf32>
    %cst_46 = arith.constant dense<0.000000e+00> : vector<192x72xf32>
    %45 = tpu.matmul %39, %44, %cst_46 {dimension_numbers = #tpu.dot_dimension_numbers<[1], [0], [0], [1], [0, 0, 1, 1], [], []>} : vector<192x144xf32>, vector<144x72xf32>, vector<192x72xf32> -> vector<192x72xf32>
    %46 = arith.maximumf %42, %45 : vector<192x72xf32>
    %c0_47 = arith.constant 0 : index
    %c0_48 = arith.constant 0 : index
    %c0_49 = arith.constant 0 : index
    %47 = vector.load %arg6[%c0_47, %c0_48, %c0_49] : memref<2x96x192xf32, #tpu.memory_space<vmem>>, vector<1x96x192xf32>
    %48 = vector.shape_cast %47 : vector<1x96x192xf32> to vector<96x192xf32>
    %cst_50 = arith.constant dense<0.000000e+00> : vector<96x72xf32>
    %49 = tpu.matmul %48, %46, %cst_50 {dimension_numbers = #tpu.dot_dimension_numbers<[1], [0], [0], [1], [0, 0, 1, 1], [], []>} : vector<96x192xf32>, vector<192x72xf32>, vector<96x72xf32> -> vector<96x72xf32>
    %c1_51 = arith.constant 1 : index
    %c0_52 = arith.constant 0 : index
    %c0_53 = arith.constant 0 : index
    %50 = vector.load %arg6[%c1_51, %c0_52, %c0_53] : memref<2x96x192xf32, #tpu.memory_space<vmem>>, vector<1x96x192xf32>
    %51 = vector.shape_cast %50 : vector<1x96x192xf32> to vector<96x192xf32>
    %cst_54 = arith.constant dense<0.000000e+00> : vector<96x72xf32>
    %52 = tpu.matmul %51, %46, %cst_54 {dimension_numbers = #tpu.dot_dimension_numbers<[1], [0], [0], [1], [0, 0, 1, 1], [], []>} : vector<96x192xf32>, vector<192x72xf32>, vector<96x72xf32> -> vector<96x72xf32>
    %53 = arith.maximumf %49, %52 : vector<96x72xf32>
    %c0_55 = arith.constant 0 : index
    %c0_56 = arith.constant 0 : index
    %c0_57 = arith.constant 0 : index
    %54 = vector.load %arg7[%c0_55, %c0_56, %c0_57] : memref<5x64x96xf32, #tpu.memory_space<vmem>>, vector<1x64x96xf32>
    %55 = vector.shape_cast %54 : vector<1x64x96xf32> to vector<64x96xf32>
    %cst_58 = arith.constant dense<0.000000e+00> : vector<64x72xf32>
    %56 = tpu.matmul %55, %53, %cst_58 {dimension_numbers = #tpu.dot_dimension_numbers<[1], [0], [0], [1], [0, 0, 1, 1], [], []>} : vector<64x96xf32>, vector<96x72xf32>, vector<64x72xf32> -> vector<64x72xf32>
    %c0_59 = arith.constant 0 : index
    %c0_60 = arith.constant 0 : index
    %c0_61 = arith.constant 0 : index
    %57 = vector.load %arg8[%c0_59, %c0_60, %c0_61] : memref<5x72x128xf32, #tpu.memory_space<vmem>>, vector<1x72x128xf32>
    %58 = vector.shape_cast %57 : vector<1x72x128xf32> to vector<72x128xf32>
    %cst_62 = arith.constant dense<0.000000e+00> : vector<64x128xf32>
    %59 = tpu.matmul %56, %58, %cst_62 {dimension_numbers = #tpu.dot_dimension_numbers<[1], [0], [0], [1], [0, 0, 1, 1], [], []>} : vector<64x72xf32>, vector<72x128xf32>, vector<64x128xf32> -> vector<64x128xf32>
    %c1_63 = arith.constant 1 : index
    %c0_64 = arith.constant 0 : index
    %c0_65 = arith.constant 0 : index
    %60 = vector.load %arg7[%c1_63, %c0_64, %c0_65] : memref<5x64x96xf32, #tpu.memory_space<vmem>>, vector<1x64x96xf32>
    %61 = vector.shape_cast %60 : vector<1x64x96xf32> to vector<64x96xf32>
    %cst_66 = arith.constant dense<0.000000e+00> : vector<64x72xf32>
    %62 = tpu.matmul %61, %53, %cst_66 {dimension_numbers = #tpu.dot_dimension_numbers<[1], [0], [0], [1], [0, 0, 1, 1], [], []>} : vector<64x96xf32>, vector<96x72xf32>, vector<64x72xf32> -> vector<64x72xf32>
    %c1_67 = arith.constant 1 : index
    %c0_68 = arith.constant 0 : index
    %c0_69 = arith.constant 0 : index
    %63 = vector.load %arg8[%c1_67, %c0_68, %c0_69] : memref<5x72x128xf32, #tpu.memory_space<vmem>>, vector<1x72x128xf32>
    %64 = vector.shape_cast %63 : vector<1x72x128xf32> to vector<72x128xf32>
    %cst_70 = arith.constant dense<0.000000e+00> : vector<64x128xf32>
    %65 = tpu.matmul %62, %64, %cst_70 {dimension_numbers = #tpu.dot_dimension_numbers<[1], [0], [0], [1], [0, 0, 1, 1], [], []>} : vector<64x72xf32>, vector<72x128xf32>, vector<64x128xf32> -> vector<64x128xf32>
    %66 = arith.addf %59, %65 : vector<64x128xf32>
    %c2_71 = arith.constant 2 : index
    %c0_72 = arith.constant 0 : index
    %c0_73 = arith.constant 0 : index
    %67 = vector.load %arg7[%c2_71, %c0_72, %c0_73] : memref<5x64x96xf32, #tpu.memory_space<vmem>>, vector<1x64x96xf32>
    %68 = vector.shape_cast %67 : vector<1x64x96xf32> to vector<64x96xf32>
    %cst_74 = arith.constant dense<0.000000e+00> : vector<64x72xf32>
    %69 = tpu.matmul %68, %53, %cst_74 {dimension_numbers = #tpu.dot_dimension_numbers<[1], [0], [0], [1], [0, 0, 1, 1], [], []>} : vector<64x96xf32>, vector<96x72xf32>, vector<64x72xf32> -> vector<64x72xf32>
    %c2_75 = arith.constant 2 : index
    %c0_76 = arith.constant 0 : index
    %c0_77 = arith.constant 0 : index
    %70 = vector.load %arg8[%c2_75, %c0_76, %c0_77] : memref<5x72x128xf32, #tpu.memory_space<vmem>>, vector<1x72x128xf32>
    %71 = vector.shape_cast %70 : vector<1x72x128xf32> to vector<72x128xf32>
    %cst_78 = arith.constant dense<0.000000e+00> : vector<64x128xf32>
    %72 = tpu.matmul %69, %71, %cst_78 {dimension_numbers = #tpu.dot_dimension_numbers<[1], [0], [0], [1], [0, 0, 1, 1], [], []>} : vector<64x72xf32>, vector<72x128xf32>, vector<64x128xf32> -> vector<64x128xf32>
    %73 = arith.addf %66, %72 : vector<64x128xf32>
    %c3_79 = arith.constant 3 : index
    %c0_80 = arith.constant 0 : index
    %c0_81 = arith.constant 0 : index
    %74 = vector.load %arg7[%c3_79, %c0_80, %c0_81] : memref<5x64x96xf32, #tpu.memory_space<vmem>>, vector<1x64x96xf32>
    %75 = vector.shape_cast %74 : vector<1x64x96xf32> to vector<64x96xf32>
    %cst_82 = arith.constant dense<0.000000e+00> : vector<64x72xf32>
    %76 = tpu.matmul %75, %53, %cst_82 {dimension_numbers = #tpu.dot_dimension_numbers<[1], [0], [0], [1], [0, 0, 1, 1], [], []>} : vector<64x96xf32>, vector<96x72xf32>, vector<64x72xf32> -> vector<64x72xf32>
    %c3_83 = arith.constant 3 : index
    %c0_84 = arith.constant 0 : index
    %c0_85 = arith.constant 0 : index
    %77 = vector.load %arg8[%c3_83, %c0_84, %c0_85] : memref<5x72x128xf32, #tpu.memory_space<vmem>>, vector<1x72x128xf32>
    %78 = vector.shape_cast %77 : vector<1x72x128xf32> to vector<72x128xf32>
    %cst_86 = arith.constant dense<0.000000e+00> : vector<64x128xf32>
    %79 = tpu.matmul %76, %78, %cst_86 {dimension_numbers = #tpu.dot_dimension_numbers<[1], [0], [0], [1], [0, 0, 1, 1], [], []>} : vector<64x72xf32>, vector<72x128xf32>, vector<64x128xf32> -> vector<64x128xf32>
    %80 = arith.addf %73, %79 : vector<64x128xf32>
    %c4_87 = arith.constant 4 : index
    %c0_88 = arith.constant 0 : index
    %c0_89 = arith.constant 0 : index
    %81 = vector.load %arg7[%c4_87, %c0_88, %c0_89] : memref<5x64x96xf32, #tpu.memory_space<vmem>>, vector<1x64x96xf32>
    %82 = vector.shape_cast %81 : vector<1x64x96xf32> to vector<64x96xf32>
    %cst_90 = arith.constant dense<0.000000e+00> : vector<64x72xf32>
    %83 = tpu.matmul %82, %53, %cst_90 {dimension_numbers = #tpu.dot_dimension_numbers<[1], [0], [0], [1], [0, 0, 1, 1], [], []>} : vector<64x96xf32>, vector<96x72xf32>, vector<64x72xf32> -> vector<64x72xf32>
    %c4_91 = arith.constant 4 : index
    %c0_92 = arith.constant 0 : index
    %c0_93 = arith.constant 0 : index
    %84 = vector.load %arg8[%c4_91, %c0_92, %c0_93] : memref<5x72x128xf32, #tpu.memory_space<vmem>>, vector<1x72x128xf32>
    %85 = vector.shape_cast %84 : vector<1x72x128xf32> to vector<72x128xf32>
    %cst_94 = arith.constant dense<0.000000e+00> : vector<64x128xf32>
    %86 = tpu.matmul %83, %85, %cst_94 {dimension_numbers = #tpu.dot_dimension_numbers<[1], [0], [0], [1], [0, 0, 1, 1], [], []>} : vector<64x72xf32>, vector<72x128xf32>, vector<64x128xf32> -> vector<64x128xf32>
    %87 = arith.addf %80, %86 : vector<64x128xf32>
    %c0_95 = arith.constant 0 : index
    %c0_96 = arith.constant 0 : index
    %88 = vector.load %arg9[%c0_95, %c0_96] : memref<1x128xf32, #tpu.memory_space<vmem>>, vector<1x128xf32>
    %89 = vector.broadcast %88 : vector<1x128xf32> to vector<64x128xf32>
    %90 = arith.addf %87, %89 : vector<64x128xf32>
    %cst_97 = arith.constant 0.000000e+00 : f32
    %91 = vector.broadcast %cst_97 : f32 to vector<64x128xf32>
    %92 = arith.maximumf %90, %91 : vector<64x128xf32>
    %c0_98 = arith.constant 0 : index
    %c0_99 = arith.constant 0 : index
    %c0_100 = arith.constant 0 : index
    %93 = vector.load %arg10[%c0_98, %c0_99, %c0_100] : memref<2x128x64xf32, #tpu.memory_space<vmem>>, vector<1x128x64xf32>
    %94 = vector.shape_cast %93 : vector<1x128x64xf32> to vector<128x64xf32>
    %cst_101 = arith.constant dense<0.000000e+00> : vector<64x64xf32>
    %95 = tpu.matmul %92, %94, %cst_101 {dimension_numbers = #tpu.dot_dimension_numbers<[1], [0], [0], [1], [0, 0, 1, 1], [], []>} : vector<64x128xf32>, vector<128x64xf32>, vector<64x64xf32> -> vector<64x64xf32>
    %c1_102 = arith.constant 1 : index
    %c0_103 = arith.constant 0 : index
    %c0_104 = arith.constant 0 : index
    %96 = vector.load %arg10[%c1_102, %c0_103, %c0_104] : memref<2x128x64xf32, #tpu.memory_space<vmem>>, vector<1x128x64xf32>
    %97 = vector.shape_cast %96 : vector<1x128x64xf32> to vector<128x64xf32>
    %cst_105 = arith.constant dense<0.000000e+00> : vector<64x64xf32>
    %98 = tpu.matmul %92, %97, %cst_105 {dimension_numbers = #tpu.dot_dimension_numbers<[1], [0], [0], [1], [0, 0, 1, 1], [], []>} : vector<64x128xf32>, vector<128x64xf32>, vector<64x64xf32> -> vector<64x64xf32>
    %99 = arith.maximumf %95, %98 : vector<64x64xf32>
    %c0_106 = arith.constant 0 : index
    %c0_107 = arith.constant 0 : index
    %c0_108 = arith.constant 0 : index
    %100 = vector.load %arg11[%c0_106, %c0_107, %c0_108] : memref<8x8x64xf32, #tpu.memory_space<vmem>>, vector<1x8x64xf32>
    %101 = vector.shape_cast %100 : vector<1x8x64xf32> to vector<8x64xf32>
    %cst_109 = arith.constant dense<0.000000e+00> : vector<8x64xf32>
    %102 = tpu.matmul %101, %99, %cst_109 {dimension_numbers = #tpu.dot_dimension_numbers<[1], [0], [0], [1], [0, 0, 1, 1], [], []>} : vector<8x64xf32>, vector<64x64xf32>, vector<8x64xf32> -> vector<8x64xf32>
    %c1_110 = arith.constant 1 : index
    %c0_111 = arith.constant 0 : index
    %c0_112 = arith.constant 0 : index
    %103 = vector.load %arg11[%c1_110, %c0_111, %c0_112] : memref<8x8x64xf32, #tpu.memory_space<vmem>>, vector<1x8x64xf32>
    %104 = vector.shape_cast %103 : vector<1x8x64xf32> to vector<8x64xf32>
    %cst_113 = arith.constant dense<0.000000e+00> : vector<8x64xf32>
    %105 = tpu.matmul %104, %99, %cst_113 {dimension_numbers = #tpu.dot_dimension_numbers<[1], [0], [0], [1], [0, 0, 1, 1], [], []>} : vector<8x64xf32>, vector<64x64xf32>, vector<8x64xf32> -> vector<8x64xf32>
    %106 = arith.maximumf %102, %105 : vector<8x64xf32>
    %c0_114 = arith.constant 0 : index
    %c0_115 = arith.constant 0 : index
    %107 = vector.load %arg12[%c0_114, %c0_115] : memref<256x128xf32, #tpu.memory_space<vmem>>, vector<64x128xf32>
    %cst_116 = arith.constant dense<0.000000e+00> : vector<8x128xf32>
    %108 = tpu.matmul %106, %107, %cst_116 {dimension_numbers = #tpu.dot_dimension_numbers<[1], [0], [0], [1], [0, 0, 1, 1], [], []>} : vector<8x64xf32>, vector<64x128xf32>, vector<8x128xf32> -> vector<8x128xf32>
    %c2_117 = arith.constant 2 : index
    %c0_118 = arith.constant 0 : index
    %c0_119 = arith.constant 0 : index
    %109 = vector.load %arg11[%c2_117, %c0_118, %c0_119] : memref<8x8x64xf32, #tpu.memory_space<vmem>>, vector<1x8x64xf32>
    %110 = vector.shape_cast %109 : vector<1x8x64xf32> to vector<8x64xf32>
    %cst_120 = arith.constant dense<0.000000e+00> : vector<8x64xf32>
    %111 = tpu.matmul %110, %99, %cst_120 {dimension_numbers = #tpu.dot_dimension_numbers<[1], [0], [0], [1], [0, 0, 1, 1], [], []>} : vector<8x64xf32>, vector<64x64xf32>, vector<8x64xf32> -> vector<8x64xf32>
    %c3_121 = arith.constant 3 : index
    %c0_122 = arith.constant 0 : index
    %c0_123 = arith.constant 0 : index
    %112 = vector.load %arg11[%c3_121, %c0_122, %c0_123] : memref<8x8x64xf32, #tpu.memory_space<vmem>>, vector<1x8x64xf32>
    %113 = vector.shape_cast %112 : vector<1x8x64xf32> to vector<8x64xf32>
    %cst_124 = arith.constant dense<0.000000e+00> : vector<8x64xf32>
    %114 = tpu.matmul %113, %99, %cst_124 {dimension_numbers = #tpu.dot_dimension_numbers<[1], [0], [0], [1], [0, 0, 1, 1], [], []>} : vector<8x64xf32>, vector<64x64xf32>, vector<8x64xf32> -> vector<8x64xf32>
    %115 = arith.maximumf %111, %114 : vector<8x64xf32>
    %c64 = arith.constant 64 : index
    %c0_125 = arith.constant 0 : index
    %116 = vector.load %arg12[%c64, %c0_125] : memref<256x128xf32, #tpu.memory_space<vmem>>, vector<64x128xf32>
    %cst_126 = arith.constant dense<0.000000e+00> : vector<8x128xf32>
    %117 = tpu.matmul %115, %116, %cst_126 {dimension_numbers = #tpu.dot_dimension_numbers<[1], [0], [0], [1], [0, 0, 1, 1], [], []>} : vector<8x64xf32>, vector<64x128xf32>, vector<8x128xf32> -> vector<8x128xf32>
    %118 = arith.addf %108, %117 : vector<8x128xf32>
    %c4_127 = arith.constant 4 : index
    %c0_128 = arith.constant 0 : index
    %c0_129 = arith.constant 0 : index
    %119 = vector.load %arg11[%c4_127, %c0_128, %c0_129] : memref<8x8x64xf32, #tpu.memory_space<vmem>>, vector<1x8x64xf32>
    %120 = vector.shape_cast %119 : vector<1x8x64xf32> to vector<8x64xf32>
    %cst_130 = arith.constant dense<0.000000e+00> : vector<8x64xf32>
    %121 = tpu.matmul %120, %99, %cst_130 {dimension_numbers = #tpu.dot_dimension_numbers<[1], [0], [0], [1], [0, 0, 1, 1], [], []>} : vector<8x64xf32>, vector<64x64xf32>, vector<8x64xf32> -> vector<8x64xf32>
    %c5 = arith.constant 5 : index
    %c0_131 = arith.constant 0 : index
    %c0_132 = arith.constant 0 : index
    %122 = vector.load %arg11[%c5, %c0_131, %c0_132] : memref<8x8x64xf32, #tpu.memory_space<vmem>>, vector<1x8x64xf32>
    %123 = vector.shape_cast %122 : vector<1x8x64xf32> to vector<8x64xf32>
    %cst_133 = arith.constant dense<0.000000e+00> : vector<8x64xf32>
    %124 = tpu.matmul %123, %99, %cst_133 {dimension_numbers = #tpu.dot_dimension_numbers<[1], [0], [0], [1], [0, 0, 1, 1], [], []>} : vector<8x64xf32>, vector<64x64xf32>, vector<8x64xf32> -> vector<8x64xf32>
    %125 = arith.maximumf %121, %124 : vector<8x64xf32>
    %c128 = arith.constant 128 : index
    %c0_134 = arith.constant 0 : index
    %126 = vector.load %arg12[%c128, %c0_134] : memref<256x128xf32, #tpu.memory_space<vmem>>, vector<64x128xf32>
    %cst_135 = arith.constant dense<0.000000e+00> : vector<8x128xf32>
    %127 = tpu.matmul %125, %126, %cst_135 {dimension_numbers = #tpu.dot_dimension_numbers<[1], [0], [0], [1], [0, 0, 1, 1], [], []>} : vector<8x64xf32>, vector<64x128xf32>, vector<8x128xf32> -> vector<8x128xf32>
    %128 = arith.addf %118, %127 : vector<8x128xf32>
    %c6 = arith.constant 6 : index
    %c0_136 = arith.constant 0 : index
    %c0_137 = arith.constant 0 : index
    %129 = vector.load %arg11[%c6, %c0_136, %c0_137] : memref<8x8x64xf32, #tpu.memory_space<vmem>>, vector<1x8x64xf32>
    %130 = vector.shape_cast %129 : vector<1x8x64xf32> to vector<8x64xf32>
    %cst_138 = arith.constant dense<0.000000e+00> : vector<8x64xf32>
    %131 = tpu.matmul %130, %99, %cst_138 {dimension_numbers = #tpu.dot_dimension_numbers<[1], [0], [0], [1], [0, 0, 1, 1], [], []>} : vector<8x64xf32>, vector<64x64xf32>, vector<8x64xf32> -> vector<8x64xf32>
    %c7 = arith.constant 7 : index
    %c0_139 = arith.constant 0 : index
    %c0_140 = arith.constant 0 : index
    %132 = vector.load %arg11[%c7, %c0_139, %c0_140] : memref<8x8x64xf32, #tpu.memory_space<vmem>>, vector<1x8x64xf32>
    %133 = vector.shape_cast %132 : vector<1x8x64xf32> to vector<8x64xf32>
    %cst_141 = arith.constant dense<0.000000e+00> : vector<8x64xf32>
    %134 = tpu.matmul %133, %99, %cst_141 {dimension_numbers = #tpu.dot_dimension_numbers<[1], [0], [0], [1], [0, 0, 1, 1], [], []>} : vector<8x64xf32>, vector<64x64xf32>, vector<8x64xf32> -> vector<8x64xf32>
    %135 = arith.maximumf %131, %134 : vector<8x64xf32>
    %c192 = arith.constant 192 : index
    %c0_142 = arith.constant 0 : index
    %136 = vector.load %arg12[%c192, %c0_142] : memref<256x128xf32, #tpu.memory_space<vmem>>, vector<64x128xf32>
    %cst_143 = arith.constant dense<0.000000e+00> : vector<8x128xf32>
    %137 = tpu.matmul %135, %136, %cst_143 {dimension_numbers = #tpu.dot_dimension_numbers<[1], [0], [0], [1], [0, 0, 1, 1], [], []>} : vector<8x64xf32>, vector<64x128xf32>, vector<8x128xf32> -> vector<8x128xf32>
    %138 = arith.addf %128, %137 : vector<8x128xf32>
    %c0_144 = arith.constant 0 : index
    %c0_145 = arith.constant 0 : index
    %139 = vector.load %arg13[%c0_144, %c0_145] : memref<1x128xf32, #tpu.memory_space<vmem>>, vector<1x128xf32>
    %140 = vector.broadcast %139 : vector<1x128xf32> to vector<8x128xf32>
    %141 = arith.addf %138, %140 : vector<8x128xf32>
    %cst_146 = arith.constant 0.000000e+00 : f32
    %142 = vector.broadcast %cst_146 : f32 to vector<8x128xf32>
    %143 = arith.maximumf %141, %142 : vector<8x128xf32>
    %c0_147 = arith.constant 0 : index
    %c0_148 = arith.constant 0 : index
    %144 = vector.load %arg14[%c0_147, %c0_148] : memref<128x128xf32, #tpu.memory_space<vmem>>, vector<128x128xf32>
    %cst_149 = arith.constant dense<0.000000e+00> : vector<8x128xf32>
    %145 = tpu.matmul %143, %144, %cst_149 {dimension_numbers = #tpu.dot_dimension_numbers<[1], [0], [0], [1], [0, 0, 1, 1], [], []>} : vector<8x128xf32>, vector<128x128xf32>, vector<8x128xf32> -> vector<8x128xf32>
    %c0_150 = arith.constant 0 : index
    %c0_151 = arith.constant 0 : index
    %146 = vector.load %arg15[%c0_150, %c0_151] : memref<1x128xf32, #tpu.memory_space<vmem>>, vector<1x128xf32>
    %147 = vector.broadcast %146 : vector<1x128xf32> to vector<8x128xf32>
    %148 = arith.addf %145, %147 : vector<8x128xf32>
    %cst_152 = arith.constant 0.000000e+00 : f32
    %149 = vector.broadcast %cst_152 : f32 to vector<8x128xf32>
    %150 = arith.maximumf %148, %149 : vector<8x128xf32>
    %c0_153 = arith.constant 0 : index
    %c0_154 = arith.constant 0 : index
    %151 = vector.load %arg16[%c0_153, %c0_154] : memref<128x128xf32, #tpu.memory_space<vmem>>, vector<128x128xf32>
    %cst_155 = arith.constant dense<0.000000e+00> : vector<8x128xf32>
    %152 = tpu.matmul %150, %151, %cst_155 {dimension_numbers = #tpu.dot_dimension_numbers<[1], [0], [0], [1], [0, 0, 1, 1], [], []>} : vector<8x128xf32>, vector<128x128xf32>, vector<8x128xf32> -> vector<8x128xf32>
    %c0_156 = arith.constant 0 : index
    %c0_157 = arith.constant 0 : index
    %153 = vector.load %arg17[%c0_156, %c0_157] : memref<1x128xf32, #tpu.memory_space<vmem>>, vector<1x128xf32>
    %154 = vector.broadcast %153 : vector<1x128xf32> to vector<8x128xf32>
    %155 = arith.addf %152, %154 : vector<8x128xf32>
    %c0_158 = arith.constant 0 : index
    %c0_159 = arith.constant 0 : index
    %156 = vector.load %arg18[%c0_158, %c0_159] : memref<8x128xf32, #tpu.memory_space<vmem>>, vector<8x128xf32>
    tpu.vector_store %arg18[%c0_158, %c0_159], %155 {strides = array<i32>} : memref<8x128xf32, #tpu.memory_space<vmem>>, vector<8x128xf32>,
    return
  }
  func.func @transform_0(%arg0: i32) -> (i32, i32) {
    %c0_i32 = arith.constant 0 : i32
    %c0_i32_0 = arith.constant 0 : i32
    return %arg0, %c0_i32 : i32, i32
  }
  func.func @transform_1(%arg0: i32) -> (i32, i32, i32) {
    %c0_i32 = arith.constant 0 : i32
    %c0_i32_0 = arith.constant 0 : i32
    %c0_i32_1 = arith.constant 0 : i32
    %c0_i32_2 = arith.constant 0 : i32
    return %c0_i32, %c0_i32_0, %c0_i32_1 : i32, i32, i32
  }
  func.func @transform_2(%arg0: i32) -> (i32, i32, i32) {
    %c0_i32 = arith.constant 0 : i32
    %c0_i32_0 = arith.constant 0 : i32
    %c0_i32_1 = arith.constant 0 : i32
    %c0_i32_2 = arith.constant 0 : i32
    return %c0_i32, %c0_i32_0, %c0_i32_1 : i32, i32, i32
  }
  func.func @transform_3(%arg0: i32) -> (i32, i32) {
    %c0_i32 = arith.constant 0 : i32
    %c0_i32_0 = arith.constant 0 : i32
    %c0_i32_1 = arith.constant 0 : i32
    return %c0_i32, %c0_i32_0 : i32, i32
  }
  func.func @transform_4(%arg0: i32) -> (i32, i32, i32) {
    %c0_i32 = arith.constant 0 : i32
    %c0_i32_0 = arith.constant 0 : i32
    %c0_i32_1 = arith.constant 0 : i32
    %c0_i32_2 = arith.constant 0 : i32
    return %c0_i32, %c0_i32_0, %c0_i32_1 : i32, i32, i32
  }
  func.func @transform_5(%arg0: i32) -> (i32, i32, i32) {
    %c0_i32 = arith.constant 0 : i32
    %c0_i32_0 = arith.constant 0 : i32
    %c0_i32_1 = arith.constant 0 : i32
    %c0_i32_2 = arith.constant 0 : i32
    return %c0_i32, %c0_i32_0, %c0_i32_1 : i32, i32, i32
  }
  func.func @transform_6(%arg0: i32) -> (i32, i32, i32) {
    %c0_i32 = arith.constant 0 : i32
    %c0_i32_0 = arith.constant 0 : i32
    %c0_i32_1 = arith.constant 0 : i32
    %c0_i32_2 = arith.constant 0 : i32
    return %c0_i32, %c0_i32_0, %c0_i32_1 : i32, i32, i32
  }
  func.func @transform_7(%arg0: i32) -> (i32, i32, i32) {
    %c0_i32 = arith.constant 0 : i32
    %c0_i32_0 = arith.constant 0 : i32
    %c0_i32_1 = arith.constant 0 : i32
    %c0_i32_2 = arith.constant 0 : i32
    return %c0_i32, %c0_i32_0, %c0_i32_1 : i32, i32, i32
  }
  func.func @transform_8(%arg0: i32) -> (i32, i32) {
    %c0_i32 = arith.constant 0 : i32
    %c0_i32_0 = arith.constant 0 : i32
    %c0_i32_1 = arith.constant 0 : i32
    return %c0_i32, %c0_i32_0 : i32, i32
  }
  func.func @transform_9(%arg0: i32) -> (i32, i32, i32) {
    %c0_i32 = arith.constant 0 : i32
    %c0_i32_0 = arith.constant 0 : i32
    %c0_i32_1 = arith.constant 0 : i32
    %c0_i32_2 = arith.constant 0 : i32
    return %c0_i32, %c0_i32_0, %c0_i32_1 : i32, i32, i32
  }
  func.func @transform_10(%arg0: i32) -> (i32, i32, i32) {
    %c0_i32 = arith.constant 0 : i32
    %c0_i32_0 = arith.constant 0 : i32
    %c0_i32_1 = arith.constant 0 : i32
    %c0_i32_2 = arith.constant 0 : i32
    return %c0_i32, %c0_i32_0, %c0_i32_1 : i32, i32, i32
  }
  func.func @transform_11(%arg0: i32) -> (i32, i32) {
    %c0_i32 = arith.constant 0 : i32
    %c0_i32_0 = arith.constant 0 : i32
    %c0_i32_1 = arith.constant 0 : i32
    return %c0_i32, %c0_i32_0 : i32, i32
  }
  func.func @transform_12(%arg0: i32) -> (i32, i32) {
    %c0_i32 = arith.constant 0 : i32
    %c0_i32_0 = arith.constant 0 : i32
    %c0_i32_1 = arith.constant 0 : i32
    return %c0_i32, %c0_i32_0 : i32, i32
  }
  func.func @transform_13(%arg0: i32) -> (i32, i32) {
    %c0_i32 = arith.constant 0 : i32
    %c0_i32_0 = arith.constant 0 : i32
    %c0_i32_1 = arith.constant 0 : i32
    return %c0_i32, %c0_i32_0 : i32, i32
  }
  func.func @transform_14(%arg0: i32) -> (i32, i32) {
    %c0_i32 = arith.constant 0 : i32
    %c0_i32_0 = arith.constant 0 : i32
    %c0_i32_1 = arith.constant 0 : i32
    return %c0_i32, %c0_i32_0 : i32, i32
  }
  func.func @transform_15(%arg0: i32) -> (i32, i32) {
    %c0_i32 = arith.constant 0 : i32
    %c0_i32_0 = arith.constant 0 : i32
    %c0_i32_1 = arith.constant 0 : i32
    return %c0_i32, %c0_i32_0 : i32, i32
  }
  func.func @transform_16(%arg0: i32) -> (i32, i32) {
    %c0_i32 = arith.constant 0 : i32
    %c0_i32_0 = arith.constant 0 : i32
    %c0_i32_1 = arith.constant 0 : i32
    return %c0_i32, %c0_i32_0 : i32, i32
  }
  func.func @transform_17(%arg0: i32) -> (i32, i32) {
    %c0_i32 = arith.constant 0 : i32
    %c0_i32_0 = arith.constant 0 : i32
    return %arg0, %c0_i32 : i32, i32
  }
}

</mosaic_0001>

<bundles_post_ra>
// kernel: simple_convnet_forward.1
= control target key start
LH: loop header
LB: loop body
LE: loop exit
PB: predicated region body
PF: predicated region fallthrough
CT: control target
= control target key end

     0   :  { %v13525_v0 = vmov 0.0|0.0   ;;  %vm132_vm0 = vcmask 785408   ;;  %vm786_vm1 = vcmask 1043456   ;;  %vm9984_vm2 = vmmov 1   ;;  %s13503_s0 = inlined_call_operand.vmem [shape: f32[224,28], index: 0, kind: input, shape index: {}]   ;;  %s13504_s1 = inlined_call_operand.vmem [shape: f32[5,192,224], index: 1, kind: input, shape index: {}]   ;;  %s13505_s2 = inlined_call_operand.vmem [shape: f32[5,28,144], index: 2, kind: input, shape index: {}]   ;;  %s13506_s4 = inlined_call_operand.vmem [shape: f32[2,144,72], index: 4, kind: input, shape index: {}]   ;;  %s13507_s3 = inlined_call_operand.vmem [shape: f32[1,144], index: 3, kind: input, shape index: {}]   ;;  %s13508_s5 = inlined_call_operand.vmem [shape: f32[2,96,192], index: 5, kind: input, shape index: {}]   ;;  %s13509_s6 = inlined_call_operand.vmem [shape: f32[5,64,96], index: 6, kind: input, shape index: {}]   ;;  %s13510_s7 = inlined_call_operand.vmem [shape: f32[5,72,128], index: 7, kind: input, shape index: {}]   ;;  %s13511_s9 = inlined_call_operand.vmem [shape: f32[2,128,64], index: 9, kind: input, shape index: {}]   ;;  %s13512_s8 = inlined_call_operand.vmem [shape: f32[1,128], index: 8, kind: input, shape index: {}]   ;;  %s13513_s10 = inlined_call_operand.vmem [shape: f32[8,8,64], index: 10, kind: input, shape index: {}]   ;;  %s13514_s11 = inlined_call_operand.vmem [shape: f32[256,128], index: 11, kind: input, shape index: {}]   ;;  %s13515_s13 = inlined_call_operand.vmem [shape: f32[128,128], index: 13, kind: input, shape index: {}]   ;;  %s13516_s15 = inlined_call_operand.vmem [shape: f32[128,128], index: 15, kind: input, shape index: {}]   ;;  %s13517_s12 = inlined_call_operand.vmem [shape: f32[1,128], index: 12, kind: input, shape index: {}]   ;;  %s13518_s14 = inlined_call_operand.vmem [shape: f32[1,128], index: 14, kind: input, shape index: {}]   ;;  %s13519_s16 = inlined_call_operand.vmem [shape: f32[1,128], index: 16, kind: input, shape index: {}]   ;;  %s13520_s17 = inlined_call_operand.vmem [shape: f32[8,128], index: 17, kind: output, shape index: {}]  }
   0x1   :  { %13563 = sst [smem:[#allocation2_spill]] %s13503_s0  ;;  %8955 = vmatprep.subr.bf16.mxu1 %v13525_v0  ;;  %8913 = vmatprep.subr.bf16.mxu0 %v13525_v0  ;;  %v7144_v44 = vld [vmem:[%s13505_s2 + $0x48] sm:$0xff]  ;;  %v7146_v45 = vld [vmem:[%s13505_s2 + $0x58] sm:$0xff]  ;;  %v7143_v48 = vld [vmem:[%s13505_s2 + $0x40] sm:$0xff]  ;;  %vm713_vm4 = vcmask 228352   ;;  %vm3365_vm5 = vcmask 130048  }
   0x2   :  { %13564 = sst [smem:[#allocation3_spill]] %s13504_s1  ;;  %s13565_s26 = sld [smem:[#allocation2_spill]]  ;;  %v8997_v47 = vpack.c.bf16 %v7146_v45, %v7144_v44  ;;  %v7145_v49 = vld [vmem:[%s13505_s2 + $0x50] sm:$0xff]  ;;  %v7148_v50 = vld [vmem:[%s13505_s2 + $0x68] sm:$0xff]  ;;  %v7150_v51 = vld [vmem:[%s13505_s2 + $0x78] sm:$0xf] }
   0x3   :  { %s13566_s29 = sld [smem:[#allocation3_spill]]  ;;  %v8999_v56 = vpack.c.bf16 %v7145_v49, %v7143_v48  ;;  %v9001_v57 = vpack.c.bf16 %v7150_v51, %v7148_v50  ;;  %v7147_v58 = vld [vmem:[%s13505_s2 + $0x60] sm:$0xff]  ;;  %v7149_v59 = vld [vmem:[%s13505_s2 + $0x70] sm:$0xf]  ;;  %vm10290_vm3 = vmpackc.low %vm786_vm1, %vm9984_vm2  ;;  %vm3875_vm6 = vcmask 523264   ;;  %vm4529_vm7 = vcmask 588800  }
   0x4   :  { %vm9986_vm8 = vmmov 0  }
   0x8   :  { %v56_v1 = vld [vmem:[%s13565_s26] sm:$0xff]  ;;  %v57_v2 = vld [vmem:[%s13565_s26 + $0x8] sm:$0xff]  ;;  %v58_v3 = vld [vmem:[%s13565_s26 + $0x10] sm:$0xff] }
   0x9   :  { %v10088_v4 = vpack.c.bf16 %v57_v2, %v56_v1  ;;  %v59_v5 = vld [vmem:[%s13565_s26 + $0x18] sm:$0xff]  ;;  %v60_v7 = vld [vmem:[%s13565_s26 + $0x20] sm:$0xff]  ;;  %v61_v8 = vld [vmem:[%s13565_s26 + $0x28] sm:$0xff]  ;;  %v9004_v2 = vpack.c.bf16 %v7149_v59, %v7147_v58 }
   0xa   :  { %v10094_v6 = vpack.c.bf16 %v59_v5, %v58_v3  ;;  %v10106_v9 = vpack.c.bf16 %v61_v8, %v60_v7  ;;  %v62_v10 = vld [vmem:[%s13565_s26 + $0x30] sm:$0xff]  ;;  %v63_v11 = vld [vmem:[%s13565_s26 + $0x38] sm:$0xff]  ;;  %v7072_v12 = vld [vmem:[%s13566_s29 + $0x188] sm:$0xff] }
   0xb   :  { %8957 = vmatpush1.bf16.msra.mxu1 %v10088_v4  ;;  %8915 = vmatpush1.bf16.msra.mxu0 %v10088_v4  ;;  %v10122_v13 = vpack.c.bf16 %v63_v11, %v62_v10  ;;  %v64_v14 = vld [vmem:[%s13565_s26 + $0x40] sm:$0xff]  ;;  %v65_v15 = vld [vmem:[%s13565_s26 + $0x48] sm:$0xff]  ;;  %v66_v17 = vld [vmem:[%s13565_s26 + $0x50] sm:$0xff] }
   0xc   :  { %8958 = vmatprep.subr.bf16.mxu1 %v13525_v0  ;;  %8916 = vmatprep.subr.bf16.mxu0 %v13525_v0  ;;  %v10134_v16 = vpack.c.bf16 %v65_v15, %v64_v14  ;;  %v67_v18 = vld [vmem:[%s13565_s26 + $0x58] sm:$0xff]  ;;  %v68_v20 = vld [vmem:[%s13565_s26 + $0x60] sm:$0xff]  ;;  %v69_v21 = vld [vmem:[%s13565_s26 + $0x68] sm:$0xff] }
   0xd   :  { %7119 = vmatprep.mubr.msk.f32.mxu1 %vm132_vm0, %v7072_v12  ;;  %v10146_v19 = vpack.c.bf16 %v67_v18, %v66_v17  ;;  %v10158_v22 = vpack.c.bf16 %v69_v21, %v68_v20  ;;  %v70_v23 = vld [vmem:[%s13565_s26 + $0x70] sm:$0xff]  ;;  %v71_v24 = vld [vmem:[%s13565_s26 + $0x78] sm:$0xff]  ;;  %v85_v25 = vld [vmem:[%s13566_s29 + $0x8] sm:$0xff] }
   0xe   :  { %7047 = vmatprep.mubr.msk.f32.mxu0 %vm132_vm0, %v85_v25  ;;  %v10174_v26 = vpack.c.bf16 %v71_v24, %v70_v23  ;;  %v72_v27 = vld [vmem:[%s13565_s26 + $0x80] sm:$0xff]  ;;  %v73_v28 = vld [vmem:[%s13565_s26 + $0x88] sm:$0xff]  ;;  %v74_v30 = vld [vmem:[%s13565_s26 + $0x90] sm:$0xff] }
   0xf   :  { %8960 = vmatpush1.bf16.msra.mxu1 %v10094_v6  ;;  %8918 = vmatpush1.bf16.msra.mxu0 %v10094_v6  ;;  %v10186_v29 = vpack.c.bf16 %v73_v28, %v72_v27  ;;  %v75_v31 = vld [vmem:[%s13565_s26 + $0x98] sm:$0xff]  ;;  %v76_v33 = vld [vmem:[%s13565_s26 + $0xa0] sm:$0xff]  ;;  %v77_v34 = vld [vmem:[%s13565_s26 + $0xa8] sm:$0xff] }
  0x10   :  { %8961 = vmatprep.subr.bf16.mxu1 %v13525_v0  ;;  %8919 = vmatprep.subr.bf16.mxu0 %v13525_v0  ;;  %v10198_v32 = vpack.c.bf16 %v75_v31, %v74_v30  ;;  %v10210_v35 = vpack.c.bf16 %v77_v34, %v76_v33  ;;  %v78_v36 = vld [vmem:[%s13565_s26 + $0xb0] sm:$0xff]  ;;  %v79_v37 = vld [vmem:[%s13565_s26 + $0xb8] sm:$0xff]  ;;  %v80_v39 = vld [vmem:[%s13565_s26 + $0xc0] sm:$0xff] }
  0x11   :  { %v10222_v38 = vpack.c.bf16 %v79_v37, %v78_v36  ;;  %v81_v40 = vld [vmem:[%s13565_s26 + $0xc8] sm:$0xff]  ;;  %v82_v42 = vld [vmem:[%s13565_s26 + $0xd0] sm:$0xff]  ;;  %v83_v43 = vld [vmem:[%s13565_s26 + $0xd8] sm:$0xff] }
  0x12   :  { %v10234_v41 = vpack.c.bf16 %v81_v40, %v80_v39  ;;  %v10252_v46 = vpack.c.bf16 %v83_v43, %v82_v42  ;;  %v7071_v52 = vld [vmem:[%s13566_s29 + $0x180] sm:$0xff]  ;;  %v7074_v54 = vld [vmem:[%s13566_s29 + $0x198] sm:$0xff]  ;;  %v7073_v61 = vld [vmem:[%s13566_s29 + $0x190] sm:$0xff] }
  0x13   :  { %8963 = vmatpush1.bf16.msra.mxu1 %v10106_v9  ;;  %8921 = vmatpush1.bf16.msra.mxu0 %v10106_v9  ;;  %v84_v53 = vld [vmem:[%s13566_s29] sm:$0xff]  ;;  %v87_v55 = vld [vmem:[%s13566_s29 + $0x18] sm:$0xff]  ;;  %v86_v62 = vld [vmem:[%s13566_s29 + $0x10] sm:$0xff] }
  0x14   :  { %8964 = vmatprep.subr.bf16.mxu1 %v13525_v0  ;;  %8922 = vmatprep.subr.bf16.mxu0 %v13525_v0  ;;  %v7076_v63 = vld [vmem:[%s13566_s29 + $0x1a8] sm:$0xff]  ;;  %v7075_v3 = vld [vmem:[%s13566_s29 + $0x1a0] sm:$0xff]  ;;  %v7078_v7 = vld [vmem:[%s13566_s29 + $0x1b8] sm:$0xff] }
  0x15   :  { %v89_v1 = vld [vmem:[%s13566_s29 + $0x28] sm:$0xff]  ;;  %v88_v5 = vld [vmem:[%s13566_s29 + $0x20] sm:$0xff]  ;;  %v91_v8 = vld [vmem:[%s13566_s29 + $0x38] sm:$0xff] }
  0x16   :  { %v7077_v10 = vld [vmem:[%s13566_s29 + $0x1b0] sm:$0xff]  ;;  %v7080_v12 = vld [vmem:[%s13566_s29 + $0x1c8] sm:$0xff]  ;;  %v7079_v15 = vld [vmem:[%s13566_s29 + $0x1c0] sm:$0xff] }
  0x17   :  { %8966 = vmatpush1.bf16.msra.mxu1 %v10122_v13  ;;  %8924 = vmatpush1.bf16.msra.mxu0 %v10122_v13  ;;  %v90_v11 = vld [vmem:[%s13566_s29 + $0x30] sm:$0xff]  ;;  %v93_v14 = vld [vmem:[%s13566_s29 + $0x48] sm:$0xff]  ;;  %v92_v17 = vld [vmem:[%s13566_s29 + $0x40] sm:$0xff] }
  0x18   :  { %8967 = vmatprep.subr.bf16.mxu1 %v13525_v0  ;;  %8925 = vmatprep.subr.bf16.mxu0 %v13525_v0  ;;  %v7082_v18 = vld [vmem:[%s13566_s29 + $0x1d8] sm:$0xff]  ;;  %v7081_v21 = vld [vmem:[%s13566_s29 + $0x1d0] sm:$0xff]  ;;  %v7084_v24 = vld [vmem:[%s13566_s29 + $0x1e8] sm:$0xff] }
  0x19   :  { %v95_v20 = vld [vmem:[%s13566_s29 + $0x58] sm:$0xff]  ;;  %v94_v23 = vld [vmem:[%s13566_s29 + $0x50] sm:$0xff]  ;;  %v97_v25 = vld [vmem:[%s13566_s29 + $0x68] sm:$0xff] }
  0x1a   :  { %v7083_v27 = vld [vmem:[%s13566_s29 + $0x1e0] sm:$0xff]  ;;  %v7086_v30 = vld [vmem:[%s13566_s29 + $0x1f8] sm:$0xff]  ;;  %v7085_v33 = vld [vmem:[%s13566_s29 + $0x1f0] sm:$0xff] }
  0x1b   :  { %8969 = vmatpush1.bf16.msra.mxu1 %v10134_v16  ;;  %8927 = vmatpush1.bf16.msra.mxu0 %v10134_v16  ;;  %v96_v28 = vld [vmem:[%s13566_s29 + $0x60] sm:$0xff]  ;;  %v99_v31 = vld [vmem:[%s13566_s29 + $0x78] sm:$0xff]  ;;  %v98_v34 = vld [vmem:[%s13566_s29 + $0x70] sm:$0xff] }
  0x1c   :  { %8970 = vmatprep.subr.bf16.mxu1 %v13525_v0  ;;  %8928 = vmatprep.subr.bf16.mxu0 %v13525_v0  ;;  %v7088_v36 = vld [vmem:[%s13566_s29 + $0x208] sm:$0xff]  ;;  %v7087_v39 = vld [vmem:[%s13566_s29 + $0x200] sm:$0xff]  ;;  %v7090_v42 = vld [vmem:[%s13566_s29 + $0x218] sm:$0xff] }
  0x1d   :  { %v101_v37 = vld [vmem:[%s13566_s29 + $0x88] sm:$0xff]  ;;  %v100_v40 = vld [vmem:[%s13566_s29 + $0x80] sm:$0xff]  ;;  %v103_v43 = vld [vmem:[%s13566_s29 + $0x98] sm:$0xff] }
  0x1e   :  { %v7089_v44 = vld [vmem:[%s13566_s29 + $0x210] sm:$0xff]  ;;  %v105_v48 = vld [vmem:[%s13566_s29 + $0xa8] sm:$0xff]  ;;  %v7091_v49 = vld [vmem:[%s13566_s29 + $0x220] sm:$0xff] }
  0x1f   :  { %8972 = vmatpush1.bf16.msra.mxu1 %v10146_v19  ;;  %8930 = vmatpush1.bf16.msra.mxu0 %v10146_v19  ;;  %v102_v45 = vld [vmem:[%s13566_s29 + $0x90] sm:$0xff]  ;;  %v104_v50 = vld [vmem:[%s13566_s29 + $0xa0] sm:$0xff]  ;;  %v7094_v51 = vld [vmem:[%s13566_s29 + $0x238] sm:$0xff] }
  0x20   :  { %8973 = vmatprep.subr.bf16.mxu1 %v13525_v0  ;;  %8931 = vmatprep.subr.bf16.mxu0 %v13525_v0  ;;  %v108_v58 = vld [vmem:[%s13566_s29 + $0xc0] sm:$0xff]  ;;  %v7098_v59 = vld [vmem:[%s13566_s29 + $0x258] sm:$0xff] }
  0x23   :  { %8975 = vmatpush1.bf16.msra.mxu1 %v10158_v22  ;;  %8933 = vmatpush1.bf16.msra.mxu0 %v10158_v22 }
  0x24   :  { %8976 = vmatprep.subr.bf16.mxu1 %v13525_v0  ;;  %8934 = vmatprep.subr.bf16.mxu0 %v13525_v0 }
  0x27   :  { %8978 = vmatpush1.bf16.msra.mxu1 %v10174_v26  ;;  %8936 = vmatpush1.bf16.msra.mxu0 %v10174_v26 }
  0x28   :  { %8979 = vmatprep.subr.bf16.mxu1 %v13525_v0  ;;  %8937 = vmatprep.subr.bf16.mxu0 %v13525_v0 }
  0x2b   :  { %8981 = vmatpush1.bf16.msra.mxu1 %v10186_v29  ;;  %8939 = vmatpush1.bf16.msra.mxu0 %v10186_v29 }
  0x2c   :  { %8982 = vmatprep.subr.bf16.mxu1 %v13525_v0  ;;  %8940 = vmatprep.subr.bf16.mxu0 %v13525_v0 }
  0x2f   :  { %8984 = vmatpush1.bf16.msra.mxu1 %v10198_v32  ;;  %8942 = vmatpush1.bf16.msra.mxu0 %v10198_v32 }
  0x30   :  { %8985 = vmatprep.subr.bf16.mxu1 %v13525_v0  ;;  %8943 = vmatprep.subr.bf16.mxu0 %v13525_v0 }
  0x33   :  { %8987 = vmatpush1.bf16.msra.mxu1 %v10210_v35  ;;  %8945 = vmatpush1.bf16.msra.mxu0 %v10210_v35 }
  0x34   :  { %8988 = vmatprep.subr.bf16.mxu1 %v13525_v0  ;;  %8946 = vmatprep.subr.bf16.mxu0 %v13525_v0 }
  0x37   :  { %8990 = vmatpush1.bf16.msra.mxu1 %v10222_v38  ;;  %8948 = vmatpush1.bf16.msra.mxu0 %v10222_v38 }
  0x38   :  { %8991 = vmatprep.subr.bf16.mxu1 %v13525_v0  ;;  %8949 = vmatprep.subr.bf16.mxu0 %v13525_v0 }
  0x3b   :  { %8993 = vmatpush1.bf16.msra.mxu1 %v10234_v41  ;;  %8951 = vmatpush1.bf16.msra.mxu0 %v10234_v41 }
  0x3c   :  { %8994 = vmatprep.subr.bf16.mxu1 %v13525_v0  ;;  %8952 = vmatprep.subr.bf16.mxu0 %v13525_v0 }
  0x3f   :  { %8996 = vmatpush1.bf16.msra.mxu1 %v10252_v46  ;;  %8954 = vmatpush1.bf16.msra.mxu0 %v10252_v46 }
  0x40   :  { %9017 = vmatprep.subr.bf16.mxu1 %v13525_v0  ;;  %8998 = vmatprep.subr.bf16.mxu0 %v8997_v47  ;;  %v7092_v47 = vld [vmem:[%s13566_s29 + $0x228] sm:$0xff] }
  0x42   :  { %584 = vmatmul.mubr.f32.vlgmr.msra.gmra.mrb[0].mxu1 %v7071_v52  ;;  %270 = vmatmul.mubr.f32.vlgmr.msra.gmra.mrb[0].mxu0 %v84_v53  ;;  %v107_v52 = vld [vmem:[%s13566_s29 + $0xb8] sm:$0xff]  ;;  %v7093_v53 = vld [vmem:[%s13566_s29 + $0x230] sm:$0xff] }
  0x43   :  { %7120 = vmatprep.mubr.msk.f32.mxu1 %vm132_vm0, %v7074_v54  ;;  %7048 = vmatprep.mubr.msk.f32.mxu0 %vm132_vm0, %v87_v55  ;;  %v106_v54 = vld [vmem:[%s13566_s29 + $0xb0] sm:$0xff]  ;;  %v7096_v55 = vld [vmem:[%s13566_s29 + $0x248] sm:$0xff] }
  0x44   :  { %9019 = vmatpush1.bf16.msra.mxu1 %v10088_v4  ;;  %9000 = vmatpush1.bf16.msra.mxu0 %v8999_v56  ;;  %v109_v56 = vld [vmem:[%s13566_s29 + $0xc8] sm:$0xff] }
  0x45   :  { %9020 = vmatprep.subr.bf16.mxu1 %v13525_v0  ;;  %9003 = vmatprep.subr.msk.bf16.mxu0 %vm10290_vm3, %v9001_v57  ;;  %v7095_v57 = vld [vmem:[%s13566_s29 + $0x240] sm:$0xff] }
  0x46   :  { %589 = vmatmul.mubr.f32.gmra.mrb[2].mxu1 %v7073_v61  ;;  %275 = vmatmul.mubr.f32.gmra.mrb[2].mxu0 %v86_v62  ;;  %v111_v61 = vld [vmem:[%s13566_s29 + $0xd8] sm:$0xff]  ;;  %v7097_v62 = vld [vmem:[%s13566_s29 + $0x250] sm:$0xff] }
  0x47   :  { %7121 = vmatprep.mubr.msk.f32.mxu1 %vm132_vm0, %v7076_v63  ;;  %7049 = vmatprep.mubr.msk.f32.mxu0 %vm132_vm0, %v89_v1  ;;  %v110_v63 = vld [vmem:[%s13566_s29 + $0xd0] sm:$0xff]  ;;  %v7100_v1 = vld [vmem:[%s13566_s29 + $0x268] sm:$0xff] }
  0x48   :  { %9022 = vmatpush1.bf16.msra.mxu1 %v10094_v6  ;;  %9006 = vmatpush1.bf16.msk.msra.mxu0 %vm10290_vm3, %v9004_v2  ;;  %v113_v2 = vld [vmem:[%s13566_s29 + $0xe8] sm:$0xff] }
  0x49   :  { %9023 = vmatprep.subr.bf16.mxu1 %v13525_v0 }
  0x4a   :  { %594 = vmatmul.mubr.f32.gmra.mrb[4].mxu1 %v7075_v3  ;;  %280 = vmatmul.mubr.f32.gmra.mrb[4].mxu0 %v88_v5  ;;  %v7099_v3 = vld [vmem:[%s13566_s29 + $0x260] sm:$0xff] }
  0x4b   :  { %7122 = vmatprep.mubr.msk.f32.mxu1 %vm132_vm0, %v7078_v7  ;;  %7050 = vmatprep.mubr.msk.f32.mxu0 %vm132_vm0, %v91_v8  ;;  %v112_v5 = vld [vmem:[%s13566_s29 + $0xe0] sm:$0xff]  ;;  %v7102_v7 = vld [vmem:[%s13566_s29 + $0x278] sm:$0xff] }
  0x4c   :  { %9025 = vmatpush1.bf16.msra.mxu1 %v10106_v9  ;;  %v115_v8 = vld [vmem:[%s13566_s29 + $0xf8] sm:$0xff] }
  0x4d   :  { %9026 = vmatprep.subr.bf16.mxu1 %v13525_v0 }
  0x4e   :  { %599 = vmatmul.mubr.f32.gmra.mrb[6].mxu1 %v7077_v10  ;;  %285 = vmatmul.mubr.f32.gmra.mrb[6].mxu0 %v90_v11  ;;  %v7101_v10 = vld [vmem:[%s13566_s29 + $0x270] sm:$0xff] }
  0x4f   :  { %7123 = vmatprep.mubr.msk.f32.mxu1 %vm132_vm0, %v7080_v12  ;;  %7051 = vmatprep.mubr.msk.f32.mxu0 %vm132_vm0, %v93_v14  ;;  %v114_v11 = vld [vmem:[%s13566_s29 + $0xf0] sm:$0xff]  ;;  %v7104_v12 = vld [vmem:[%s13566_s29 + $0x288] sm:$0xff] }
  0x50   :  { %9028 = vmatpush1.bf16.msra.mxu1 %v10122_v13  ;;  %v117_v14 = vld [vmem:[%s13566_s29 + $0x108] sm:$0xff] }
  0x51   :  { %9029 = vmatprep.subr.bf16.mxu1 %v13525_v0 }
  0x52   :  { %604 = vmatmul.mubr.f32.gmra.mrb[8].mxu1 %v7079_v15  ;;  %290 = vmatmul.mubr.f32.gmra.mrb[8].mxu0 %v92_v17  ;;  %v7103_v15 = vld [vmem:[%s13566_s29 + $0x280] sm:$0xff] }
  0x53   :  { %7124 = vmatprep.mubr.msk.f32.mxu1 %vm132_vm0, %v7082_v18  ;;  %7052 = vmatprep.mubr.msk.f32.mxu0 %vm132_vm0, %v95_v20  ;;  %v116_v17 = vld [vmem:[%s13566_s29 + $0x100] sm:$0xff]  ;;  %v7106_v18 = vld [vmem:[%s13566_s29 + $0x298] sm:$0xff] }
  0x54   :  { %9031 = vmatpush1.bf16.msra.mxu1 %v10134_v16  ;;  %v119_v20 = vld [vmem:[%s13566_s29 + $0x118] sm:$0xff] }
  0x55   :  { %9032 = vmatprep.subr.bf16.mxu1 %v13525_v0 }
  0x56   :  { %609 = vmatmul.mubr.f32.gmra.mrb[10].mxu1 %v7081_v21  ;;  %295 = vmatmul.mubr.f32.gmra.mrb[10].mxu0 %v94_v23  ;;  %v7105_v21 = vld [vmem:[%s13566_s29 + $0x290] sm:$0xff] }
  0x57   :  { %7125 = vmatprep.mubr.msk.f32.mxu1 %vm132_vm0, %v7084_v24  ;;  %7053 = vmatprep.mubr.msk.f32.mxu0 %vm132_vm0, %v97_v25  ;;  %v118_v23 = vld [vmem:[%s13566_s29 + $0x110] sm:$0xff]  ;;  %v7108_v24 = vld [vmem:[%s13566_s29 + $0x2a8] sm:$0xff] }
  0x58   :  { %9034 = vmatpush1.bf16.msra.mxu1 %v10146_v19  ;;  %v121_v25 = vld [vmem:[%s13566_s29 + $0x128] sm:$0xff] }
  0x59   :  { %9035 = vmatprep.subr.bf16.mxu1 %v13525_v0 }
  0x5a   :  { %614 = vmatmul.mubr.f32.gmra.mrb[12].mxu1 %v7083_v27  ;;  %300 = vmatmul.mubr.f32.gmra.mrb[12].mxu0 %v96_v28  ;;  %v7107_v27 = vld [vmem:[%s13566_s29 + $0x2a0] sm:$0xff] }
  0x5b   :  { %7126 = vmatprep.mubr.msk.f32.mxu1 %vm132_vm0, %v7086_v30  ;;  %7054 = vmatprep.mubr.msk.f32.mxu0 %vm132_vm0, %v99_v31  ;;  %v120_v28 = vld [vmem:[%s13566_s29 + $0x120] sm:$0xff]  ;;  %v7110_v30 = vld [vmem:[%s13566_s29 + $0x2b8] sm:$0xff] }
  0x5c   :  { %9037 = vmatpush1.bf16.msra.mxu1 %v10158_v22  ;;  %v123_v31 = vld [vmem:[%s13566_s29 + $0x138] sm:$0xff] }
  0x5d   :  { %9038 = vmatprep.subr.bf16.mxu1 %v13525_v0 }
  0x5e   :  { %619 = vmatmul.mubr.f32.gmra.mrb[14].mxu1 %v7085_v33  ;;  %305 = vmatmul.mubr.f32.gmra.mrb[14].mxu0 %v98_v34  ;;  %v7109_v33 = vld [vmem:[%s13566_s29 + $0x2b0] sm:$0xff] }
  0x5f   :  { %7127 = vmatprep.mubr.msk.f32.mxu1 %vm132_vm0, %v7088_v36  ;;  %7055 = vmatprep.mubr.msk.f32.mxu0 %vm132_vm0, %v101_v37  ;;  %v122_v34 = vld [vmem:[%s13566_s29 + $0x130] sm:$0xff]  ;;  %v7112_v36 = vld [vmem:[%s13566_s29 + $0x2c8] sm:$0xff] }
  0x60   :  { %9040 = vmatpush1.bf16.msra.mxu1 %v10174_v26  ;;  %v125_v37 = vld [vmem:[%s13566_s29 + $0x148] sm:$0xff] }
  0x61   :  { %9041 = vmatprep.subr.bf16.mxu1 %v13525_v0 }
  0x62   :  { %624 = vmatmul.mubr.f32.gmra.mrb[16].mxu1 %v7087_v39  ;;  %310 = vmatmul.mubr.f32.gmra.mrb[16].mxu0 %v100_v40  ;;  %v7111_v39 = vld [vmem:[%s13566_s29 + $0x2c0] sm:$0xff] }
  0x63   :  { %7128 = vmatprep.mubr.msk.f32.mxu1 %vm132_vm0, %v7090_v42  ;;  %7056 = vmatprep.mubr.msk.f32.mxu0 %vm132_vm0, %v103_v43  ;;  %v124_v40 = vld [vmem:[%s13566_s29 + $0x140] sm:$0xff]  ;;  %v7114_v42 = vld [vmem:[%s13566_s29 + $0x2d8] sm:$0xff] }
  0x64   :  { %9043 = vmatpush1.bf16.msra.mxu1 %v10186_v29  ;;  %v127_v43 = vld [vmem:[%s13566_s29 + $0x158] sm:$0xff] }
  0x65   :  { %9044 = vmatprep.subr.bf16.mxu1 %v13525_v0 }
  0x66   :  { %629 = vmatmul.mubr.f32.gmra.mrb[18].mxu1 %v7089_v44  ;;  %315 = vmatmul.mubr.f32.gmra.mrb[18].mxu0 %v102_v45  ;;  %v7113_v44 = vld [vmem:[%s13566_s29 + $0x2d0] sm:$0xff] }
  0x67   :  { %7129 = vmatprep.mubr.msk.f32.mxu1 %vm132_vm0, %v7092_v47  ;;  %7057 = vmatprep.mubr.msk.f32.mxu0 %vm132_vm0, %v105_v48  ;;  %v126_v45 = vld [vmem:[%s13566_s29 + $0x150] sm:$0xff]  ;;  %v7116_v47 = vld [vmem:[%s13566_s29 + $0x2e8] sm:$0xff] }
  0x68   :  { %9046 = vmatpush1.bf16.msra.mxu1 %v10198_v32  ;;  %v129_v48 = vld [vmem:[%s13566_s29 + $0x168] sm:$0xff] }
  0x69   :  { %9047 = vmatprep.subr.bf16.mxu1 %v13525_v0 }
  0x6a   :  { %634 = vmatmul.mubr.f32.gmra.mrb[20].mxu1 %v7091_v49  ;;  %320 = vmatmul.mubr.f32.gmra.mrb[20].mxu0 %v104_v50  ;;  %v7115_v49 = vld [vmem:[%s13566_s29 + $0x2e0] sm:$0xff] }
  0x6b   :  { %7130 = vmatprep.mubr.msk.f32.mxu1 %vm132_vm0, %v7094_v51  ;;  %7058 = vmatprep.mubr.msk.f32.mxu0 %vm132_vm0, %v107_v52  ;;  %v128_v50 = vld [vmem:[%s13566_s29 + $0x160] sm:$0xff]  ;;  %v7118_v51 = vld [vmem:[%s13566_s29 + $0x2f8] sm:$0xff] }
  0x6c   :  { %9049 = vmatpush1.bf16.msra.mxu1 %v10210_v35  ;;  %v131_v52 = vld [vmem:[%s13566_s29 + $0x178] sm:$0xff] }
  0x6d   :  { %9050 = vmatprep.subr.bf16.mxu1 %v13525_v0 }
  0x6e   :  { %639 = vmatmul.mubr.f32.gmra.mrb[22].mxu1 %v7093_v53  ;;  %325 = vmatmul.mubr.f32.gmra.mrb[22].mxu0 %v106_v54  ;;  %v391_v53 = vld [vmem:[%s13505_s2 + $0x8] sm:$0xff]  ;;  %v393_v54 = vld [vmem:[%s13505_s2 + $0x18] sm:$0xff] }
  0x6f   :  { %7131 = vmatprep.mubr.msk.f32.mxu1 %vm132_vm0, %v7096_v55  ;;  %7059 = vmatprep.mubr.msk.f32.mxu0 %vm132_vm0, %v109_v56  ;;  %v7117_v55 = vld [vmem:[%s13566_s29 + $0x2f0] sm:$0xff] }
  0x70   :  { %9052 = vmatpush1.bf16.msra.mxu1 %v10222_v38  ;;  %v130_v56 = vld [vmem:[%s13566_s29 + $0x170] sm:$0xff] }
  0x71   :  { %9053 = vmatprep.subr.bf16.mxu1 %v13525_v0 }
  0x72   :  { %644 = vmatmul.mubr.f32.gmra.mrb[24].mxu1 %v7095_v57  ;;  %330 = vmatmul.mubr.f32.gmra.mrb[24].mxu0 %v108_v58  ;;  %v9007_v57 = vpack.c.bf16 %v393_v54, %v391_v53  ;;  %v7204_v58 = vld [vmem:[%s13566_s29 + $0x308] sm:$0xff]  ;;  %v7246_v53 = vld [vmem:[%s13566_s29 + $0x458] sm:$0xff]  ;;  %v7245_v54 = vld [vmem:[%s13566_s29 + $0x450] sm:$0xff] }
  0x73   :  { %7132 = vmatprep.mubr.msk.f32.mxu1 %vm132_vm0, %v7098_v59  ;;  %7060 = vmatprep.mubr.msk.f32.mxu0 %vm132_vm0, %v111_v61  ;;  %v7203_v59 = vld [vmem:[%s13566_s29 + $0x300] sm:$0xff]  ;;  %v13523_v61 = vmov 0.0  }
  0x74   :  { %9055 = vmatpush1.bf16.msra.mxu1 %v10234_v41  ;;  %9008 = vmatprep.subr.bf16.mxu0 %v9007_v57  ;;  %v7250_v57 = vld [vmem:[%s13566_s29 + $0x478] sm:$0xff] }
  0x75   :  { %9056 = vmatprep.subr.bf16.mxu1 %v13525_v0 }
  0x76   :  { %649 = vmatmul.mubr.f32.gmra.mrb[26].mxu1 %v7097_v62  ;;  %335 = vmatmul.mubr.f32.gmra.mrb[26].mxu0 %v110_v63  ;;  %v7206_v62 = vld [vmem:[%s13566_s29 + $0x318] sm:$0xff]  ;;  %v7205_v63 = vld [vmem:[%s13566_s29 + $0x310] sm:$0xff] }
  0x77   :  { %7133 = vmatprep.mubr.msk.f32.mxu1 %vm132_vm0, %v7100_v1  ;;  %7061 = vmatprep.mubr.msk.f32.mxu0 %vm132_vm0, %v113_v2  ;;  %v7208_v1 = vld [vmem:[%s13566_s29 + $0x328] sm:$0xff]  ;;  %v7207_v2 = vld [vmem:[%s13566_s29 + $0x320] sm:$0xff] }
  0x78   :  { %9058 = vmatpush1.bf16.msra.mxu1 %v10252_v46 }
  0x79   :  { %9069 = vmatprep.subr.bf16.mxu1 %v13525_v0 }
  0x7a   :  { %654 = vmatmul.mubr.f32.gmra.mrb[28].mxu1 %v7099_v3  ;;  %340 = vmatmul.mubr.f32.gmra.mrb[28].mxu0 %v112_v5  ;;  %v7210_v3 = vld [vmem:[%s13566_s29 + $0x338] sm:$0xff]  ;;  %v7209_v5 = vld [vmem:[%s13566_s29 + $0x330] sm:$0xff] }
  0x7b   :  { %7134 = vmatprep.mubr.msk.f32.mxu1 %vm132_vm0, %v7102_v7  ;;  %7062 = vmatprep.mubr.msk.f32.mxu0 %vm132_vm0, %v115_v8  ;;  %v7212_v7 = vld [vmem:[%s13566_s29 + $0x348] sm:$0xff]  ;;  %v7211_v8 = vld [vmem:[%s13566_s29 + $0x340] sm:$0xff] }
  0x7e   :  { %659 = vmatmul.mubr.f32.gmra.mrb[30].mxu1 %v7101_v10  ;;  %345 = vmatmul.mubr.f32.gmra.mrb[30].mxu0 %v114_v11  ;;  %v7214_v10 = vld [vmem:[%s13566_s29 + $0x358] sm:$0xff]  ;;  %v7213_v11 = vld [vmem:[%s13566_s29 + $0x350] sm:$0xff] }
  0x7f   :  { %7135 = vmatprep.mubr.msk.f32.mxu1 %vm132_vm0, %v7104_v12  ;;  %7063 = vmatprep.mubr.msk.f32.mxu0 %vm132_vm0, %v117_v14  ;;  %v7216_v12 = vld [vmem:[%s13566_s29 + $0x368] sm:$0xff]  ;;  %v7215_v14 = vld [vmem:[%s13566_s29 + $0x360] sm:$0xff] }
  0x82   :  { %664 = vmatmul.mubr.f32.gmra.mrb[32].mxu1 %v7103_v15  ;;  %350 = vmatmul.mubr.f32.gmra.mrb[32].mxu0 %v116_v17  ;;  %v7218_v15 = vld [vmem:[%s13566_s29 + $0x378] sm:$0xff]  ;;  %v7217_v17 = vld [vmem:[%s13566_s29 + $0x370] sm:$0xff] }
  0x83   :  { %7136 = vmatprep.mubr.msk.f32.mxu1 %vm132_vm0, %v7106_v18  ;;  %7064 = vmatprep.mubr.msk.f32.mxu0 %vm132_vm0, %v119_v20  ;;  %v7220_v18 = vld [vmem:[%s13566_s29 + $0x388] sm:$0xff]  ;;  %v7219_v20 = vld [vmem:[%s13566_s29 + $0x380] sm:$0xff] }
  0x86   :  { %669 = vmatmul.mubr.f32.gmra.mrb[34].mxu1 %v7105_v21  ;;  %355 = vmatmul.mubr.f32.gmra.mrb[34].mxu0 %v118_v23  ;;  %v7222_v21 = vld [vmem:[%s13566_s29 + $0x398] sm:$0xff]  ;;  %v7221_v23 = vld [vmem:[%s13566_s29 + $0x390] sm:$0xff] }
  0x87   :  { %7137 = vmatprep.mubr.msk.f32.mxu1 %vm132_vm0, %v7108_v24  ;;  %7065 = vmatprep.mubr.msk.f32.mxu0 %vm132_vm0, %v121_v25  ;;  %v7224_v24 = vld [vmem:[%s13566_s29 + $0x3a8] sm:$0xff]  ;;  %v7223_v25 = vld [vmem:[%s13566_s29 + $0x3a0] sm:$0xff] }
  0x8a   :  { %674 = vmatmul.mubr.f32.gmra.mrb[36].mxu1 %v7107_v27  ;;  %360 = vmatmul.mubr.f32.gmra.mrb[36].mxu0 %v120_v28  ;;  %v7226_v27 = vld [vmem:[%s13566_s29 + $0x3b8] sm:$0xff]  ;;  %v7225_v28 = vld [vmem:[%s13566_s29 + $0x3b0] sm:$0xff] }
  0x8b   :  { %7138 = vmatprep.mubr.msk.f32.mxu1 %vm132_vm0, %v7110_v30  ;;  %7066 = vmatprep.mubr.msk.f32.mxu0 %vm132_vm0, %v123_v31  ;;  %v7228_v30 = vld [vmem:[%s13566_s29 + $0x3c8] sm:$0xff]  ;;  %v7227_v31 = vld [vmem:[%s13566_s29 + $0x3c0] sm:$0xff] }
  0x8e   :  { %679 = vmatmul.mubr.f32.gmra.mrb[38].mxu1 %v7109_v33  ;;  %365 = vmatmul.mubr.f32.gmra.mrb[38].mxu0 %v122_v34  ;;  %v7230_v33 = vld [vmem:[%s13566_s29 + $0x3d8] sm:$0xff]  ;;  %v7229_v34 = vld [vmem:[%s13566_s29 + $0x3d0] sm:$0xff] }
  0x8f   :  { %7139 = vmatprep.mubr.msk.f32.mxu1 %vm132_vm0, %v7112_v36  ;;  %7067 = vmatprep.mubr.msk.f32.mxu0 %vm132_vm0, %v125_v37  ;;  %v7232_v36 = vld [vmem:[%s13566_s29 + $0x3e8] sm:$0xff]  ;;  %v7231_v37 = vld [vmem:[%s13566_s29 + $0x3e0] sm:$0xff] }
  0x92   :  { %684 = vmatmul.mubr.f32.gmra.mrb[40].mxu1 %v7111_v39  ;;  %370 = vmatmul.mubr.f32.gmra.mrb[40].mxu0 %v124_v40  ;;  %v7234_v39 = vld [vmem:[%s13566_s29 + $0x3f8] sm:$0xff]  ;;  %v7233_v40 = vld [vmem:[%s13566_s29 + $0x3f0] sm:$0xff] }
  0x93   :  { %7140 = vmatprep.mubr.msk.f32.mxu1 %vm132_vm0, %v7114_v42  ;;  %7068 = vmatprep.mubr.msk.f32.mxu0 %vm132_vm0, %v127_v43  ;;  %v7236_v42 = vld [vmem:[%s13566_s29 + $0x408] sm:$0xff]  ;;  %v7235_v43 = vld [vmem:[%s13566_s29 + $0x400] sm:$0xff] }
  0x96   :  { %689 = vmatmul.mubr.f32.gmra.mrb[42].mxu1 %v7113_v44  ;;  %375 = vmatmul.mubr.f32.gmra.mrb[42].mxu0 %v126_v45  ;;  %v7238_v44 = vld [vmem:[%s13566_s29 + $0x418] sm:$0xff]  ;;  %v7237_v45 = vld [vmem:[%s13566_s29 + $0x410] sm:$0xff] }
  0x97   :  { %7141 = vmatprep.mubr.msk.f32.mxu1 %vm132_vm0, %v7116_v47  ;;  %7069 = vmatprep.mubr.msk.f32.mxu0 %vm132_vm0, %v129_v48  ;;  %v7240_v47 = vld [vmem:[%s13566_s29 + $0x428] sm:$0xff]  ;;  %v7239_v48 = vld [vmem:[%s13566_s29 + $0x420] sm:$0xff] }
  0x9a   :  { %694 = vmatmul.mubr.f32.gmra.mrb[44].mxu1 %v7115_v49  ;;  %380 = vmatmul.mubr.f32.gmra.mrb[44].mxu0 %v128_v50  ;;  %v7242_v49 = vld [vmem:[%s13566_s29 + $0x438] sm:$0xff]  ;;  %v7241_v50 = vld [vmem:[%s13566_s29 + $0x430] sm:$0xff] }
  0x9b   :  { %7142 = vmatprep.mubr.msk.f32.mxu1 %vm132_vm0, %v7118_v51  ;;  %7070 = vmatprep.mubr.msk.f32.mxu0 %vm132_vm0, %v131_v52  ;;  %v7244_v51 = vld [vmem:[%s13566_s29 + $0x448] sm:$0xff]  ;;  %v7243_v52 = vld [vmem:[%s13566_s29 + $0x440] sm:$0xff] }
  0x9e   :  { %699 = vmatmul.mubr.f32.gmra.mrb[46].mxu1 %v7117_v55  ;;  %385 = vmatmul.mubr.f32.gmra.mrb[46].mxu0 %v130_v56  ;;  %v7248_v55 = vld [vmem:[%s13566_s29 + $0x468] sm:$0xff]  ;;  %v7247_v56 = vld [vmem:[%s13566_s29 + $0x460] sm:$0xff] }
  0x9f   :  { %7251 = vmatprep.mubr.msk.f32.mxu1 %vm132_vm0, %v7204_v58  ;;  %857 = vmatprep.mubr.f32.mxu0 %v13523_v61  ;;  %v7249_v58 = vld [vmem:[%s13566_s29 + $0x470] sm:$0xff] }
  0xa2   :  { %1475 = vmatmul.mubr.f32.vlgmr.msra.gmra.mrb[48].mxu1 %v7203_v59  ;;  %v7310_v59 = vld [vmem:[%s13566_s29 + $0x488] sm:$0xff] }
  0xa3   :  { %7252 = vmatprep.mubr.msk.f32.mxu1 %vm132_vm0, %v7206_v62  ;;  %9071 = vmatpush1.bf16.msra.mxu1 %v10088_v4  ;;  %v7309_v62 = vld [vmem:[%s13566_s29 + $0x480] sm:$0xff] }
  0xa4   :  { %9072 = vmatprep.subr.bf16.mxu1 %v13525_v0 }
  0xa6   :  { %1480 = vmatmul.mubr.f32.gmra.mrb[50].mxu1 %v7205_v63  ;;  %v7312_v63 = vld [vmem:[%s13566_s29 + $0x498] sm:$0xff] }
  0xa7   :  { %7253 = vmatprep.mubr.msk.f32.mxu1 %vm132_vm0, %v7208_v1  ;;  %9074 = vmatpush1.bf16.msra.mxu1 %v10094_v6  ;;  %v7311_v1 = vld [vmem:[%s13566_s29 + $0x490] sm:$0xff] }
  0xa8   :  { %9075 = vmatprep.subr.bf16.mxu1 %v13525_v0 }
  0xaa   :  { %1485 = vmatmul.mubr.f32.gmra.mrb[52].mxu1 %v7207_v2  ;;  %v7314_v2 = vld [vmem:[%s13566_s29 + $0x4a8] sm:$0xff] }
  0xab   :  { %7254 = vmatprep.mubr.msk.f32.mxu1 %vm132_vm0, %v7210_v3  ;;  %9077 = vmatpush1.bf16.msra.mxu1 %v10106_v9  ;;  %v7313_v3 = vld [vmem:[%s13566_s29 + $0x4a0] sm:$0xff] }
  0xac   :  { %9078 = vmatprep.subr.bf16.mxu1 %v13525_v0 }
  0xae   :  { %1490 = vmatmul.mubr.f32.gmra.mrb[54].mxu1 %v7209_v5  ;;  %v7316_v5 = vld [vmem:[%s13566_s29 + $0x4b8] sm:$0xff] }
  0xaf   :  { %7255 = vmatprep.mubr.msk.f32.mxu1 %vm132_vm0, %v7212_v7  ;;  %9080 = vmatpush1.bf16.msra.mxu1 %v10122_v13  ;;  %v7318_v7 = vld [vmem:[%s13566_s29 + $0x4c8] sm:$0xff] }
  0xb0   :  { %9081 = vmatprep.subr.bf16.mxu1 %v13525_v0 }
  0xb2   :  { %1495 = vmatmul.mubr.f32.gmra.mrb[56].mxu1 %v7211_v8  ;;  %v390_v8 = vld [vmem:[%s13505_s2] sm:$0xff] }
  0xb3   :  { %7256 = vmatprep.mubr.msk.f32.mxu1 %vm132_vm0, %v7214_v10  ;;  %9083 = vmatpush1.bf16.msra.mxu1 %v10134_v16  ;;  %v7320_v10 = vld [vmem:[%s13566_s29 + $0x4d8] sm:$0xff] }
  0xb4   :  { %9084 = vmatprep.subr.bf16.mxu1 %v13525_v0 }
  0xb6   :  { %1500 = vmatmul.mubr.f32.gmra.mrb[58].mxu1 %v7213_v11  ;;  %v395_v11 = vld [vmem:[%s13505_s2 + $0x28] sm:$0xff] }
  0xb7   :  { %7257 = vmatprep.mubr.msk.f32.mxu1 %vm132_vm0, %v7216_v12  ;;  %9086 = vmatpush1.bf16.msra.mxu1 %v10146_v19 }
  0xb8   :  { %9087 = vmatprep.subr.bf16.mxu1 %v13525_v0 }
  0xba   :  { %1505 = vmatmul.mubr.f32.gmra.mrb[60].mxu1 %v7215_v14  ;;  %v7319_v14 = vld [vmem:[%s13566_s29 + $0x4d0] sm:$0xff] }
  0xbb   :  { %7258 = vmatprep.mubr.msk.f32.mxu1 %vm132_vm0, %v7218_v15  ;;  %9089 = vmatpush1.bf16.msra.mxu1 %v10158_v22 }
  0xbc   :  { %9090 = vmatprep.subr.bf16.mxu1 %v13525_v0 }
  0xbe   :  { %1510 = vmatmul.mubr.f32.gmra.mrb[62].mxu1 %v7217_v17  ;;  %v394_v17 = vld [vmem:[%s13505_s2 + $0x20] sm:$0xff] }
  0xbf   :  { %7259 = vmatprep.mubr.msk.f32.mxu1 %vm132_vm0, %v7220_v18  ;;  %9092 = vmatpush1.bf16.msra.mxu1 %v10174_v26  ;;  %v396_v18 = vld [vmem:[%s13505_s2 + $0x30] sm:$0xf] }
  0xc0   :  { %9093 = vmatprep.subr.bf16.mxu1 %v13525_v0 }
  0xc2   :  { %1515 = vmatmul.mubr.f32.gmra.mrb[64].mxu1 %v7219_v20 }
  0xc3   :  { %7260 = vmatprep.mubr.msk.f32.mxu1 %vm132_vm0, %v7222_v21  ;;  %9095 = vmatpush1.bf16.msra.mxu1 %v10186_v29 }
  0xc4   :  { %9096 = vmatprep.subr.bf16.mxu1 %v13525_v0 }
  0xc6   :  { %1520 = vmatmul.mubr.f32.gmra.mrb[66].mxu1 %v7221_v23  ;;  %v7322_v23 = vld [vmem:[%s13566_s29 + $0x4e8] sm:$0xff] }
  0xc7   :  { %7261 = vmatprep.mubr.msk.f32.mxu1 %vm132_vm0, %v7224_v24  ;;  %9098 = vmatpush1.bf16.msra.mxu1 %v10198_v32  ;;  %v7278_v24 = vld [vmem:[%s13505_s2 + $0x98] sm:$0xff] }
  0xc8   :  { %9099 = vmatprep.subr.bf16.mxu1 %v13525_v0 }
  0xca   :  { %1525 = vmatmul.mubr.f32.gmra.mrb[68].mxu1 %v7223_v25 }
  0xcb   :  { %7262 = vmatprep.mubr.msk.f32.mxu1 %vm132_vm0, %v7226_v27  ;;  %9101 = vmatpush1.bf16.msra.mxu1 %v10210_v35 }
  0xcc   :  { %9102 = vmatprep.subr.bf16.mxu1 %v13525_v0 }
  0xce   :  { %1530 = vmatmul.mubr.f32.gmra.mrb[70].mxu1 %v7225_v28  ;;  %v9014_v28 = vpack.c.bf16 %v396_v18, %v394_v17  ;;  %v7337_v18 = vld [vmem:[%s13566_s29 + $0x560] sm:$0xff] }
  0xcf   :  { %7263 = vmatprep.mubr.msk.f32.mxu1 %vm132_vm0, %v7228_v30  ;;  %9104 = vmatpush1.bf16.msra.mxu1 %v10222_v38  ;;  %v7321_v30 = vld [vmem:[%s13566_s29 + $0x4e0] sm:$0xff] }
  0xd0   :  { %9105 = vmatprep.subr.bf16.mxu1 %v13525_v0 }
  0xd2   :  { %1535 = vmatmul.mubr.f32.gmra.mrb[72].mxu1 %v7227_v31 }
  0xd3   :  { %7264 = vmatprep.mubr.msk.f32.mxu1 %vm132_vm0, %v7230_v33  ;;  %9107 = vmatpush1.bf16.msra.mxu1 %v10234_v41 }
  0xd4   :  { %9108 = vmatprep.subr.bf16.mxu1 %v13525_v0 }
  0xd6   :  { %1540 = vmatmul.mubr.f32.gmra.mrb[74].mxu1 %v7229_v34 }
  0xd7   :  { %7265 = vmatprep.mubr.msk.f32.mxu1 %vm132_vm0, %v7232_v36  ;;  %9110 = vmatpush1.bf16.msra.mxu1 %v10252_v46  ;;  %v7324_v36 = vld [vmem:[%s13566_s29 + $0x4f8] sm:$0xff] }
  0xd8   :  { %9121 = vmatprep.subr.bf16.mxu1 %v13525_v0 }
  0xda   :  { %1545 = vmatmul.mubr.f32.gmra.mrb[76].mxu1 %v7231_v37 }
  0xdb   :  { %7266 = vmatprep.mubr.msk.f32.mxu1 %vm132_vm0, %v7234_v39 }
  0xde   :  { %1550 = vmatmul.mubr.f32.gmra.mrb[78].mxu1 %v7233_v40  ;;  %v7323_v40 = vld [vmem:[%s13566_s29 + $0x4f0] sm:$0xff] }
  0xdf   :  { %7267 = vmatprep.mubr.msk.f32.mxu1 %vm132_vm0, %v7236_v42 }
  0xe2   :  { %1555 = vmatmul.mubr.f32.gmra.mrb[80].mxu1 %v7235_v43 }
  0xe3   :  { %7268 = vmatprep.mubr.msk.f32.mxu1 %vm132_vm0, %v7238_v44 }
  0xe6   :  { %1560 = vmatmul.mubr.f32.gmra.mrb[82].mxu1 %v7237_v45 }
  0xe7   :  { %7269 = vmatprep.mubr.msk.f32.mxu1 %vm132_vm0, %v7240_v47  ;;  %v7325_v47 = vld [vmem:[%s13566_s29 + $0x500] sm:$0xff] }
  0xea   :  { %1565 = vmatmul.mubr.f32.gmra.mrb[84].mxu1 %v7239_v48  ;;  %v7328_v48 = vld [vmem:[%s13566_s29 + $0x518] sm:$0xff] }
  0xeb   :  { %7270 = vmatprep.mubr.msk.f32.mxu1 %vm132_vm0, %v7242_v49 }
  0xee   :  { %1570 = vmatmul.mubr.f32.gmra.mrb[86].mxu1 %v7241_v50 }
  0xef   :  { %7271 = vmatprep.mubr.msk.f32.mxu1 %vm132_vm0, %v7244_v51 }
  0xf2   :  { %1575 = vmatmul.mubr.f32.gmra.mrb[88].mxu1 %v7243_v52 }
  0xf3   :  { %7272 = vmatprep.mubr.msk.f32.mxu1 %vm132_vm0, %v7246_v53  ;;  %v7327_v53 = vld [vmem:[%s13566_s29 + $0x510] sm:$0xff] }
  0xf6   :  { %1580 = vmatmul.mubr.f32.gmra.mrb[90].mxu1 %v7245_v54 }
  0xf7   :  { %7273 = vmatprep.mubr.msk.f32.mxu1 %vm132_vm0, %v7248_v55 }
  0xfa   :  { %1585 = vmatmul.mubr.f32.gmra.mrb[92].mxu1 %v7247_v56 }
  0xfb   :  { %7274 = vmatprep.mubr.msk.f32.mxu1 %vm132_vm0, %v7250_v57 }
  0xfe   :  { %1590 = vmatmul.mubr.f32.gmra.mrb[94].mxu1 %v7249_v58  ;;  %v7329_v58 = vld [vmem:[%s13566_s29 + $0x520] sm:$0xff] }
  0xff   :  { %7357 = vmatprep.mubr.msk.f32.mxu1 %vm132_vm0, %v7310_v59 }
 0x102   :  { %2125 = vmatmul.mubr.f32.vlgmr.msra.gmra.mrb[96].mxu1 %v7309_v62 }
 0x103   :  { %7358 = vmatprep.mubr.msk.f32.mxu1 %vm132_vm0, %v7312_v63  ;;  %9123 = vmatpush1.bf16.msra.mxu1 %v10088_v4  ;;  %v7315_v4 = vld [vmem:[%s13566_s29 + $0x4b0] sm:$0xff] }
 0x104   :  { %9124 = vmatprep.subr.bf16.mxu1 %v13525_v0 }
 0x106   :  { %2130 = vmatmul.mubr.f32.gmra.mrb[98].mxu1 %v7311_v1 }
 0x107   :  { %7359 = vmatprep.mubr.msk.f32.mxu1 %vm132_vm0, %v7314_v2  ;;  %9126 = vmatpush1.bf16.msra.mxu1 %v10094_v6  ;;  %v7317_v6 = vld [vmem:[%s13566_s29 + $0x4c0] sm:$0xff]  ;;  %v7331_v2 = vld [vmem:[%s13566_s29 + $0x530] sm:$0xff] }
 0x108   :  { %9127 = vmatprep.subr.bf16.mxu1 %v13525_v0 }
 0x10a   :  { %2135 = vmatmul.mubr.f32.gmra.mrb[100].mxu1 %v7313_v3 }
 0x10b   :  { %7360 = vmatprep.mubr.msk.f32.mxu1 %vm132_vm0, %v7316_v5  ;;  %9129 = vmatpush1.bf16.msra.mxu1 %v10106_v9  ;;  %v392_v9 = vld [vmem:[%s13505_s2 + $0x10] sm:$0xff] }
 0x10c   :  { %9130 = vmatprep.subr.bf16.mxu1 %v13525_v0  ;;  %v9009_v12 = vpack.c.bf16 %v392_v9, %v390_v8 }
 0x10e   :  { %2140 = vmatmul.mubr.f32.gmra.mrb[102].mxu1 %v7315_v4 }
 0x10f   :  { %7361 = vmatprep.mubr.msk.f32.mxu1 %vm132_vm0, %v7318_v7  ;;  %9132 = vmatpush1.bf16.msra.mxu1 %v10122_v13  ;;  %v397_v13 = vld [vmem:[%s13505_s2 + $0x38] sm:$0xf] }
 0x110   :  { %9133 = vmatprep.subr.bf16.mxu1 %v13525_v0  ;;  %v9011_v15 = vpack.c.bf16 %v397_v13, %v395_v11  ;;  %v7335_v13 = vld [vmem:[%s13566_s29 + $0x550] sm:$0xff] }
 0x112   :  { %2145 = vmatmul.mubr.f32.gmra.mrb[104].mxu1 %v7317_v6  ;;  %v7333_v6 = vld [vmem:[%s13566_s29 + $0x540] sm:$0xff] }
 0x113   :  { %7362 = vmatprep.mubr.msk.f32.mxu1 %vm132_vm0, %v7320_v10  ;;  %9135 = vmatpush1.bf16.msra.mxu1 %v10134_v16  ;;  %v7276_v16 = vld [vmem:[%s13505_s2 + $0x88] sm:$0xff] }
 0x114   :  { %9136 = vmatprep.subr.bf16.mxu1 %v13525_v0  ;;  %v9059_v31 = vpack.c.bf16 %v7278_v24, %v7276_v16 }
 0x115   :  { %v585_v20 = vpop.f32.mrb[0].mxu1  ;;  %v10915_v21 = vpop.f32.mrb[0].mxu0 }
 0x116   :  { %v587_v25 = vpop.f32.mrb[1].mxu1  ;;  %7153 = vmatmul.mubr.msk.f32.vlgmr.msra.gmra.mrb[48].mxu0 %vm713_vm4, %v585_v20  ;;  %v273_v27 = vpop.f32.mrb[1].mxu0  ;;  %2150 = vmatmul.mubr.f32.gmra.mrb[106].mxu1 %v7319_v14 }
 0x117   :  { %863 = vmatprep.mubr.f32.mxu0 %v13523_v61  ;;  %9010 = vmatpush1.bf16.msra.mxu0 %v9009_v12  ;;  %v7339_v25 = vld [vmem:[%s13566_s29 + $0x570] sm:$0xff] }
 0x118   :  { %9013 = vmatprep.subr.msk.bf16.mxu0 %vm10290_vm3, %v9011_v15  ;;  %7363 = vmatprep.mubr.msk.f32.mxu1 %vm132_vm0, %v7322_v23 }
 0x119   :  { %v590_v33 = vpop.f32.mrb[2].mxu1  ;;  %v10934_v34 = vpop.f32.mrb[2].mxu0  ;;  %9138 = vmatpush1.bf16.msra.mxu1 %v10146_v19  ;;  %v7326_v19 = vld [vmem:[%s13566_s29 + $0x508] sm:$0xff] }
 0x11a   :  { %v592_v37 = vpop.f32.mrb[3].mxu1  ;;  %7154 = vmatmul.mubr.msk.f32.gmra.mrb[50].mxu0 %vm713_vm4, %v590_v33  ;;  %v278_v39 = vpop.f32.mrb[3].mxu0  ;;  %2155 = vmatmul.mubr.f32.gmra.mrb[108].mxu1 %v7321_v30  ;;  %v7341_v33 = vld [vmem:[%s13566_s29 + $0x580] sm:$0xff] }
 0x11b   :  { %869 = vmatprep.mubr.f32.mxu0 %v13523_v61  ;;  %9016 = vmatpush1.bf16.msk.msra.mxu0 %vm10290_vm3, %v9014_v28 }
 0x11c   :  { %9060 = vmatprep.subr.bf16.mxu0 %v9059_v31  ;;  %7364 = vmatprep.mubr.msk.f32.mxu1 %vm132_vm0, %v7324_v36 }
 0x11d   :  { %v595_v42 = vpop.f32.mrb[4].mxu1  ;;  %v10951_v43 = vpop.f32.mrb[4].mxu0  ;;  %9139 = vmatprep.subr.bf16.mxu1 %v13525_v0 }
 0x11e   :  { %v597_v44 = vpop.f32.mrb[5].mxu1  ;;  %7155 = vmatmul.mubr.msk.f32.gmra.mrb[52].mxu0 %vm713_vm4, %v595_v42  ;;  %v283_v45 = vpop.f32.mrb[5].mxu0  ;;  %2160 = vmatmul.mubr.f32.gmra.mrb[110].mxu1 %v7323_v40  ;;  %v7346_v42 = vld [vmem:[%s13566_s29 + $0x5a8] sm:$0xff] }
 0x11f   :  { %875 = vmatprep.mubr.f32.mxu0 %v13523_v61  ;;  %7365 = vmatprep.mubr.msk.f32.mxu1 %vm132_vm0, %v7326_v19  ;;  %v7343_v19 = vld [vmem:[%s13566_s29 + $0x590] sm:$0xff] }
 0x120   :  { %9141 = vmatpush1.bf16.msra.mxu1 %v10158_v22  ;;  %v7330_v22 = vld [vmem:[%s13566_s29 + $0x528] sm:$0xff] }
 0x121   :  { %v600_v49 = vpop.f32.mrb[6].mxu1  ;;  %v10964_v50 = vpop.f32.mrb[6].mxu0  ;;  %9142 = vmatprep.subr.bf16.mxu1 %v13525_v0 }
 0x122   :  { %v602_v51 = vpop.f32.mrb[7].mxu1  ;;  %7156 = vmatmul.mubr.msk.f32.gmra.mrb[54].mxu0 %vm713_vm4, %v600_v49  ;;  %v288_v52 = vpop.f32.mrb[7].mxu0  ;;  %2165 = vmatmul.mubr.f32.gmra.mrb[112].mxu1 %v7325_v47  ;;  %v7345_v49 = vld [vmem:[%s13566_s29 + $0x5a0] sm:$0xff] }
 0x123   :  { %881 = vmatprep.mubr.f32.mxu0 %v13523_v61  ;;  %7366 = vmatprep.mubr.msk.f32.mxu1 %vm132_vm0, %v7328_v48  ;;  %v7348_v51 = vld [vmem:[%s13566_s29 + $0x5b8] sm:$0xff] }
 0x124   :  { %9144 = vmatpush1.bf16.msra.mxu1 %v10174_v26  ;;  %v7332_v26 = vld [vmem:[%s13566_s29 + $0x538] sm:$0xff] }
 0x125   :  { %v605_v54 = vpop.f32.mrb[8].mxu1  ;;  %v10977_v55 = vpop.f32.mrb[8].mxu0  ;;  %9145 = vmatprep.subr.bf16.mxu1 %v13525_v0 }
 0x126   :  { %v607_v56 = vpop.f32.mrb[9].mxu1  ;;  %7157 = vmatmul.mubr.msk.f32.gmra.mrb[56].mxu0 %vm713_vm4, %v605_v54  ;;  %v293_v57 = vpop.f32.mrb[9].mxu0  ;;  %2170 = vmatmul.mubr.f32.gmra.mrb[114].mxu1 %v7327_v53 }
 0x127   :  { %887 = vmatprep.mubr.f32.mxu0 %v13523_v61  ;;  %7367 = vmatprep.mubr.msk.f32.mxu1 %vm132_vm0, %v7330_v22  ;;  %v7347_v56 = vld [vmem:[%s13566_s29 + $0x5b0] sm:$0xff]  ;;  %v7350_v57 = vld [vmem:[%s13566_s29 + $0x5c8] sm:$0xff] }
 0x128   :  { %9147 = vmatpush1.bf16.msra.mxu1 %v10186_v29  ;;  %v7334_v29 = vld [vmem:[%s13566_s29 + $0x548] sm:$0xff] }
 0x129   :  { %v610_v59 = vpop.f32.mrb[10].mxu1  ;;  %v10990_v62 = vpop.f32.mrb[10].mxu0  ;;  %9148 = vmatprep.subr.bf16.mxu1 %v13525_v0 }
 0x12a   :  { %v612_v63 = vpop.f32.mrb[11].mxu1  ;;  %7158 = vmatmul.mubr.msk.f32.gmra.mrb[58].mxu0 %vm713_vm4, %v610_v59  ;;  %v298_v1 = vpop.f32.mrb[11].mxu0  ;;  %2175 = vmatmul.mubr.f32.gmra.mrb[116].mxu1 %v7329_v58 }
 0x12b   :  { %893 = vmatprep.mubr.f32.mxu0 %v13523_v61  ;;  %7368 = vmatprep.mubr.msk.f32.mxu1 %vm132_vm0, %v7332_v26  ;;  %v7349_v1 = vld [vmem:[%s13566_s29 + $0x5c0] sm:$0xff] }
 0x12c   :  { %9150 = vmatpush1.bf16.msra.mxu1 %v10198_v32  ;;  %v7336_v32 = vld [vmem:[%s13566_s29 + $0x558] sm:$0xff] }
 0x12d   :  { %v615_v3 = vpop.f32.mrb[12].mxu1  ;;  %v11003_v5 = vpop.f32.mrb[12].mxu0  ;;  %9151 = vmatprep.subr.bf16.mxu1 %v13525_v0 }
 0x12e   :  { %v617_v4 = vpop.f32.mrb[13].mxu1  ;;  %7159 = vmatmul.mubr.msk.f32.gmra.mrb[60].mxu0 %vm713_vm4, %v615_v3  ;;  %v303_v7 = vpop.f32.mrb[13].mxu0  ;;  %2180 = vmatmul.mubr.f32.gmra.mrb[118].mxu1 %v7331_v2  ;;  %v7352_v2 = vld [vmem:[%s13566_s29 + $0x5d8] sm:$0xff] }
 0x12f   :  { %899 = vmatprep.mubr.f32.mxu0 %v13523_v61  ;;  %7369 = vmatprep.mubr.msk.f32.mxu1 %vm132_vm0, %v7334_v29 }
 0x130   :  { %9153 = vmatpush1.bf16.msra.mxu1 %v10210_v35  ;;  %v7338_v35 = vld [vmem:[%s13566_s29 + $0x568] sm:$0xff] }
 0x131   :  { %v620_v8 = vpop.f32.mrb[14].mxu1  ;;  %v11016_v9 = vpop.f32.mrb[14].mxu0  ;;  %9154 = vmatprep.subr.bf16.mxu1 %v13525_v0 }
 0x132   :  { %v622_v10 = vpop.f32.mrb[15].mxu1  ;;  %7160 = vmatmul.mubr.msk.f32.gmra.mrb[62].mxu0 %vm713_vm4, %v620_v8  ;;  %v308_v11 = vpop.f32.mrb[15].mxu0  ;;  %2185 = vmatmul.mubr.f32.gmra.mrb[120].mxu1 %v7333_v6  ;;  %v7351_v6 = vld [vmem:[%s13566_s29 + $0x5d0] sm:$0xff] }
 0x133   :  { %905 = vmatprep.mubr.f32.mxu0 %v13523_v61  ;;  %7370 = vmatprep.mubr.msk.f32.mxu1 %vm132_vm0, %v7336_v32  ;;  %v7354_v32 = vld [vmem:[%s13566_s29 + $0x5e8] sm:$0xff] }
 0x134   :  { %9156 = vmatpush1.bf16.msra.mxu1 %v10222_v38  ;;  %v7340_v38 = vld [vmem:[%s13566_s29 + $0x578] sm:$0xff] }
 0x135   :  { %v625_v12 = vpop.f32.mrb[16].mxu1  ;;  %v11029_v14 = vpop.f32.mrb[16].mxu0  ;;  %9157 = vmatprep.subr.bf16.mxu1 %v13525_v0 }
 0x136   :  { %v627_v15 = vpop.f32.mrb[17].mxu1  ;;  %7161 = vmatmul.mubr.msk.f32.gmra.mrb[64].mxu0 %vm713_vm4, %v625_v12  ;;  %v313_v17 = vpop.f32.mrb[17].mxu0  ;;  %2190 = vmatmul.mubr.f32.gmra.mrb[122].mxu1 %v7335_v13  ;;  %v7356_v12 = vld [vmem:[%s13566_s29 + $0x5f8] sm:$0xff] }
 0x137   :  { %911 = vmatprep.mubr.f32.mxu0 %v13523_v61  ;;  %7371 = vmatprep.mubr.msk.f32.mxu1 %vm132_vm0, %v7338_v35  ;;  %v7353_v35 = vld [vmem:[%s13566_s29 + $0x5e0] sm:$0xff] }
 0x138   :  { %9159 = vmatpush1.bf16.msra.mxu1 %v10234_v41  ;;  %v7342_v41 = vld [vmem:[%s13566_s29 + $0x588] sm:$0xff] }
 0x139   :  { %v630_v20 = vpop.f32.mrb[18].mxu1  ;;  %v11042_v23 = vpop.f32.mrb[18].mxu0  ;;  %9160 = vmatprep.subr.bf16.mxu1 %v13525_v0 }
 0x13a   :  { %v632_v16 = vpop.f32.mrb[19].mxu1  ;;  %7162 = vmatmul.mubr.msk.f32.gmra.mrb[66].mxu0 %vm713_vm4, %v630_v20  ;;  %v318_v24 = vpop.f32.mrb[19].mxu0  ;;  %2195 = vmatmul.mubr.f32.gmra.mrb[124].mxu1 %v7337_v18  ;;  %v7355_v20 = vld [vmem:[%s13566_s29 + $0x5f0] sm:$0xff] }
 0x13b   :  { %917 = vmatprep.mubr.f32.mxu0 %v13523_v61  ;;  %7372 = vmatprep.mubr.msk.f32.mxu1 %vm132_vm0, %v7340_v38  ;;  %v7416_v16 = vld [vmem:[%s13566_s29 + $0x608] sm:$0xff] }
 0x13c   :  { %9162 = vmatpush1.bf16.msra.mxu1 %v10252_v46  ;;  %v7344_v46 = vld [vmem:[%s13566_s29 + $0x598] sm:$0xff] }
 0x13d   :  { %v635_v27 = vpop.f32.mrb[20].mxu1  ;;  %v11055_v28 = vpop.f32.mrb[20].mxu0  ;;  %9173 = vmatprep.subr.bf16.mxu1 %v13525_v0 }
 0x13e   :  { %v637_v30 = vpop.f32.mrb[21].mxu1  ;;  %7163 = vmatmul.mubr.msk.f32.gmra.mrb[68].mxu0 %vm713_vm4, %v635_v27  ;;  %v323_v31 = vpop.f32.mrb[21].mxu0  ;;  %2200 = vmatmul.mubr.f32.gmra.mrb[126].mxu1 %v7339_v25 }
 0x13f   :  { %923 = vmatprep.mubr.f32.mxu0 %v13523_v61  ;;  %7373 = vmatprep.mubr.msk.f32.mxu1 %vm132_vm0, %v7342_v41  ;;  %v7415_v30 = vld [vmem:[%s13566_s29 + $0x600] sm:$0xff]  ;;  %v7418_v31 = vld [vmem:[%s13566_s29 + $0x618] sm:$0xff] }
 0x141   :  { %v640_v36 = vpop.f32.mrb[22].mxu1  ;;  %v11067_v37 = vpop.f32.mrb[22].mxu0 }
 0x142   :  { %v642_v39 = vpop.f32.mrb[23].mxu1  ;;  %7164 = vmatmul.mubr.msk.f32.gmra.mrb[70].mxu0 %vm713_vm4, %v640_v36  ;;  %v328_v40 = vpop.f32.mrb[23].mxu0  ;;  %2205 = vmatmul.mubr.f32.gmra.mrb[128].mxu1 %v7341_v33 }
 0x143   :  { %929 = vmatprep.mubr.f32.mxu0 %v13523_v61  ;;  %7374 = vmatprep.mubr.msk.f32.mxu1 %vm132_vm0, %v7344_v46  ;;  %v7417_v40 = vld [vmem:[%s13566_s29 + $0x610] sm:$0xff] }
 0x145   :  { %v645_v44 = vpop.f32.mrb[24].mxu1  ;;  %v11078_v45 = vpop.f32.mrb[24].mxu0 }
 0x146   :  { %v647_v47 = vpop.f32.mrb[25].mxu1  ;;  %7165 = vmatmul.mubr.msk.f32.gmra.mrb[72].mxu0 %vm713_vm4, %v645_v44  ;;  %v333_v48 = vpop.f32.mrb[25].mxu0  ;;  %2210 = vmatmul.mubr.f32.gmra.mrb[130].mxu1 %v7343_v19  ;;  %v7420_v19 = vld [vmem:[%s13566_s29 + $0x628] sm:$0xff] }
 0x147   :  { %935 = vmatprep.mubr.f32.mxu0 %v13523_v61  ;;  %7375 = vmatprep.mubr.msk.f32.mxu1 %vm132_vm0, %v7346_v42 }
 0x149   :  { %v650_v52 = vpop.f32.mrb[26].mxu1  ;;  %v11089_v53 = vpop.f32.mrb[26].mxu0 }
 0x14a   :  { %v652_v22 = vpop.f32.mrb[27].mxu1  ;;  %7166 = vmatmul.mubr.msk.f32.gmra.mrb[74].mxu0 %vm713_vm4, %v650_v52  ;;  %v338_v54 = vpop.f32.mrb[27].mxu0  ;;  %2215 = vmatmul.mubr.f32.gmra.mrb[132].mxu1 %v7345_v49  ;;  %v7419_v49 = vld [vmem:[%s13566_s29 + $0x620] sm:$0xff] }
 0x14b   :  { %941 = vmatprep.mubr.f32.mxu0 %v13523_v61  ;;  %7376 = vmatprep.mubr.msk.f32.mxu1 %vm132_vm0, %v7348_v51  ;;  %v7422_v51 = vld [vmem:[%s13566_s29 + $0x638] sm:$0xff] }
 0x14d   :  { %v655_v58 = vpop.f32.mrb[28].mxu1  ;;  %v11100_v26 = vpop.f32.mrb[28].mxu0 }
 0x14e   :  { %v657_v59 = vpop.f32.mrb[29].mxu1  ;;  %7167 = vmatmul.mubr.msk.f32.gmra.mrb[76].mxu0 %vm713_vm4, %v655_v58  ;;  %v343_v63 = vpop.f32.mrb[29].mxu0  ;;  %2220 = vmatmul.mubr.f32.gmra.mrb[134].mxu1 %v7347_v56  ;;  %v7424_v58 = vld [vmem:[%s13566_s29 + $0x648] sm:$0xff] }
 0x14f   :  { %947 = vmatprep.mubr.f32.mxu0 %v13523_v61  ;;  %7377 = vmatprep.mubr.msk.f32.mxu1 %vm132_vm0, %v7350_v57  ;;  %v7421_v57 = vld [vmem:[%s13566_s29 + $0x630] sm:$0xff] }
 0x151   :  { %v660_v29 = vpop.f32.mrb[30].mxu1  ;;  %v11111_v3 = vpop.f32.mrb[30].mxu0 }
 0x152   :  { %v662_v4 = vpop.f32.mrb[31].mxu1  ;;  %7168 = vmatmul.mubr.msk.f32.gmra.mrb[78].mxu0 %vm713_vm4, %v660_v29  ;;  %v348_v7 = vpop.f32.mrb[31].mxu0  ;;  %2225 = vmatmul.mubr.f32.gmra.mrb[136].mxu1 %v7349_v1  ;;  %v7423_v29 = vld [vmem:[%s13566_s29 + $0x640] sm:$0xff] }
 0x153   :  { %953 = vmatprep.mubr.f32.mxu0 %v13523_v61  ;;  %7378 = vmatprep.mubr.msk.f32.mxu1 %vm132_vm0, %v7352_v2  ;;  %v7275_v4 = vld [vmem:[%s13505_s2 + $0x80] sm:$0xff]  ;;  %v7277_v7 = vld [vmem:[%s13505_s2 + $0x90] sm:$0xff] }
 0x155   :  { %v665_v8 = vpop.f32.mrb[32].mxu1  ;;  %v11122_v10 = vpop.f32.mrb[32].mxu0 }
 0x156   :  { %v667_v11 = vpop.f32.mrb[33].mxu1  ;;  %7169 = vmatmul.mubr.msk.f32.gmra.mrb[80].mxu0 %vm713_vm4, %v665_v8  ;;  %v353_v13 = vpop.f32.mrb[33].mxu0  ;;  %2230 = vmatmul.mubr.f32.gmra.mrb[138].mxu1 %v7351_v6  ;;  %v7426_v6 = vld [vmem:[%s13566_s29 + $0x658] sm:$0xff]  ;;  %v7280_v8 = vld [vmem:[%s13505_s2 + $0xa8] sm:$0xff] }
 0x157   :  { %959 = vmatprep.mubr.f32.mxu0 %v13523_v61  ;;  %7379 = vmatprep.mubr.msk.f32.mxu1 %vm132_vm0, %v7354_v32  ;;  %v7282_v11 = vld [vmem:[%s13505_s2 + $0xb8] sm:$0xf] }
 0x159   :  { %v670_v15 = vpop.f32.mrb[34].mxu1  ;;  %v11133_v17 = vpop.f32.mrb[34].mxu0 }
 0x15a   :  { %v672_v18 = vpop.f32.mrb[35].mxu1  ;;  %7170 = vmatmul.mubr.msk.f32.gmra.mrb[82].mxu0 %vm713_vm4, %v670_v15  ;;  %v358_v38 = vpop.f32.mrb[35].mxu0  ;;  %2235 = vmatmul.mubr.f32.gmra.mrb[140].mxu1 %v7353_v35  ;;  %v9061_v15 = vpack.c.bf16 %v7277_v7, %v7275_v4  ;;  %v7439_v7 = vld [vmem:[%s13566_s29 + $0x6c0] sm:$0xff] }
 0x15b   :  { %965 = vmatprep.mubr.f32.mxu0 %v13523_v61  ;;  %7380 = vmatprep.mubr.msk.f32.mxu1 %vm132_vm0, %v7356_v12  ;;  %v7425_v18 = vld [vmem:[%s13566_s29 + $0x650] sm:$0xff]  ;;  %v9063_v38 = vpack.c.bf16 %v7282_v11, %v7280_v8  ;;  %v7444_v11 = vld [vmem:[%s13566_s29 + $0x6e8] sm:$0xff] }
 0x15c   :  { %v7441_v8 = vld [vmem:[%s13566_s29 + $0x6d0] sm:$0xff] }
 0x15d   :  { %v675_v24 = vpop.f32.mrb[36].mxu1  ;;  %v11144_v25 = vpop.f32.mrb[36].mxu0 }
 0x15e   :  { %v677_v41 = vpop.f32.mrb[37].mxu1  ;;  %7171 = vmatmul.mubr.msk.f32.gmra.mrb[84].mxu0 %vm713_vm4, %v675_v24  ;;  %v363_v27 = vpop.f32.mrb[37].mxu0  ;;  %2240 = vmatmul.mubr.f32.gmra.mrb[142].mxu1 %v7355_v20  ;;  %v7279_v20 = vld [vmem:[%s13505_s2 + $0xa0] sm:$0xff] }
 0x15f   :  { %971 = vmatprep.mubr.f32.mxu0 %v13523_v61  ;;  %7463 = vmatprep.mubr.msk.f32.mxu1 %vm132_vm0, %v7416_v16  ;;  %v7281_v16 = vld [vmem:[%s13505_s2 + $0xb0] sm:$0xf]  ;;  %v7428_v41 = vld [vmem:[%s13566_s29 + $0x668] sm:$0xff] }
 0x160   :  { %v7382_v27 = vld [vmem:[%s13505_s2 + $0xc8] sm:$0xff] }
 0x161   :  { %v680_v33 = vpop.f32.mrb[38].mxu1  ;;  %v11155_v46 = vpop.f32.mrb[38].mxu0 }
 0x162   :  { %v682_v36 = vpop.f32.mrb[39].mxu1  ;;  %7172 = vmatmul.mubr.msk.f32.gmra.mrb[86].mxu0 %vm713_vm4, %v680_v33  ;;  %v368_v39 = vpop.f32.mrb[39].mxu0  ;;  %2775 = vmatmul.mubr.f32.vlgmr.msra.gmra.mrb[144].mxu1 %v7415_v30  ;;  %v7384_v30 = vld [vmem:[%s13505_s2 + $0xd8] sm:$0xff]  ;;  %v9066_v33 = vpack.c.bf16 %v7281_v16, %v7279_v20  ;;  %v7448_v20 = vld [vmem:[%s13566_s29 + $0x708] sm:$0xff] }
 0x163   :  { %977 = vmatprep.mubr.f32.mxu0 %v13523_v61  ;;  %7464 = vmatprep.mubr.msk.f32.mxu1 %vm132_vm0, %v7418_v31  ;;  %v7427_v36 = vld [vmem:[%s13566_s29 + $0x660] sm:$0xff]  ;;  %v9111_v39 = vpack.c.bf16 %v7384_v30, %v7382_v27  ;;  %v7450_v27 = vld [vmem:[%s13566_s29 + $0x718] sm:$0xff] }
 0x165   :  { %v685_v42 = vpop.f32.mrb[40].mxu1  ;;  %v11166_v44 = vpop.f32.mrb[40].mxu0 }
 0x166   :  { %v687_v47 = vpop.f32.mrb[41].mxu1  ;;  %7173 = vmatmul.mubr.msk.f32.gmra.mrb[88].mxu0 %vm713_vm4, %v685_v42  ;;  %v373_v48 = vpop.f32.mrb[41].mxu0  ;;  %2780 = vmatmul.mubr.f32.gmra.mrb[146].mxu1 %v7417_v40  ;;  %v7429_v42 = vld [vmem:[%s13566_s29 + $0x670] sm:$0xff] }
 0x167   :  { %983 = vmatprep.mubr.f32.mxu0 %v13523_v61  ;;  %7465 = vmatprep.mubr.msk.f32.mxu1 %vm132_vm0, %v7420_v19  ;;  %v7432_v47 = vld [vmem:[%s13566_s29 + $0x688] sm:$0xff] }
 0x169   :  { %v690_v52 = vpop.f32.mrb[42].mxu1  ;;  %v11177_v22 = vpop.f32.mrb[42].mxu0 }
 0x16a   :  { %v692_v54 = vpop.f32.mrb[43].mxu1  ;;  %7174 = vmatmul.mubr.msk.f32.gmra.mrb[90].mxu0 %vm713_vm4, %v690_v52  ;;  %v378_v56 = vpop.f32.mrb[43].mxu0  ;;  %2785 = vmatmul.mubr.f32.gmra.mrb[148].mxu1 %v7419_v49  ;;  %v7431_v49 = vld [vmem:[%s13566_s29 + $0x680] sm:$0xff] }
 0x16b   :  { %989 = vmatprep.mubr.f32.mxu0 %v13523_v61  ;;  %7466 = vmatprep.mubr.msk.f32.mxu1 %vm132_vm0, %v7422_v51  ;;  %v7434_v51 = vld [vmem:[%s13566_s29 + $0x698] sm:$0xff]  ;;  %v7433_v54 = vld [vmem:[%s13566_s29 + $0x690] sm:$0xff]  ;;  %v7436_v56 = vld [vmem:[%s13566_s29 + $0x6a8] sm:$0xff] }
 0x16d   :  { %v695_v59 = vpop.f32.mrb[44].mxu1  ;;  %v11188_v63 = vpop.f32.mrb[44].mxu0 }
 0x16e   :  { %v697_v1 = vpop.f32.mrb[45].mxu1  ;;  %7175 = vmatmul.mubr.msk.f32.gmra.mrb[92].mxu0 %vm713_vm4, %v695_v59  ;;  %v383_v2 = vpop.f32.mrb[45].mxu0  ;;  %2790 = vmatmul.mubr.f32.gmra.mrb[150].mxu1 %v7421_v57  ;;  %v7438_v59 = vld [vmem:[%s13566_s29 + $0x6b8] sm:$0xff] }
 0x16f   :  { %995 = vmatprep.mubr.f32.mxu0 %v13523_v61  ;;  %7467 = vmatprep.mubr.msk.f32.mxu1 %vm132_vm0, %v7424_v58  ;;  %v7435_v58 = vld [vmem:[%s13566_s29 + $0x6a0] sm:$0xff]  ;;  %v7437_v2 = vld [vmem:[%s13566_s29 + $0x6b0] sm:$0xff] }
 0x171   :  { %v700_v32 = vpop.f32.mrb[46].mxu1  ;;  %v11211_v13 = vpop.f32.mrb[46].mxu0 }
 0x172   :  { %v702_v35 = vpop.f32.mrb[47].mxu1  ;;  %7176 = vmatmul.mubr.msk.f32.gmra.mrb[94].mxu0 %vm713_vm4, %v700_v32  ;;  %v388_v12 = vpop.f32.mrb[47].mxu0  ;;  %2795 = vmatmul.mubr.f32.gmra.mrb[152].mxu1 %v7423_v29  ;;  %v7440_v29 = vld [vmem:[%s13566_s29 + $0x6c8] sm:$0xff] }
 0x173   :  { %1144 = vmatprep.mubr.f32.mxu0 %v13523_v61  ;;  %7468 = vmatprep.mubr.msk.f32.mxu1 %vm132_vm0, %v7426_v6  ;;  %v7442_v6 = vld [vmem:[%s13566_s29 + $0x6d8] sm:$0xff]  ;;  %v7443_v12 = vld [vmem:[%s13566_s29 + $0x6e0] sm:$0xff] }
 0x175   :  { %v11225_v24 = vpop.f32.mrb[48].mxu1 }
 0x176   :  { %7179 = vmatmul.mubr.msk.f32.vlgmr.msra.gmra.mrb[48].mxu0 %vm713_vm4, %v10915_v21  ;;  %v1478_v31 = vpop.f32.mrb[49].mxu1  ;;  %2800 = vmatmul.mubr.f32.gmra.mrb[154].mxu1 %v7425_v18  ;;  %v7430_v21 = vld [vmem:[%s13566_s29 + $0x678] sm:$0xff] }
 0x177   :  { %1150 = vmatprep.mubr.f32.mxu0 %v13523_v61  ;;  %9062 = vmatpush1.bf16.msra.mxu0 %v9061_v15  ;;  %v7446_v15 = vld [vmem:[%s13566_s29 + $0x6f8] sm:$0xff]  ;;  %v7449_v31 = vld [vmem:[%s13566_s29 + $0x710] sm:$0xff] }
 0x178   :  { %9065 = vmatprep.subr.msk.bf16.mxu0 %vm10290_vm3, %v9063_v38  ;;  %7469 = vmatprep.mubr.msk.f32.mxu1 %vm132_vm0, %v7428_v41  ;;  %v7445_v38 = vld [vmem:[%s13566_s29 + $0x6f0] sm:$0xff]  ;;  %v7447_v41 = vld [vmem:[%s13566_s29 + $0x700] sm:$0xff] }
 0x179   :  { %v11245_v40 = vpop.f32.mrb[50].mxu1 }
 0x17a   :  { %7180 = vmatmul.mubr.msk.f32.gmra.mrb[50].mxu0 %vm713_vm4, %v10934_v34  ;;  %v1483_v19 = vpop.f32.mrb[51].mxu1  ;;  %2805 = vmatmul.mubr.f32.gmra.mrb[156].mxu1 %v7427_v36 }
 0x17b   :  { %1156 = vmatprep.mubr.f32.mxu0 %v13523_v61  ;;  %9068 = vmatpush1.bf16.msk.msra.mxu0 %vm10290_vm3, %v9066_v33  ;;  %v7452_v33 = vld [vmem:[%s13566_s29 + $0x728] sm:$0xff] }
 0x17c   :  { %9112 = vmatprep.subr.bf16.mxu0 %v9111_v39  ;;  %7470 = vmatprep.mubr.msk.f32.mxu1 %vm132_vm0, %v7430_v21  ;;  %v7451_v39 = vld [vmem:[%s13566_s29 + $0x720] sm:$0xff]  ;;  %v7454_v21 = vld [vmem:[%s13566_s29 + $0x738] sm:$0xff] }
 0x17d   :  { %v11262_v48 = vpop.f32.mrb[52].mxu1 }
 0x17e   :  { %7181 = vmatmul.mubr.msk.f32.gmra.mrb[52].mxu0 %vm713_vm4, %v10951_v43  ;;  %v1488_v34 = vpop.f32.mrb[53].mxu1  ;;  %2810 = vmatmul.mubr.f32.gmra.mrb[158].mxu1 %v7429_v42  ;;  %v7453_v42 = vld [vmem:[%s13566_s29 + $0x730] sm:$0xff] }
 0x17f   :  { %1162 = vmatprep.mubr.f32.mxu0 %v13523_v61  ;;  %7471 = vmatprep.mubr.msk.f32.mxu1 %vm132_vm0, %v7432_v47  ;;  %v7456_v47 = vld [vmem:[%s13566_s29 + $0x748] sm:$0xff] }
 0x181   :  { %v11274_v52 = vpop.f32.mrb[54].mxu1 }
 0x182   :  { %7182 = vmatmul.mubr.msk.f32.gmra.mrb[54].mxu0 %vm713_vm4, %v10964_v50  ;;  %v1493_v43 = vpop.f32.mrb[55].mxu1  ;;  %2815 = vmatmul.mubr.f32.gmra.mrb[160].mxu1 %v7431_v49  ;;  %v7455_v49 = vld [vmem:[%s13566_s29 + $0x740] sm:$0xff] }
 0x183   :  { %1168 = vmatprep.mubr.f32.mxu0 %v13523_v61  ;;  %7472 = vmatprep.mubr.msk.f32.mxu1 %vm132_vm0, %v7434_v51  ;;  %v7458_v51 = vld [vmem:[%s13566_s29 + $0x758] sm:$0xff] }
 0x185   :  { %v11286_v57 = vpop.f32.mrb[56].mxu1 }
 0x186   :  { %7183 = vmatmul.mubr.msk.f32.gmra.mrb[56].mxu0 %vm713_vm4, %v10977_v55  ;;  %v1498_v50 = vpop.f32.mrb[57].mxu1  ;;  %2820 = vmatmul.mubr.f32.gmra.mrb[162].mxu1 %v7433_v54  ;;  %v7457_v54 = vld [vmem:[%s13566_s29 + $0x750] sm:$0xff] }
 0x187   :  { %1174 = vmatprep.mubr.f32.mxu0 %v13523_v61  ;;  %7473 = vmatprep.mubr.msk.f32.mxu1 %vm132_vm0, %v7436_v56  ;;  %v7460_v56 = vld [vmem:[%s13566_s29 + $0x768] sm:$0xff] }
 0x189   :  { %v11298_v1 = vpop.f32.mrb[58].mxu1 }
 0x18a   :  { %7184 = vmatmul.mubr.msk.f32.gmra.mrb[58].mxu0 %vm713_vm4, %v10990_v62  ;;  %v1503_v55 = vpop.f32.mrb[59].mxu1  ;;  %2825 = vmatmul.mubr.f32.gmra.mrb[164].mxu1 %v7435_v58  ;;  %v7459_v58 = vld [vmem:[%s13566_s29 + $0x760] sm:$0xff] }
 0x18b   :  { %1180 = vmatprep.mubr.f32.mxu0 %v13523_v61  ;;  %7474 = vmatprep.mubr.msk.f32.mxu1 %vm132_vm0, %v7438_v59  ;;  %v7462_v59 = vld [vmem:[%s13566_s29 + $0x778] sm:$0xff] }
 0x18d   :  { %v11310_v4 = vpop.f32.mrb[60].mxu1 }
 0x18e   :  { %7185 = vmatmul.mubr.msk.f32.gmra.mrb[60].mxu0 %vm713_vm4, %v11003_v5  ;;  %v1508_v62 = vpop.f32.mrb[61].mxu1  ;;  %2830 = vmatmul.mubr.f32.gmra.mrb[166].mxu1 %v7437_v2  ;;  %v7461_v2 = vld [vmem:[%s13566_s29 + $0x770] sm:$0xff] }
 0x18f   :  { %1186 = vmatprep.mubr.f32.mxu0 %v13523_v61  ;;  %7475 = vmatprep.mubr.msk.f32.mxu1 %vm132_vm0, %v7440_v29 }
 0x191   :  { %v11322_v32 = vpop.f32.mrb[62].mxu1 }
 0x192   :  { %7186 = vmatmul.mubr.msk.f32.gmra.mrb[62].mxu0 %vm713_vm4, %v11016_v9  ;;  %v1513_v5 = vpop.f32.mrb[63].mxu1  ;;  %2835 = vmatmul.mubr.f32.gmra.mrb[168].mxu1 %v7439_v7 }
 0x193   :  { %1192 = vmatprep.mubr.f32.mxu0 %v13523_v61  ;;  %7476 = vmatprep.mubr.msk.f32.mxu1 %vm132_vm0, %v7442_v6 }
 0x195   :  { %v11334_v35 = vpop.f32.mrb[64].mxu1 }
 0x196   :  { %7187 = vmatmul.mubr.msk.f32.gmra.mrb[64].mxu0 %vm713_vm4, %v11029_v14  ;;  %v1518_v9 = vpop.f32.mrb[65].mxu1  ;;  %2840 = vmatmul.mubr.f32.gmra.mrb[170].mxu1 %v7441_v8 }
 0x197   :  { %1198 = vmatprep.mubr.f32.mxu0 %v13523_v61  ;;  %7477 = vmatprep.mubr.msk.f32.mxu1 %vm132_vm0, %v7444_v11  ;;  %v7383_v9 = vld [vmem:[%s13505_s2 + $0xd0] sm:$0xff] }
 0x199   :  { %v11346_v18 = vpop.f32.mrb[66].mxu1 }
 0x19a   :  { %7188 = vmatmul.mubr.msk.f32.gmra.mrb[66].mxu0 %vm713_vm4, %v11042_v23  ;;  %v1523_v14 = vpop.f32.mrb[67].mxu1  ;;  %2845 = vmatmul.mubr.f32.gmra.mrb[172].mxu1 %v7443_v12  ;;  %v7388_v12 = vld [vmem:[%s13505_s2 + $0xf8] sm:$0xf] }
 0x19b   :  { %1204 = vmatprep.mubr.f32.mxu0 %v13523_v61  ;;  %7478 = vmatprep.mubr.msk.f32.mxu1 %vm132_vm0, %v7446_v15 }
 0x19d   :  { %v11358_v16 = vpop.f32.mrb[68].mxu1 }
 0x19e   :  { %7189 = vmatmul.mubr.msk.f32.gmra.mrb[68].mxu0 %vm713_vm4, %v11055_v28  ;;  %v1528_v23 = vpop.f32.mrb[69].mxu1  ;;  %2850 = vmatmul.mubr.f32.gmra.mrb[174].mxu1 %v7445_v38 }
 0x19f   :  { %1210 = vmatprep.mubr.f32.mxu0 %v13523_v61  ;;  %7479 = vmatprep.mubr.msk.f32.mxu1 %vm132_vm0, %v7448_v20  ;;  %v7385_v20 = vld [vmem:[%s13505_s2 + $0xe0] sm:$0xff]  ;;  %v7387_v23 = vld [vmem:[%s13505_s2 + $0xf0] sm:$0xf] }
 0x1a1   :  { %v11370_v30 = vpop.f32.mrb[70].mxu1 }
 0x1a2   :  { %7190 = vmatmul.mubr.msk.f32.gmra.mrb[70].mxu0 %vm713_vm4, %v11067_v37  ;;  %v1533_v28 = vpop.f32.mrb[71].mxu1  ;;  %2855 = vmatmul.mubr.f32.gmra.mrb[176].mxu1 %v7447_v41 }
 0x1a3   :  { %1216 = vmatprep.mubr.f32.mxu0 %v13523_v61  ;;  %7480 = vmatprep.mubr.msk.f32.mxu1 %vm132_vm0, %v7450_v27  ;;  %v7488_v27 = vld [vmem:[%s13505_s2 + $0x108] sm:$0xff] }
 0x1a5   :  { %v11382_v36 = vpop.f32.mrb[72].mxu1 }
 0x1a6   :  { %7191 = vmatmul.mubr.msk.f32.gmra.mrb[72].mxu0 %vm713_vm4, %v11078_v45  ;;  %v1538_v37 = vpop.f32.mrb[73].mxu1  ;;  %2860 = vmatmul.mubr.f32.gmra.mrb[178].mxu1 %v7449_v31  ;;  %v9118_v31 = vpack.c.bf16 %v7387_v23, %v7385_v20  ;;  %v7491_v20 = vld [vmem:[%s13505_s2 + $0x120] sm:$0xff]  ;;  %v7493_v23 = vld [vmem:[%s13505_s2 + $0x130] sm:$0xf] }
 0x1a7   :  { %1222 = vmatprep.mubr.f32.mxu0 %v13523_v61  ;;  %7481 = vmatprep.mubr.msk.f32.mxu1 %vm132_vm0, %v7452_v33 }
 0x1a9   :  { %v11394_v19 = vpop.f32.mrb[74].mxu1 }
 0x1aa   :  { %7192 = vmatmul.mubr.msk.f32.gmra.mrb[74].mxu0 %vm713_vm4, %v11089_v53  ;;  %v1543_v45 = vpop.f32.mrb[75].mxu1  ;;  %2865 = vmatmul.mubr.f32.gmra.mrb[180].mxu1 %v7451_v39 }
 0x1ab   :  { %1228 = vmatprep.mubr.f32.mxu0 %v13523_v61  ;;  %7482 = vmatprep.mubr.msk.f32.mxu1 %vm132_vm0, %v7454_v21 }
 0x1ad   :  { %v11406_v34 = vpop.f32.mrb[76].mxu1 }
 0x1ae   :  { %7193 = vmatmul.mubr.msk.f32.gmra.mrb[76].mxu0 %vm713_vm4, %v11100_v26  ;;  %v1548_v53 = vpop.f32.mrb[77].mxu1  ;;  %2870 = vmatmul.mubr.f32.gmra.mrb[182].mxu1 %v7453_v42 }
 0x1af   :  { %1234 = vmatprep.mubr.f32.mxu0 %v13523_v61  ;;  %7483 = vmatprep.mubr.msk.f32.mxu1 %vm132_vm0, %v7456_v47 }
 0x1b1   :  { %v11418_v43 = vpop.f32.mrb[78].mxu1 }
 0x1b2   :  { %7194 = vmatmul.mubr.msk.f32.gmra.mrb[78].mxu0 %vm713_vm4, %v11111_v3  ;;  %v1553_v26 = vpop.f32.mrb[79].mxu1  ;;  %2875 = vmatmul.mubr.f32.gmra.mrb[184].mxu1 %v7455_v49 }
 0x1b3   :  { %1240 = vmatprep.mubr.f32.mxu0 %v13523_v61  ;;  %7484 = vmatprep.mubr.msk.f32.mxu1 %vm132_vm0, %v7458_v51 }
 0x1b5   :  { %v11430_v50 = vpop.f32.mrb[80].mxu1 }
 0x1b6   :  { %7195 = vmatmul.mubr.msk.f32.gmra.mrb[80].mxu0 %vm713_vm4, %v11122_v10  ;;  %v1558_v3 = vpop.f32.mrb[81].mxu1  ;;  %2880 = vmatmul.mubr.f32.gmra.mrb[186].mxu1 %v7457_v54 }
 0x1b7   :  { %1246 = vmatprep.mubr.f32.mxu0 %v13523_v61  ;;  %7485 = vmatprep.mubr.msk.f32.mxu1 %vm132_vm0, %v7460_v56 }
 0x1b9   :  { %v11442_v55 = vpop.f32.mrb[82].mxu1 }
 0x1ba   :  { %7196 = vmatmul.mubr.msk.f32.gmra.mrb[82].mxu0 %vm713_vm4, %v11133_v17  ;;  %v1563_v10 = vpop.f32.mrb[83].mxu1  ;;  %2885 = vmatmul.mubr.f32.gmra.mrb[188].mxu1 %v7459_v58 }
 0x1bb   :  { %1252 = vmatprep.mubr.f32.mxu0 %v13523_v61  ;;  %7486 = vmatprep.mubr.msk.f32.mxu1 %vm132_vm0, %v7462_v59 }
 0x1bd   :  { %v11451_v29 = vpop.f32.mrb[84].mxu1 }
 0x1be   :  { %7197 = vmatmul.mubr.msk.f32.gmra.mrb[84].mxu0 %vm713_vm4, %v11144_v25  ;;  %v1568_v62 = vpop.f32.mrb[85].mxu1  ;;  %2890 = vmatmul.mubr.f32.gmra.mrb[190].mxu1 %v7461_v2 }
 0x1bf   :  { %1258 = vmatprep.mubr.f32.mxu0 %v13523_v61 }
 0x1c1   :  { %v11456_v17 = vpop.f32.mrb[86].mxu1 }
 0x1c2   :  { %7198 = vmatmul.mubr.msk.f32.gmra.mrb[86].mxu0 %vm713_vm4, %v11155_v46  ;;  %v1573_v7 = vpop.f32.mrb[87].mxu1 }
 0x1c3   :  { %1264 = vmatprep.mubr.f32.mxu0 %v13523_v61 }
 0x1c5   :  { %v11461_v6 = vpop.f32.mrb[88].mxu1 }
 0x1c6   :  { %7199 = vmatmul.mubr.msk.f32.gmra.mrb[88].mxu0 %vm713_vm4, %v11166_v44  ;;  %v1578_v5 = vpop.f32.mrb[89].mxu1  ;;  %v7381_v44 = vld [vmem:[%s13505_s2 + $0xc0] sm:$0xff] }
 0x1c7   :  { %1270 = vmatprep.mubr.f32.mxu0 %v13523_v61  ;;  %v9113_v14 = vpack.c.bf16 %v7383_v9, %v7381_v44 }
 0x1c9   :  { %v11466_v25 = vpop.f32.mrb[90].mxu1 }
 0x1ca   :  { %7200 = vmatmul.mubr.msk.f32.gmra.mrb[90].mxu0 %vm713_vm4, %v11177_v22  ;;  %v1583_v8 = vpop.f32.mrb[91].mxu1  ;;  %v7386_v22 = vld [vmem:[%s13505_s2 + $0xe8] sm:$0xff] }
 0x1cb   :  { %1276 = vmatprep.mubr.f32.mxu0 %v13523_v61  ;;  %v9115_v38 = vpack.c.bf16 %v7388_v12, %v7386_v22  ;;  %v7489_v22 = vld [vmem:[%s13505_s2 + $0x110] sm:$0xff]  ;;  %v7494_v12 = vld [vmem:[%s13505_s2 + $0x138] sm:$0xf] }
 0x1cd   :  { %v11471_v46 = vpop.f32.mrb[92].mxu1 }
 0x1ce   :  { %7201 = vmatmul.mubr.msk.f32.gmra.mrb[92].mxu0 %vm713_vm4, %v11188_v63  ;;  %v1588_v11 = vpop.f32.mrb[93].mxu1 }
 0x1cf   :  { %1282 = vmatprep.mubr.f32.mxu0 %v13523_v61 }
 0x1d1   :  { %v11488_v63 = vpop.f32.mrb[94].mxu1 }
 0x1d2   :  { %7202 = vmatmul.mubr.msk.f32.gmra.mrb[94].mxu0 %vm713_vm4, %v11211_v13  ;;  %v1593_v15 = vpop.f32.mrb[95].mxu1  ;;  %v7490_v13 = vld [vmem:[%s13505_s2 + $0x118] sm:$0xff] }
 0x1d3   :  { %1746 = vmatprep.mubr.f32.mxu0 %v13523_v61  ;;  %v9163_v33 = vpack.c.bf16 %v7490_v13, %v7488_v27 }
 0x1d5   :  { %v11499_v41 = vpop.f32.mrb[96].mxu1 }
 0x1d6   :  { %7285 = vmatmul.mubr.msk.f32.vlgmr.msra.gmra.mrb[48].mxu0 %vm713_vm4, %v11225_v24  ;;  %v2128_v28 = vpop.f32.mrb[97].mxu1 }
 0x1d7   :  { %1752 = vmatprep.mubr.f32.mxu0 %v13523_v61  ;;  %9114 = vmatpush1.bf16.msra.mxu0 %v9113_v14 }
 0x1d8   :  { %9117 = vmatprep.subr.msk.bf16.mxu0 %vm10290_vm3, %v9115_v38 }
 0x1d9   :  { %v11512_v37 = vpop.f32.mrb[98].mxu1 }
 0x1da   :  { %7286 = vmatmul.mubr.msk.f32.gmra.mrb[50].mxu0 %vm713_vm4, %v11245_v40  ;;  %v2133_v39 = vpop.f32.mrb[99].mxu1 }
 0x1db   :  { %1758 = vmatprep.mubr.f32.mxu0 %v13523_v61  ;;  %9120 = vmatpush1.bf16.msk.msra.mxu0 %vm10290_vm3, %v9118_v31 }
 0x1dc   :  { %9164 = vmatprep.subr.bf16.mxu0 %v9163_v33 }
 0x1dd   :  { %v11519_v24 = vpop.f32.mrb[100].mxu1 }
 0x1de   :  { %7287 = vmatmul.mubr.msk.f32.gmra.mrb[52].mxu0 %vm713_vm4, %v11262_v48  ;;  %v2138_v21 = vpop.f32.mrb[101].mxu1 }
 0x1df   :  { %1764 = vmatprep.mubr.f32.mxu0 %v13523_v61 }
 0x1e1   :  { %v11524_v45 = vpop.f32.mrb[102].mxu1 }
 0x1e2   :  { %7288 = vmatmul.mubr.msk.f32.gmra.mrb[54].mxu0 %vm713_vm4, %v11274_v52  ;;  %v2143_v40 = vpop.f32.mrb[103].mxu1 }
 0x1e3   :  { %1770 = vmatprep.mubr.f32.mxu0 %v13523_v61 }
 0x1e5   :  { %v11529_v42 = vpop.f32.mrb[104].mxu1 }
 0x1e6   :  { %7289 = vmatmul.mubr.msk.f32.gmra.mrb[56].mxu0 %vm713_vm4, %v11286_v57  ;;  %v2148_v47 = vpop.f32.mrb[105].mxu1 }
 0x1e7   :  { %1776 = vmatprep.mubr.f32.mxu0 %v13523_v61 }
 0x1e9   :  { %v11534_v48 = vpop.f32.mrb[106].mxu1 }
 0x1ea   :  { %7290 = vmatmul.mubr.msk.f32.gmra.mrb[58].mxu0 %vm713_vm4, %v11298_v1  ;;  %v2153_v53 = vpop.f32.mrb[107].mxu1 }
 0x1eb   :  { %1782 = vmatprep.mubr.f32.mxu0 %v13523_v61 }
 0x1ed   :  { %v11539_v52 = vpop.f32.mrb[108].mxu1 }
 0x1ee   :  { %7291 = vmatmul.mubr.msk.f32.gmra.mrb[60].mxu0 %vm713_vm4, %v11310_v4  ;;  %v2158_v49 = vpop.f32.mrb[109].mxu1 }
 0x1ef   :  { %1788 = vmatprep.mubr.f32.mxu0 %v13523_v61 }
 0x1f1   :  { %v11544_v57 = vpop.f32.mrb[110].mxu1 }
 0x1f2   :  { %7292 = vmatmul.mubr.msk.f32.gmra.mrb[62].mxu0 %vm713_vm4, %v11322_v32  ;;  %v2163_v51 = vpop.f32.mrb[111].mxu1 }
 0x1f3   :  { %1794 = vmatprep.mubr.f32.mxu0 %v13523_v61 }
 0x1f5   :  { %v11549_v1 = vpop.f32.mrb[112].mxu1 }
 0x1f6   :  { %7293 = vmatmul.mubr.msk.f32.gmra.mrb[64].mxu0 %vm713_vm4, %v11334_v35  ;;  %v2168_v26 = vpop.f32.mrb[113].mxu1 }
 0x1f7   :  { %1800 = vmatprep.mubr.f32.mxu0 %v13523_v61 }
 0x1f9   :  { %v11554_v4 = vpop.f32.mrb[114].mxu1 }
 0x1fa   :  { %7294 = vmatmul.mubr.msk.f32.gmra.mrb[66].mxu0 %vm713_vm4, %v11346_v18  ;;  %v2173_v54 = vpop.f32.mrb[115].mxu1 }
 0x1fb   :  { %1806 = vmatprep.mubr.f32.mxu0 %v13523_v61 }
 0x1fd   :  { %v11559_v32 = vpop.f32.mrb[116].mxu1 }
 0x1fe   :  { %7295 = vmatmul.mubr.msk.f32.gmra.mrb[68].mxu0 %vm713_vm4, %v11358_v16  ;;  %v2178_v56 = vpop.f32.mrb[117].mxu1 }
 0x1ff   :  { %1812 = vmatprep.mubr.f32.mxu0 %v13523_v61 }
 0x201   :  { %v11564_v35 = vpop.f32.mrb[118].mxu1 }
 0x202   :  { %7296 = vmatmul.mubr.msk.f32.gmra.mrb[70].mxu0 %vm713_vm4, %v11370_v30  ;;  %v2183_v3 = vpop.f32.mrb[119].mxu1 }
 0x203   :  { %1818 = vmatprep.mubr.f32.mxu0 %v13523_v61 }
 0x205   :  { %v11569_v18 = vpop.f32.mrb[120].mxu1 }
 0x206   :  { %7297 = vmatmul.mubr.msk.f32.gmra.mrb[72].mxu0 %vm713_vm4, %v11382_v36  ;;  %v2188_v58 = vpop.f32.mrb[121].mxu1 }
 0x207   :  { %1824 = vmatprep.mubr.f32.mxu0 %v13523_v61 }
 0x209   :  { %v11574_v16 = vpop.f32.mrb[122].mxu1 }
 0x20a   :  { %7298 = vmatmul.mubr.msk.f32.gmra.mrb[74].mxu0 %vm713_vm4, %v11394_v19  ;;  %v2193_v59 = vpop.f32.mrb[123].mxu1 }
 0x20b   :  { %1830 = vmatprep.mubr.f32.mxu0 %v13523_v61 }
 0x20d   :  { %v11579_v30 = vpop.f32.mrb[124].mxu1 }
 0x20e   :  { %7299 = vmatmul.mubr.msk.f32.gmra.mrb[76].mxu0 %vm713_vm4, %v11406_v34  ;;  %v2198_v10 = vpop.f32.mrb[125].mxu1 }
 0x20f   :  { %1836 = vmatprep.mubr.f32.mxu0 %v13523_v61  ;;  %v3348_v10 = vld [vmem:[%s13506_s4 + $0x8] sm:$0xff] }
 0x211   :  { %v11584_v36 = vpop.f32.mrb[126].mxu1 }
 0x212   :  { %7300 = vmatmul.mubr.msk.f32.gmra.mrb[78].mxu0 %vm713_vm4, %v11418_v43  ;;  %v2203_v2 = vpop.f32.mrb[127].mxu1 }
 0x213   :  { %1842 = vmatprep.mubr.f32.mxu0 %v13523_v61 }
 0x215   :  { %v11589_v19 = vpop.f32.mrb[128].mxu1 }
 0x216   :  { %7301 = vmatmul.mubr.msk.f32.gmra.mrb[80].mxu0 %vm713_vm4, %v11430_v50  ;;  %v2208_v62 = vpop.f32.mrb[129].mxu1 }
 0x217   :  { %1848 = vmatprep.mubr.f32.mxu0 %v13523_v61 }
 0x219   :  { %v11594_v34 = vpop.f32.mrb[130].mxu1 }
 0x21a   :  { %7302 = vmatmul.mubr.msk.f32.gmra.mrb[82].mxu0 %vm713_vm4, %v11442_v55  ;;  %v2213_v7 = vpop.f32.mrb[131].mxu1 }
 0x21b   :  { %1854 = vmatprep.mubr.f32.mxu0 %v13523_v61 }
 0x21d   :  { %v11599_v43 = vpop.f32.mrb[132].mxu1 }
 0x21e   :  { %7303 = vmatmul.mubr.msk.f32.gmra.mrb[84].mxu0 %vm713_vm4, %v11451_v29  ;;  %v2218_v5 = vpop.f32.mrb[133].mxu1 }
 0x21f   :  { %1860 = vmatprep.mubr.f32.mxu0 %v13523_v61 }
 0x221   :  { %v11604_v50 = vpop.f32.mrb[134].mxu1 }
 0x222   :  { %7304 = vmatmul.mubr.msk.f32.gmra.mrb[86].mxu0 %vm713_vm4, %v11456_v17  ;;  %v2223_v8 = vpop.f32.mrb[135].mxu1 }
 0x223   :  { %1866 = vmatprep.mubr.f32.mxu0 %v13523_v61  ;;  %v3351_v8 = vld [vmem:[%s13506_s4 + $0x20] sm:$0xff] }
 0x225   :  { %v11609_v55 = vpop.f32.mrb[136].mxu1 }
 0x226   :  { %7305 = vmatmul.mubr.msk.f32.gmra.mrb[88].mxu0 %vm713_vm4, %v11461_v6  ;;  %v2228_v11 = vpop.f32.mrb[137].mxu1  ;;  %v7487_v6 = vld [vmem:[%s13505_s2 + $0x100] sm:$0xff] }
 0x227   :  { %1872 = vmatprep.mubr.f32.mxu0 %v13523_v61  ;;  %v9165_v14 = vpack.c.bf16 %v7489_v22, %v7487_v6  ;;  %v3352_v11 = vld [vmem:[%s13506_s4 + $0x28] sm:$0xff]  ;;  %v3353_v6 = vld [vmem:[%s13506_s4 + $0x30] sm:$0xff]  ;;  %v3354_v22 = vld [vmem:[%s13506_s4 + $0x38] sm:$0xff] }
 0x229   :  { %v11614_v29 = vpop.f32.mrb[138].mxu1 }
 0x22a   :  { %7306 = vmatmul.mubr.msk.f32.gmra.mrb[90].mxu0 %vm713_vm4, %v11466_v25  ;;  %v2233_v44 = vpop.f32.mrb[139].mxu1  ;;  %v7492_v25 = vld [vmem:[%s13505_s2 + $0x128] sm:$0xff] }
 0x22b   :  { %1878 = vmatprep.mubr.f32.mxu0 %v13523_v61  ;;  %v9167_v38 = vpack.c.bf16 %v7494_v12, %v7492_v25  ;;  %v9183_v12 = vpack.c.bf16 %v3354_v22, %v3353_v6 }
 0x22d   :  { %v11619_v17 = vpop.f32.mrb[140].mxu1 }
 0x22e   :  { %7307 = vmatmul.mubr.msk.f32.gmra.mrb[92].mxu0 %vm713_vm4, %v11471_v46  ;;  %v2238_v9 = vpop.f32.mrb[141].mxu1 }
 0x22f   :  { %1884 = vmatprep.mubr.f32.mxu0 %v13523_v61  ;;  %v9180_v9 = vpack.c.bf16 %v3352_v11, %v3351_v8  ;;  %v7549_v11 = vld [vmem:[%s13506_s4 + $0xb0] sm:$0xff] }
 0x231   :  { %v11636_v46 = vpop.f32.mrb[142].mxu1 }
 0x232   :  { %7308 = vmatmul.mubr.msk.f32.gmra.mrb[94].mxu0 %vm713_vm4, %v11488_v63  ;;  %v2243_v15 = vpop.f32.mrb[143].mxu1  ;;  %v9170_v63 = vpack.c.bf16 %v7493_v23, %v7491_v20  ;;  %v3357_v23 = vld [vmem:[%s13506_s4 + $0x50] sm:$0xff] }
 0x233   :  { %2396 = vmatprep.mubr.f32.mxu0 %v13523_v61  ;;  %v3355_v15 = vld [vmem:[%s13506_s4 + $0x40] sm:$0xff] }
 0x235   :  { %v11647_v27 = vpop.f32.mrb[144].mxu1 }
 0x236   :  { %7391 = vmatmul.mubr.msk.f32.vlgmr.msra.gmra.mrb[48].mxu0 %vm713_vm4, %v11499_v41  ;;  %v2778_v13 = vpop.f32.mrb[145].mxu1 }
 0x237   :  { %2402 = vmatprep.mubr.f32.mxu0 %v13523_v61  ;;  %9166 = vmatpush1.bf16.msra.mxu0 %v9165_v14  ;;  %v3356_v14 = vld [vmem:[%s13506_s4 + $0x48] sm:$0xff]  ;;  %v3358_v13 = vld [vmem:[%s13506_s4 + $0x58] sm:$0xff] }
 0x238   :  { %9169 = vmatprep.subr.msk.bf16.mxu0 %vm10290_vm3, %v9167_v38  ;;  %v9186_v20 = vpack.c.bf16 %v3356_v14, %v3355_v15  ;;  %v7551_v15 = vld [vmem:[%s13506_s4 + $0xc0] sm:$0xff]  ;;  %v7552_v14 = vld [vmem:[%s13506_s4 + $0xc8] sm:$0xff] }
 0x239   :  { %v11654_v28 = vpop.f32.mrb[146].mxu1 }
 0x23a   :  { %7392 = vmatmul.mubr.msk.f32.gmra.mrb[50].mxu0 %vm713_vm4, %v11512_v37  ;;  %v2783_v31 = vpop.f32.mrb[147].mxu1 }
 0x23b   :  { %2408 = vmatprep.mubr.f32.mxu0 %v13523_v61  ;;  %9172 = vmatpush1.bf16.msk.msra.mxu0 %vm10290_vm3, %v9170_v63  ;;  %v9189_v31 = vpack.c.bf16 %v3358_v13, %v3357_v23  ;;  %v9210_v23 = vpack.c.bf16 %v7552_v14, %v7551_v15 }
 0x23c   :  { %9227 = vmatprep.subr.bf16.mxu0 %v13525_v0 }
 0x23d   :  { %v11662_v41 = vpop.f32.mrb[148].mxu1 }
 0x23e   :  { %7393 = vmatmul.mubr.msk.f32.gmra.mrb[52].mxu0 %vm713_vm4, %v11519_v24  ;;  %v2788_v33 = vpop.f32.mrb[149].mxu1 }
 0x23f   :  { %2414 = vmatprep.mubr.f32.mxu0 %v13523_v61  ;;  %v3359_v33 = vld [vmem:[%s13506_s4 + $0x60] sm:$0xff] }
 0x241   :  { %v11667_v39 = vpop.f32.mrb[150].mxu1 }
 0x242   :  { %7394 = vmatmul.mubr.msk.f32.gmra.mrb[54].mxu0 %vm713_vm4, %v11524_v45  ;;  %v2793_v37 = vpop.f32.mrb[151].mxu1 }
 0x243   :  { %2420 = vmatprep.mubr.f32.mxu0 %v13523_v61  ;;  %v3360_v37 = vld [vmem:[%s13506_s4 + $0x68] sm:$0xff] }
 0x245   :  { %v11672_v60 = vpop.f32.mrb[152].mxu1 }
 0x246   :  { %7395 = vmatmul.mubr.msk.f32.gmra.mrb[56].mxu0 %vm713_vm4, %v11529_v42  ;;  %v2798_v21 = vpop.f32.mrb[153].mxu1 }
 0x247   :  { %2426 = vmatprep.mubr.f32.mxu0 %v13523_v61 }
 0x249   :  { %v11677_v24 = vpop.f32.mrb[154].mxu1 }
 0x24a   :  { %7396 = vmatmul.mubr.msk.f32.gmra.mrb[58].mxu0 %vm713_vm4, %v11534_v48  ;;  %v2803_v40 = vpop.f32.mrb[155].mxu1 }
 0x24b   :  { %2432 = vmatprep.mubr.f32.mxu0 %v13523_v61  ;;  %v9192_v40 = vpack.c.bf16 %v3360_v37, %v3359_v33  ;;  %v7554_v33 = vld [vmem:[%s13506_s4 + $0xd8] sm:$0xff] }
 0x24d   :  { %v11682_v45 = vpop.f32.mrb[156].mxu1 }
 0x24e   :  { %7397 = vmatmul.mubr.msk.f32.gmra.mrb[60].mxu0 %vm713_vm4, %v11539_v52  ;;  %v2808_v47 = vpop.f32.mrb[157].mxu1 }
 0x24f   :  { %2438 = vmatprep.mubr.f32.mxu0 %v13523_v61  ;;  %v3361_v47 = vld [vmem:[%s13506_s4 + $0x70] sm:$0xff] }
 0x251   :  { %v11687_v42 = vpop.f32.mrb[158].mxu1 }
 0x252   :  { %7398 = vmatmul.mubr.msk.f32.gmra.mrb[62].mxu0 %vm713_vm4, %v11544_v57  ;;  %v2813_v53 = vpop.f32.mrb[159].mxu1 }
 0x253   :  { %2444 = vmatprep.mubr.f32.mxu0 %v13523_v61  ;;  %v3362_v53 = vld [vmem:[%s13506_s4 + $0x78] sm:$0xff] }
 0x255   :  { %v11692_v48 = vpop.f32.mrb[160].mxu1 }
 0x256   :  { %7399 = vmatmul.mubr.msk.f32.gmra.mrb[64].mxu0 %vm713_vm4, %v11549_v1  ;;  %v2818_v49 = vpop.f32.mrb[161].mxu1 }
 0x257   :  { %2450 = vmatprep.mubr.f32.mxu0 %v13523_v61 }
 0x259   :  { %v11697_v52 = vpop.f32.mrb[162].mxu1 }
 0x25a   :  { %7400 = vmatmul.mubr.msk.f32.gmra.mrb[66].mxu0 %vm713_vm4, %v11554_v4  ;;  %v2823_v51 = vpop.f32.mrb[163].mxu1 }
 0x25b   :  { %2456 = vmatprep.mubr.f32.mxu0 %v13523_v61  ;;  %v9195_v51 = vpack.c.bf16 %v3362_v53, %v3361_v47 }
 0x25d   :  { %v11702_v57 = vpop.f32.mrb[164].mxu1 }
 0x25e   :  { %7401 = vmatmul.mubr.msk.f32.gmra.mrb[68].mxu0 %vm713_vm4, %v11559_v32  ;;  %v2828_v26 = vpop.f32.mrb[165].mxu1 }
 0x25f   :  { %2462 = vmatprep.mubr.f32.mxu0 %v13523_v61 }
 0x261   :  { %v11707_v1 = vpop.f32.mrb[166].mxu1 }
 0x262   :  { %7402 = vmatmul.mubr.msk.f32.gmra.mrb[70].mxu0 %vm713_vm4, %v11564_v35  ;;  %v2833_v54 = vpop.f32.mrb[167].mxu1 }
 0x263   :  { %2468 = vmatprep.mubr.f32.mxu0 %v13523_v61 }
 0x265   :  { %v11712_v4 = vpop.f32.mrb[168].mxu1 }
 0x266   :  { %7403 = vmatmul.mubr.msk.f32.gmra.mrb[72].mxu0 %vm713_vm4, %v11569_v18  ;;  %v2838_v56 = vpop.f32.mrb[169].mxu1 }
 0x267   :  { %2474 = vmatprep.mubr.f32.mxu0 %v13523_v61 }
 0x269   :  { %v11717_v32 = vpop.f32.mrb[170].mxu1 }
 0x26a   :  { %7404 = vmatmul.mubr.msk.f32.gmra.mrb[74].mxu0 %vm713_vm4, %v11574_v16  ;;  %v2843_v3 = vpop.f32.mrb[171].mxu1  ;;  %v3347_v16 = vld [vmem:[%s13506_s4] sm:$0xff] }
 0x26b   :  { %2480 = vmatprep.mubr.f32.mxu0 %v13523_v61  ;;  %v9174_v2 = vpack.c.bf16 %v3348_v10, %v3347_v16  ;;  %v7547_v16 = vld [vmem:[%s13506_s4 + $0xa0] sm:$0xff]  ;;  %v7548_v10 = vld [vmem:[%s13506_s4 + $0xa8] sm:$0xff] }
 0x26d   :  { %v11722_v35 = vpop.f32.mrb[172].mxu1  ;;  %9175 = vmatpush1.bf16.msra.mxu1 %v9174_v2 }
 0x26e   :  { %7405 = vmatmul.mubr.msk.f32.gmra.mrb[76].mxu0 %vm713_vm4, %v11579_v30  ;;  %v2848_v58 = vpop.f32.mrb[173].mxu1  ;;  %v3349_v30 = vld [vmem:[%s13506_s4 + $0x10] sm:$0xff]  ;;  %9176 = vmatprep.subr.bf16.mxu1 %v13525_v0 }
 0x26f   :  { %2486 = vmatprep.mubr.f32.mxu0 %v13523_v61 }
 0x271   :  { %v11727_v18 = vpop.f32.mrb[174].mxu1 }
 0x272   :  { %7406 = vmatmul.mubr.msk.f32.gmra.mrb[78].mxu0 %vm713_vm4, %v11584_v36  ;;  %v2853_v59 = vpop.f32.mrb[175].mxu1  ;;  %v3350_v36 = vld [vmem:[%s13506_s4 + $0x18] sm:$0xff] }
 0x273   :  { %2492 = vmatprep.mubr.f32.mxu0 %v13523_v61  ;;  %v9177_v5 = vpack.c.bf16 %v3350_v36, %v3349_v30 }
 0x275   :  { %v11744_v62 = vpop.f32.mrb[176].mxu1  ;;  %9178 = vmatpush1.bf16.msra.mxu1 %v9177_v5 }
 0x276   :  { %7407 = vmatmul.mubr.msk.f32.gmra.mrb[80].mxu0 %vm713_vm4, %v11589_v19  ;;  %v2858_v7 = vpop.f32.mrb[177].mxu1  ;;  %9179 = vmatprep.subr.bf16.mxu1 %v13525_v0 }
 0x277   :  { %2498 = vmatprep.mubr.f32.mxu0 %v13523_v61 }
 0x279   :  { %v11756_v44 = vpop.f32.mrb[178].mxu1  ;;  %9181 = vmatpush1.bf16.msra.mxu1 %v9180_v9 }
 0x27a   :  { %7408 = vmatmul.mubr.msk.f32.gmra.mrb[82].mxu0 %vm713_vm4, %v11594_v34  ;;  %v2863_v19 = vpop.f32.mrb[179].mxu1  ;;  %9182 = vmatprep.subr.bf16.mxu1 %v13525_v0 }
 0x27b   :  { %2504 = vmatprep.mubr.f32.mxu0 %v13523_v61 }
 0x27d   :  { %v11768_v25 = vpop.f32.mrb[180].mxu1  ;;  %9184 = vmatpush1.bf16.msra.mxu1 %v9183_v12 }
 0x27e   :  { %7409 = vmatmul.mubr.msk.f32.gmra.mrb[84].mxu0 %vm713_vm4, %v11599_v43  ;;  %v2868_v34 = vpop.f32.mrb[181].mxu1  ;;  %9185 = vmatprep.subr.bf16.mxu1 %v13525_v0 }
 0x27f   :  { %2510 = vmatprep.mubr.f32.mxu0 %v13523_v61 }
 0x281   :  { %v11780_v38 = vpop.f32.mrb[182].mxu1  ;;  %9187 = vmatpush1.bf16.msra.mxu1 %v9186_v20 }
 0x282   :  { %7410 = vmatmul.mubr.msk.f32.gmra.mrb[86].mxu0 %vm713_vm4, %v11604_v50  ;;  %v2873_v43 = vpop.f32.mrb[183].mxu1  ;;  %9188 = vmatprep.subr.bf16.mxu1 %v13525_v0 }
 0x283   :  { %2516 = vmatprep.mubr.f32.mxu0 %v13523_v61 }
 0x285   :  { %v11792_v63 = vpop.f32.mrb[184].mxu1  ;;  %9190 = vmatpush1.bf16.msra.mxu1 %v9189_v31  ;;  %v7553_v31 = vld [vmem:[%s13506_s4 + $0xd0] sm:$0xff] }
 0x286   :  { %7411 = vmatmul.mubr.msk.f32.gmra.mrb[88].mxu0 %vm713_vm4, %v11609_v55  ;;  %v2878_v50 = vpop.f32.mrb[185].mxu1  ;;  %9191 = vmatprep.subr.bf16.mxu1 %v13525_v0 }
 0x287   :  { %2522 = vmatprep.mubr.f32.mxu0 %v13523_v61 }
 0x289   :  { %v11804_v21 = vpop.f32.mrb[186].mxu1  ;;  %9193 = vmatpush1.bf16.msra.mxu1 %v9192_v40  ;;  %v9213_v40 = vpack.c.bf16 %v7554_v33, %v7553_v31 }
 0x28a   :  { %7412 = vmatmul.mubr.msk.f32.gmra.mrb[90].mxu0 %vm713_vm4, %v11614_v29  ;;  %v2883_v55 = vpop.f32.mrb[187].mxu1  ;;  %9194 = vmatprep.subr.bf16.mxu1 %v13525_v0 }
 0x28b   :  { %2528 = vmatprep.mubr.f32.mxu0 %v13523_v61 }
 0x28d   :  { %v2886_v49 = vpop.f32.mrb[188].mxu1  ;;  %9196 = vmatpush1.bf16.msra.mxu1 %v9195_v51  ;;  %v7556_v51 = vld [vmem:[%s13506_s4 + $0xe8] sm:$0xff] }
 0x28e   :  { %7413 = vmatmul.mubr.msk.f32.gmra.mrb[92].mxu0 %vm713_vm4, %v11619_v17  ;;  %v2888_v29 = vpop.f32.mrb[189].mxu1  ;;  %9197 = vmatprep.subr.bf16.mxu1 %v13525_v0  ;;  %v3363_v17 = vld [vmem:[%s13506_s4 + $0x80] sm:$0xff] }
 0x28f   :  { %2534 = vmatprep.mubr.f32.mxu0 %v13523_v61  ;;  %v7555_v29 = vld [vmem:[%s13506_s4 + $0xe0] sm:$0xff] }
 0x291   :  { %v2891_v26 = vpop.f32.mrb[190].mxu1 }
 0x292   :  { %7414 = vmatmul.mubr.msk.f32.gmra.mrb[94].mxu0 %vm713_vm4, %v11636_v46  ;;  %v2893_v54 = vpop.f32.mrb[191].mxu1  ;;  %v3364_v46 = vld [vmem:[%s13506_s4 + $0x88] sm:$0xff] }
 0x293   :  { %3046 = vmatprep.mubr.f32.mxu0 %v13523_v61 }
 0x296   :  { %7497 = vmatmul.mubr.msk.f32.vlgmr.msra.gmra.mrb[48].mxu0 %vm713_vm4, %v11647_v27  ;;  %v9198_v27 = vpack.c.bf16 %v3364_v46, %v3363_v17  ;;  %v9216_v46 = vpack.c.bf16 %v7556_v51, %v7555_v29 }
 0x297   :  { %3052 = vmatprep.mubr.f32.mxu0 %v13523_v61 }
 0x298   :  { %9199 = vmatpush1.bf16.msra.mxu1 %v9198_v27 }
 0x299   :  { %9200 = vmatprep.subr.bf16.mxu1 %v13525_v0 }
 0x29a   :  { %7498 = vmatmul.mubr.msk.f32.gmra.mrb[50].mxu0 %vm713_vm4, %v11654_v28  ;;  %v3241_v28 = vlaneseq }
 0x29b   :  { %3058 = vmatprep.mubr.f32.mxu0 %v13523_v61 }
 0x29e   :  { %7499 = vmatmul.mubr.msk.f32.gmra.mrb[52].mxu0 %vm713_vm4, %v11662_v41  ;;  %v3242_v41 = vshrl.u32 %v3241_v28, 7 }
 0x29f   :  { %3064 = vmatprep.mubr.f32.mxu0 %v13523_v61 }
 0x2a2   :  { %7500 = vmatmul.mubr.msk.f32.gmra.mrb[54].mxu0 %vm713_vm4, %v11667_v39  ;;  %v3243_v39 = vsub.s32 0, %v3242_v41 }
 0x2a3   :  { %3070 = vmatprep.mubr.f32.mxu0 %v13523_v61 }
 0x2a6   :  { %7501 = vmatmul.mubr.msk.f32.gmra.mrb[56].mxu0 %vm713_vm4, %v11672_v60  ;;  %v3239_v60 = vld [vmem:[%s13507_s3] sm:$0x3] }
 0x2a7   :  { %3076 = vmatprep.mubr.f32.mxu0 %v13523_v61 }
 0x2aa   :  { %7502 = vmatmul.mubr.msk.f32.gmra.mrb[58].mxu0 %vm713_vm4, %v11677_v24  ;;  %v3247_v24 = vsub.s32 1, %v3242_v41 }
 0x2ab   :  { %3082 = vmatprep.mubr.f32.mxu0 %v13523_v61 }
 0x2ae   :  { %7503 = vmatmul.mubr.msk.f32.gmra.mrb[60].mxu0 %vm713_vm4, %v11682_v45  ;;  %v11903_v45 = vrot.slane %v3239_v60, %v3243_v39  ;;  %v7557_v39 = vld [vmem:[%s13506_s4 + $0xf0] sm:$0xff] }
 0x2af   :  { %3088 = vmatprep.mubr.f32.mxu0 %v13523_v61 }
 0x2b2   :  { %7504 = vmatmul.mubr.msk.f32.gmra.mrb[62].mxu0 %vm713_vm4, %v11687_v42  ;;  %v11905_v42 = vrot.slane %v3239_v60, %v3247_v24  ;;  %v7558_v60 = vld [vmem:[%s13506_s4 + $0xf8] sm:$0xff] }
 0x2b3   :  { %3094 = vmatprep.mubr.f32.mxu0 %v13523_v61 }
 0x2b6   :  { %7505 = vmatmul.mubr.msk.f32.gmra.mrb[64].mxu0 %vm713_vm4, %v11692_v48 }
 0x2b7   :  { %3100 = vmatprep.mubr.f32.mxu0 %v13523_v61 }
 0x2ba   :  { %7506 = vmatmul.mubr.msk.f32.gmra.mrb[66].mxu0 %vm713_vm4, %v11697_v52 }
 0x2bb   :  { %3106 = vmatprep.mubr.f32.mxu0 %v13523_v61 }
 0x2be   :  { %7507 = vmatmul.mubr.msk.f32.gmra.mrb[68].mxu0 %vm713_vm4, %v11702_v57 }
 0x2bf   :  { %3112 = vmatprep.mubr.f32.mxu0 %v13523_v61 }
 0x2c2   :  { %7508 = vmatmul.mubr.msk.f32.gmra.mrb[70].mxu0 %vm713_vm4, %v11707_v1  ;;  %v7545_v1 = vld [vmem:[%s13506_s4 + $0x90] sm:$0xff] }
 0x2c3   :  { %3118 = vmatprep.mubr.f32.mxu0 %v13523_v61 }
 0x2c6   :  { %7509 = vmatmul.mubr.msk.f32.gmra.mrb[72].mxu0 %vm713_vm4, %v11712_v4  ;;  %v7546_v4 = vld [vmem:[%s13506_s4 + $0x98] sm:$0xff] }
 0x2c7   :  { %3124 = vmatprep.mubr.f32.mxu0 %v13523_v61 }
 0x2ca   :  { %7510 = vmatmul.mubr.msk.f32.gmra.mrb[74].mxu0 %vm713_vm4, %v11717_v32 }
 0x2cb   :  { %3130 = vmatprep.mubr.f32.mxu0 %v13523_v61 }
 0x2ce   :  { %7511 = vmatmul.mubr.msk.f32.gmra.mrb[76].mxu0 %vm713_vm4, %v11722_v35  ;;  %v9201_v35 = vpack.c.bf16 %v7546_v4, %v7545_v1  ;;  %v9219_v1 = vpack.c.bf16 %v7558_v60, %v7557_v39 }
 0x2cf   :  { %3136 = vmatprep.mubr.f32.mxu0 %v13523_v61 }
 0x2d2   :  { %7512 = vmatmul.mubr.msk.f32.gmra.mrb[78].mxu0 %vm713_vm4, %v11727_v18 }
 0x2d3   :  { %3142 = vmatprep.mubr.f32.mxu0 %v13523_v61 }
 0x2d6   :  { %7513 = vmatmul.mubr.msk.f32.gmra.mrb[80].mxu0 %vm713_vm4, %v11744_v62  ;;  %v9204_v62 = vpack.c.bf16 %v7548_v10, %v7547_v16  ;;  %v7560_v16 = vld [vmem:[%s13506_s4 + $0x108] sm:$0xff] }
 0x2d7   :  { %3148 = vmatprep.mubr.f32.mxu0 %v13523_v61 }
 0x2da   :  { %7514 = vmatmul.mubr.msk.f32.gmra.mrb[82].mxu0 %vm713_vm4, %v11756_v44  ;;  %v7550_v44 = vld [vmem:[%s13506_s4 + $0xb8] sm:$0xff] }
 0x2db   :  { %3154 = vmatprep.mubr.f32.mxu0 %v13523_v61  ;;  %v9207_v22 = vpack.c.bf16 %v7550_v44, %v7549_v11 }
 0x2de   :  { %7515 = vmatmul.mubr.msk.f32.gmra.mrb[84].mxu0 %vm713_vm4, %v11768_v25 }
 0x2df   :  { %3160 = vmatprep.mubr.f32.mxu0 %v13523_v61 }
 0x2e2   :  { %7516 = vmatmul.mubr.msk.f32.gmra.mrb[86].mxu0 %vm713_vm4, %v11780_v38 }
 0x2e3   :  { %3166 = vmatprep.mubr.f32.mxu0 %v13523_v61 }
 0x2e6   :  { %7517 = vmatmul.mubr.msk.f32.gmra.mrb[88].mxu0 %vm713_vm4, %v11792_v63 }
 0x2e7   :  { %3172 = vmatprep.mubr.f32.mxu0 %v13523_v61 }
 0x2ea   :  { %7518 = vmatmul.mubr.msk.f32.gmra.mrb[90].mxu0 %vm713_vm4, %v11804_v21 }
 0x2eb   :  { %3178 = vmatprep.mubr.f32.mxu0 %v13523_v61 }
 0x2ee   :  { %7519 = vmatmul.mubr.msk.f32.gmra.mrb[92].mxu0 %vm713_vm4, %v2886_v49 }
 0x2ef   :  { %3184 = vmatprep.mubr.f32.mxu0 %v13523_v61 }
 0x2f2   :  { %7520 = vmatmul.mubr.msk.f32.gmra.mrb[94].mxu0 %vm713_vm4, %v2891_v26 }
 0x369   :  { %v3048_v48 = vpop.f32.mrb[48].mxu0 }
 0x36a   :  { %v11908_v52 = vadd.f32 %v11903_v45, %v3048_v48  ;;  %v3050_v57 = vpop.f32.mrb[49].mxu0 }
 0x36b   :  { %v11917_v56 = vadd.f32 %v11905_v42, %v3050_v57 }
 0x36c   :  { %v3299_v58 = vmax.f32 %v11908_v52, 0.0 }
 0x36d   :  { %v3300_v32 = vmax.f32 %v11917_v56, 0.0  ;;  %v3054_v3 = vpop.f32.mrb[50].mxu0 }
 0x36e   :  { %v11922_v18 = vadd.f32 %v11903_v45, %v3054_v3  ;;  %v3056_v59 = vpop.f32.mrb[51].mxu0 }
 0x36f   :  { %v11931_v30 = vadd.f32 %v11905_v42, %v3056_v59  ;;  %7521 = vmatprep.mubr.msk.f32.mxu1 %vm3365_vm5, %v3300_v32  ;;  %v7559_v59 = vld [vmem:[%s13506_s4 + $0x100] sm:$0xff] }
 0x370   :  { %3503 = vmatmul.mubr.f32.vlgmr.msra.gmra.mrb[192].mxu1 %v3299_v58  ;;  %v3301_v7 = vmax.f32 %v11922_v18, 0.0 }
 0x371   :  { %v3302_v2 = vmax.f32 %v11931_v30, 0.0  ;;  %v3060_v36 = vpop.f32.mrb[52].mxu0  ;;  %9202 = vmatpush1.bf16.msra.mxu1 %v9201_v35 }
 0x372   :  { %v11941_v5 = vadd.f32 %v11903_v45, %v3060_v36  ;;  %v3062_v8 = vpop.f32.mrb[53].mxu0  ;;  %9203 = vmatprep.subr.bf16.mxu1 %v13525_v0 }
 0x373   :  { %v11951_v19 = vadd.f32 %v11905_v42, %v3062_v8  ;;  %7522 = vmatprep.mubr.msk.f32.mxu1 %vm3365_vm5, %v3302_v2  ;;  %v9222_v8 = vpack.c.bf16 %v7560_v16, %v7559_v59 }
 0x374   :  { %3508 = vmatmul.mubr.f32.gmra.mrb[194].mxu1 %v3301_v7  ;;  %v3303_v25 = vmax.f32 %v11941_v5, 0.0 }
 0x375   :  { %v3304_v9 = vmax.f32 %v11951_v19, 0.0  ;;  %v3066_v6 = vpop.f32.mrb[54].mxu0  ;;  %9205 = vmatpush1.bf16.msra.mxu1 %v9204_v62 }
 0x376   :  { %v11961_v34 = vadd.f32 %v11903_v45, %v3066_v6  ;;  %v3068_v12 = vpop.f32.mrb[55].mxu0  ;;  %9206 = vmatprep.subr.bf16.mxu1 %v13525_v0 }
 0x377   :  { %v11971_v38 = vadd.f32 %v11905_v42, %v3068_v12  ;;  %7523 = vmatprep.mubr.msk.f32.mxu1 %vm3365_vm5, %v3304_v9  ;;  %v7562_v12 = vld [vmem:[%s13506_s4 + $0x118] sm:$0xff] }
 0x378   :  { %3513 = vmatmul.mubr.f32.gmra.mrb[196].mxu1 %v3303_v25  ;;  %v13559_v13 = vmax.f32 %v11961_v34, 0.0 }
 0x379   :  { %v13561_v43 = vmax.f32 %v11971_v38, 0.0  ;;  %v3072_v20 = vpop.f32.mrb[56].mxu0  ;;  %9208 = vmatpush1.bf16.msra.mxu1 %v9207_v22  ;;  %v7561_v22 = vld [vmem:[%s13506_s4 + $0x110] sm:$0xff] }
 0x37a   :  { %v11981_v63 = vadd.f32 %v11903_v45, %v3072_v20  ;;  %v3074_v50 = vpop.f32.mrb[57].mxu0  ;;  %9209 = vmatprep.subr.bf16.mxu1 %v13525_v0 }
 0x37b   :  { %v11991_v37 = vadd.f32 %v11905_v42, %v3074_v50  ;;  %7524 = vmatprep.mubr.msk.f32.mxu1 %vm3365_vm5, %v13561_v43 }
 0x37c   :  { %3518 = vmatmul.mubr.f32.gmra.mrb[198].mxu1 %v13559_v13  ;;  %v13557_v47 = vmax.f32 %v11981_v63, 0.0  ;;  %v13572_v56 = vmax.f32 %v11981_v63, 0.0 }
 0x37d   :  { %v13558_v21 = vmax.f32 %v11991_v37, 0.0  ;;  %v3078_v55 = vpop.f32.mrb[58].mxu0  ;;  %9211 = vmatpush1.bf16.msra.mxu1 %v9210_v23  ;;  %v9225_v23 = vpack.c.bf16 %v7562_v12, %v7561_v22  ;;  %v13571_v52 = vmax.f32 %v11991_v37, 0.0 }
 0x37e   :  { %v12001_v53 = vadd.f32 %v11903_v45, %v3078_v55  ;;  %v3080_v49 = vpop.f32.mrb[59].mxu0  ;;  %9212 = vmatprep.subr.bf16.mxu1 %v13525_v0 }
 0x37f   :  { %v12011_v26 = vadd.f32 %v11905_v42, %v3080_v49  ;;  %7525 = vmatprep.mubr.msk.f32.mxu1 %vm3365_vm5, %v13558_v21 }
 0x380   :  { %3523 = vmatmul.mubr.f32.gmra.mrb[200].mxu1 %v13557_v47  ;;  %v13553_v27 = vmax.f32 %v12001_v53, 0.0 }
 0x381   :  { %v13556_v54 = vmax.f32 %v12011_v26, 0.0  ;;  %v3084_v17 = vpop.f32.mrb[60].mxu0  ;;  %9214 = vmatpush1.bf16.msra.mxu1 %v9213_v40 }
 0x382   :  { %v12021_v28 = vadd.f32 %v11903_v45, %v3084_v17  ;;  %v3086_v41 = vpop.f32.mrb[61].mxu0  ;;  %9215 = vmatprep.subr.bf16.mxu1 %v13525_v0 }
 0x383   :  { %v12031_v24 = vadd.f32 %v11905_v42, %v3086_v41  ;;  %7526 = vmatprep.mubr.msk.f32.mxu1 %vm3365_vm5, %v13556_v54 }
 0x384   :  { %3528 = vmatmul.mubr.f32.gmra.mrb[202].mxu1 %v13553_v27  ;;  %v13549_v4 = vmax.f32 %v12021_v28, 0.0  ;;  %v13576_v30 = vmax.f32 %v12021_v28, 0.0 }
 0x385   :  { %v13552_v48 = vmax.f32 %v12031_v24, 0.0  ;;  %v3090_v57 = vpop.f32.mrb[62].mxu0  ;;  %9217 = vmatpush1.bf16.msra.mxu1 %v9216_v46  ;;  %v13575_v18 = vmax.f32 %v12031_v24, 0.0 }
 0x386   :  { %v12041_v3 = vadd.f32 %v11903_v45, %v3090_v57  ;;  %v3092_v35 = vpop.f32.mrb[63].mxu0  ;;  %9218 = vmatprep.subr.bf16.mxu1 %v13525_v0 }
 0x387   :  { %v12051_v10 = vadd.f32 %v11905_v42, %v3092_v35  ;;  %7527 = vmatprep.mubr.msk.f32.mxu1 %vm3365_vm5, %v13552_v48 }
 0x388   :  { %3533 = vmatmul.mubr.f32.gmra.mrb[204].mxu1 %v13549_v4  ;;  %v13545_v11 = vmax.f32 %v12041_v3, 0.0 }
 0x389   :  { %v13548_v36 = vmax.f32 %v12051_v10, 0.0  ;;  %v3096_v62 = vpop.f32.mrb[64].mxu0  ;;  %9220 = vmatpush1.bf16.msra.mxu1 %v9219_v1 }
 0x38a   :  { %v12061_v44 = vadd.f32 %v11903_v45, %v3096_v62  ;;  %v3098_v6 = vpop.f32.mrb[65].mxu0  ;;  %9221 = vmatprep.subr.bf16.mxu1 %v13525_v0 }
 0x38b   :  { %v12071_v15 = vadd.f32 %v11905_v42, %v3098_v6  ;;  %7528 = vmatprep.mubr.msk.f32.mxu1 %vm3365_vm5, %v13548_v36 }
 0x38c   :  { %3538 = vmatmul.mubr.f32.gmra.mrb[206].mxu1 %v13545_v11  ;;  %v13541_v50 = vmax.f32 %v12061_v44, 0.0  ;;  %v13580_v19 = vmax.f32 %v12061_v44, 0.0 }
 0x38d   :  { %v13544_v14 = vmax.f32 %v12071_v15, 0.0  ;;  %v3102_v20 = vpop.f32.mrb[66].mxu0  ;;  %9223 = vmatpush1.bf16.msra.mxu1 %v9222_v8  ;;  %v13579_v5 = vmax.f32 %v12071_v15, 0.0 }
 0x38e   :  { %v12081_v31 = vadd.f32 %v11903_v45, %v3102_v20  ;;  %v3104_v33 = vpop.f32.mrb[67].mxu0  ;;  %9224 = vmatprep.subr.bf16.mxu1 %v13525_v0 }
 0x38f   :  { %v12085_v55 = vadd.f32 %v11905_v42, %v3104_v33  ;;  %7529 = vmatprep.mubr.msk.f32.mxu1 %vm3365_vm5, %v13544_v14 }
 0x390   :  { %3543 = vmatmul.mubr.f32.gmra.mrb[208].mxu1 %v13541_v50  ;;  %v13537_v29 = vmax.f32 %v12081_v31, 0.0 }
 0x391   :  { %v13540_v40 = vmax.f32 %v12085_v55, 0.0  ;;  %v3108_v49 = vpop.f32.mrb[68].mxu0  ;;  %9226 = vmatpush1.bf16.msra.mxu1 %v9225_v23 }
 0x392   :  { %v12095_v51 = vadd.f32 %v11903_v45, %v3108_v49  ;;  %v3110_v17 = vpop.f32.mrb[69].mxu0  ;;  %9263 = vmatprep.subr.bf16.mxu1 %v13525_v0 }
 0x393   :  { %v12099_v46 = vadd.f32 %v11905_v42, %v3110_v17  ;;  %7530 = vmatprep.mubr.msk.f32.mxu1 %vm3365_vm5, %v13540_v40 }
 0x394   :  { %3548 = vmatmul.mubr.f32.gmra.mrb[210].mxu1 %v13537_v29  ;;  %v13533_v60 = vmax.f32 %v12095_v51, 0.0 }
 0x395   :  { %v13536_v41 = vmax.f32 %v12099_v46, 0.0  ;;  %v3114_v39 = vpop.f32.mrb[70].mxu0 }
 0x396   :  { %v12109_v57 = vadd.f32 %v11903_v45, %v3114_v39  ;;  %v3116_v1 = vpop.f32.mrb[71].mxu0 }
 0x397   :  { %v12112_v35 = vadd.f32 %v11905_v42, %v3116_v1  ;;  %7531 = vmatprep.mubr.msk.f32.mxu1 %vm3365_vm5, %v13536_v41 }
 0x398   :  { %3553 = vmatmul.mubr.f32.gmra.mrb[212].mxu1 %v13533_v60  ;;  %v13529_v62 = vmax.f32 %v12109_v57, 0.0  ;;  %v13586_v63 = vmax.f32 %v12109_v57, 0.0 }
 0x399   :  { %v13532_v59 = vmax.f32 %v12112_v35, 0.0  ;;  %v3120_v16 = vpop.f32.mrb[72].mxu0 }
 0x39a   :  { %v12122_v8 = vadd.f32 %v11903_v45, %v3120_v16  ;;  %v3122_v6 = vpop.f32.mrb[73].mxu0 }
 0x39b   :  { %v12125_v22 = vadd.f32 %v11905_v42, %v3122_v6  ;;  %7532 = vmatprep.mubr.msk.f32.mxu1 %vm3365_vm5, %v13532_v59 }
 0x39c   :  { %3558 = vmatmul.mubr.f32.gmra.mrb[214].mxu1 %v13529_v62  ;;  %v13527_v23 = vmax.f32 %v12122_v8, 0.0 }
 0x39d   :  { %v13528_v12 = vmax.f32 %v12125_v22, 0.0  ;;  %v3126_v20 = vpop.f32.mrb[74].mxu0  ;;  %v13587_v37 = vmax.f32 %v12125_v22, 0.0 }
 0x39e   :  { %v12135_v33 = vadd.f32 %v11903_v45, %v3126_v20  ;;  %v3128_v49 = vpop.f32.mrb[75].mxu0 }
 0x39f   :  { %v12138_v17 = vadd.f32 %v11905_v42, %v3128_v49  ;;  %7533 = vmatprep.mubr.msk.f32.mxu1 %vm3365_vm5, %v13528_v12 }
 0x3a0   :  { %3563 = vmatmul.mubr.f32.gmra.mrb[216].mxu1 %v13527_v23  ;;  %v13530_v16 = vmax.f32 %v12135_v33, 0.0 }
 0x3a1   :  { %v13531_v39 = vmax.f32 %v12138_v17, 0.0  ;;  %v3132_v1 = vpop.f32.mrb[76].mxu0 }
 0x3a2   :  { %v12148_v6 = vadd.f32 %v11903_v45, %v3132_v1  ;;  %v3134_v20 = vpop.f32.mrb[77].mxu0 }
 0x3a3   :  { %v12151_v61 = vadd.f32 %v11905_v42, %v3134_v20  ;;  %7534 = vmatprep.mubr.msk.f32.mxu1 %vm3365_vm5, %v13531_v39 }
 0x3a4   :  { %3568 = vmatmul.mubr.f32.gmra.mrb[218].mxu1 %v13530_v16  ;;  %v13534_v23 = vmax.f32 %v12148_v6, 0.0 }
 0x3a5   :  { %v13535_v49 = vmax.f32 %v12151_v61, 0.0  ;;  %v3138_v0 = vpop.f32.mrb[78].mxu0 }
 0x3a6   :  { %v12161_v12 = vadd.f32 %v11903_v45, %v3138_v0  ;;  %v3140_v1 = vpop.f32.mrb[79].mxu0 }
 0x3a7   :  { %v12164_v62 = vadd.f32 %v11905_v42, %v3140_v1  ;;  %7535 = vmatprep.mubr.msk.f32.mxu1 %vm3365_vm5, %v13535_v49 }
 0x3a8   :  { %3573 = vmatmul.mubr.f32.gmra.mrb[220].mxu1 %v13534_v23  ;;  %v13538_v39 = vmax.f32 %v12161_v12, 0.0  ;;  %v13594_v24 = vmax.f32 %v12161_v12, 0.0 }
 0x3a9   :  { %v13539_v20 = vmax.f32 %v12164_v62, 0.0  ;;  %v3144_v16 = vpop.f32.mrb[80].mxu0  ;;  %v13593_v28 = vmax.f32 %v12164_v62, 0.0 }
 0x3aa   :  { %v12174_v59 = vadd.f32 %v11903_v45, %v3144_v16  ;;  %v3146_v0 = vpop.f32.mrb[81].mxu0 }
 0x3ab   :  { %v12177_v60 = vadd.f32 %v11905_v42, %v3146_v0  ;;  %7536 = vmatprep.mubr.msk.f32.mxu1 %vm3365_vm5, %v13539_v20 }
 0x3ac   :  { %3578 = vmatmul.mubr.f32.gmra.mrb[222].mxu1 %v13538_v39  ;;  %v13542_v49 = vmax.f32 %v12174_v59, 0.0 }
 0x3ad   :  { %v13543_v1 = vmax.f32 %v12177_v60, 0.0  ;;  %v3150_v23 = vpop.f32.mrb[82].mxu0 }
 0x3ae   :  { %v12187_v41 = vadd.f32 %v11903_v45, %v3150_v23  ;;  %v3152_v16 = vpop.f32.mrb[83].mxu0 }
 0x3af   :  { %v12190_v29 = vadd.f32 %v11905_v42, %v3152_v16  ;;  %7537 = vmatprep.mubr.msk.f32.mxu1 %vm3365_vm5, %v13543_v1 }
 0x3b0   :  { %3583 = vmatmul.mubr.f32.gmra.mrb[224].mxu1 %v13542_v49  ;;  %v13546_v20 = vmax.f32 %v12187_v41, 0.0  ;;  %v13598_v44 = vmax.f32 %v12187_v41, 0.0 }
 0x3b1   :  { %v13547_v0 = vmax.f32 %v12190_v29, 0.0  ;;  %v3156_v39 = vpop.f32.mrb[84].mxu0 }
 0x3b2   :  { %v12200_v40 = vadd.f32 %v11903_v45, %v3156_v39  ;;  %v3158_v23 = vpop.f32.mrb[85].mxu0 }
 0x3b3   :  { %v12203_v50 = vadd.f32 %v11905_v42, %v3158_v23  ;;  %7538 = vmatprep.mubr.msk.f32.mxu1 %vm3365_vm5, %v13547_v0 }
 0x3b4   :  { %3588 = vmatmul.mubr.f32.gmra.mrb[226].mxu1 %v13546_v20  ;;  %v13550_v1 = vmax.f32 %v12200_v40, 0.0 }
 0x3b5   :  { %v13551_v16 = vmax.f32 %v12203_v50, 0.0  ;;  %v3162_v49 = vpop.f32.mrb[86].mxu0  ;;  %v13599_v15 = vmax.f32 %v12203_v50, 0.0 }
 0x3b6   :  { %v12213_v14 = vadd.f32 %v11903_v45, %v3162_v49  ;;  %v3164_v39 = vpop.f32.mrb[87].mxu0 }
 0x3b7   :  { %v12216_v11 = vadd.f32 %v11905_v42, %v3164_v39  ;;  %7539 = vmatprep.mubr.msk.f32.mxu1 %vm3365_vm5, %v13551_v16 }
 0x3b8   :  { %3593 = vmatmul.mubr.f32.gmra.mrb[228].mxu1 %v13550_v1  ;;  %v13554_v0 = vmax.f32 %v12213_v14, 0.0 }
 0x3b9   :  { %v13555_v23 = vmax.f32 %v12216_v11, 0.0  ;;  %v3168_v20 = vpop.f32.mrb[88].mxu0 }
 0x3ba   :  { %v12226_v36 = vadd.f32 %v11903_v45, %v3168_v20  ;;  %v3170_v49 = vpop.f32.mrb[89].mxu0 }
 0x3bb   :  { %v12229_v4 = vadd.f32 %v11905_v42, %v3170_v49  ;;  %7540 = vmatprep.mubr.msk.f32.mxu1 %vm3365_vm5, %v13555_v23 }
 0x3bc   :  { %3598 = vmatmul.mubr.f32.gmra.mrb[230].mxu1 %v13554_v0  ;;  %v13562_v16 = vmax.f32 %v12226_v36, 0.0 }
 0x3bd   :  { %v13560_v39 = vmax.f32 %v12229_v4, 0.0  ;;  %v3174_v1 = vpop.f32.mrb[90].mxu0 }
 0x3be   :  { %v12239_v48 = vadd.f32 %v11903_v45, %v3174_v1  ;;  %v3176_v20 = vpop.f32.mrb[91].mxu0 }
 0x3bf   :  { %v12242_v27 = vadd.f32 %v11905_v42, %v3176_v20  ;;  %7541 = vmatprep.mubr.msk.f32.mxu1 %vm3365_vm5, %v13560_v39 }
 0x3c0   :  { %3603 = vmatmul.mubr.f32.gmra.mrb[232].mxu1 %v13562_v16  ;;  %v3341_v23 = vmax.f32 %v12239_v48, 0.0 }
 0x3c1   :  { %v3342_v49 = vmax.f32 %v12242_v27, 0.0  ;;  %v3180_v0 = vpop.f32.mrb[92].mxu0 }
 0x3c2   :  { %v3295_v54 = vadd.f32 %v11903_v45, %v3180_v0  ;;  %v3182_v1 = vpop.f32.mrb[93].mxu0 }
 0x3c3   :  { %v3296_v47 = vadd.f32 %v11905_v42, %v3182_v1  ;;  %7542 = vmatprep.mubr.msk.f32.mxu1 %vm3365_vm5, %v3342_v49 }
 0x3c4   :  { %3608 = vmatmul.mubr.f32.gmra.mrb[234].mxu1 %v3341_v23  ;;  %v3343_v13 = vmax.f32 %v3295_v54, 0.0  ;;  %v13592_v54 = vmax.f32 %v12148_v6, 0.0 }
 0x3c5   :  { %v3344_v20 = vmax.f32 %v3296_v47, 0.0  ;;  %v3186_v21 = vpop.f32.mrb[94].mxu0  ;;  %v13589_v47 = vmax.f32 %v12138_v17, 0.0 }
 0x3c6   :  { %v3297_v39 = vadd.f32 %v11903_v45, %v3186_v21  ;;  %v3188_v43 = vpop.f32.mrb[95].mxu0  ;;  %v13569_v45 = vmax.f32 %v11971_v38, 0.0  ;;  %v13584_v38 = vmax.f32 %v12095_v51, 0.0  ;;  %v13588_v21 = vmax.f32 %v12122_v8, 0.0 }
 0x3c7   :  { %v3298_v16 = vadd.f32 %v11905_v42, %v3188_v43  ;;  %7543 = vmatprep.mubr.msk.f32.mxu1 %vm3365_vm5, %v3344_v20  ;;  %v13570_v42 = vmax.f32 %v11961_v34, 0.0  ;;  %v13583_v34 = vmax.f32 %v12099_v46, 0.0  ;;  %v13585_v43 = vmax.f32 %v12112_v35, 0.0 }
 0x3c8   :  { %3613 = vmatmul.mubr.f32.gmra.mrb[236].mxu1 %v3343_v13  ;;  %v3345_v48 = vmax.f32 %v3297_v39, 0.0  ;;  %v13602_v51 = vmax.f32 %v12213_v14, 0.0  ;;  %v13604_v46 = vmax.f32 %v12226_v36, 0.0 }
 0x3c9   :  { %v3346_v27 = vmax.f32 %v3298_v16, 0.0 }
 0x3cb   :  { %7544 = vmatprep.mubr.msk.f32.mxu1 %vm3365_vm5, %v3346_v27 }
 0x3cc   :  { %3618 = vmatmul.mubr.f32.gmra.mrb[238].mxu1 %v3345_v48 }
 0x3cd   :  { %7563 = vmatprep.mubr.msk.f32.mxu1 %vm3365_vm5, %v3300_v32  ;;  %v13573_v32 = vmax.f32 %v12011_v26, 0.0  ;;  %v13591_v26 = vmax.f32 %v12151_v61, 0.0  ;;  %v13597_v61 = vmax.f32 %v12190_v29, 0.0  ;;  %v13603_v29 = vmax.f32 %v12229_v4, 0.0 }
 0x3d0   :  { %3707 = vmatmul.mubr.f32.vlgmr.msra.gmra.mrb[240].mxu1 %v3299_v58  ;;  %v13574_v58 = vmax.f32 %v12001_v53, 0.0  ;;  %v13590_v53 = vmax.f32 %v12135_v33, 0.0 }
 0x3d1   :  { %7564 = vmatprep.mubr.msk.f32.mxu1 %vm3365_vm5, %v3302_v2  ;;  %v13577_v2 = vmax.f32 %v12051_v10, 0.0  ;;  %v13596_v10 = vmax.f32 %v12174_v59, 0.0 }
 0x3d4   :  { %3712 = vmatmul.mubr.f32.gmra.mrb[242].mxu1 %v3301_v7  ;;  %v13578_v7 = vmax.f32 %v12041_v3, 0.0  ;;  %v13595_v3 = vmax.f32 %v12177_v60, 0.0 }
 0x3d5   :  { %7565 = vmatprep.mubr.msk.f32.mxu1 %vm3365_vm5, %v3304_v9  ;;  %v13581_v9 = vmax.f32 %v12085_v55, 0.0  ;;  %v13601_v55 = vmax.f32 %v12216_v11, 0.0 }
 0x3d8   :  { %3717 = vmatmul.mubr.f32.gmra.mrb[244].mxu1 %v3303_v25  ;;  %v13582_v25 = vmax.f32 %v12081_v31, 0.0  ;;  %v13600_v31 = vmax.f32 %v12200_v40, 0.0 }
 0x3d9   :  { %7566 = vmatprep.mubr.msk.f32.mxu1 %vm3365_vm5, %v13569_v45 }
 0x3dc   :  { %3722 = vmatmul.mubr.f32.gmra.mrb[246].mxu1 %v13570_v42 }
 0x3dd   :  { %7567 = vmatprep.mubr.msk.f32.mxu1 %vm3365_vm5, %v13571_v52 }
 0x3e0   :  { %3727 = vmatmul.mubr.f32.gmra.mrb[248].mxu1 %v13572_v56 }
 0x3e1   :  { %7568 = vmatprep.mubr.msk.f32.mxu1 %vm3365_vm5, %v13573_v32 }
 0x3e4   :  { %3732 = vmatmul.mubr.f32.gmra.mrb[250].mxu1 %v13574_v58 }
 0x3e5   :  { %7569 = vmatprep.mubr.msk.f32.mxu1 %vm3365_vm5, %v13575_v18  ;;  %v3852_v18 = vld [vmem:[%s13508_s5 + $0x8] sm:$0xff] }
 0x3e6   :  { %7587 = vmatprep.mubr.msk.f32.mxu0 %vm3875_vm6, %v3852_v18 }
 0x3e8   :  { %3737 = vmatmul.mubr.f32.gmra.mrb[252].mxu1 %v13576_v30  ;;  %v7600_v30 = vld [vmem:[%s13508_s5 + $0xc8] sm:$0xff] }
 0x3e9   :  { %7570 = vmatprep.mubr.msk.f32.mxu1 %vm3365_vm5, %v13577_v2 }
 0x3ec   :  { %3742 = vmatmul.mubr.f32.gmra.mrb[254].mxu1 %v13578_v7 }
 0x3ed   :  { %7571 = vmatprep.mubr.msk.f32.mxu1 %vm3365_vm5, %v13579_v5 }
 0x3f0   :  { %3747 = vmatmul.mubr.f32.gmra.mrb[0].mxu1 %v13580_v19 }
 0x3f1   :  { %7572 = vmatprep.mubr.msk.f32.mxu1 %vm3365_vm5, %v13581_v9 }
 0x3f4   :  { %3752 = vmatmul.mubr.f32.gmra.mrb[2].mxu1 %v13582_v25 }
 0x3f5   :  { %7573 = vmatprep.mubr.msk.f32.mxu1 %vm3365_vm5, %v13583_v34 }
 0x3f8   :  { %3757 = vmatmul.mubr.f32.gmra.mrb[4].mxu1 %v13584_v38 }
 0x3f9   :  { %7574 = vmatprep.mubr.msk.f32.mxu1 %vm3365_vm5, %v13585_v43 }
 0x3fc   :  { %3762 = vmatmul.mubr.f32.gmra.mrb[6].mxu1 %v13586_v63 }
 0x3fd   :  { %7575 = vmatprep.mubr.msk.f32.mxu1 %vm3365_vm5, %v13587_v37 }
 0x400   :  { %3767 = vmatmul.mubr.f32.gmra.mrb[8].mxu1 %v13588_v21 }
 0x401   :  { %7576 = vmatprep.mubr.msk.f32.mxu1 %vm3365_vm5, %v13589_v47 }
 0x404   :  { %3772 = vmatmul.mubr.f32.gmra.mrb[10].mxu1 %v13590_v53 }
 0x405   :  { %7577 = vmatprep.mubr.msk.f32.mxu1 %vm3365_vm5, %v13591_v26 }
 0x408   :  { %3777 = vmatmul.mubr.f32.gmra.mrb[12].mxu1 %v13592_v54 }
 0x409   :  { %7578 = vmatprep.mubr.msk.f32.mxu1 %vm3365_vm5, %v13593_v28 }
 0x40c   :  { %3782 = vmatmul.mubr.f32.gmra.mrb[14].mxu1 %v13594_v24 }
 0x40d   :  { %7579 = vmatprep.mubr.msk.f32.mxu1 %vm3365_vm5, %v13595_v3 }
 0x410   :  { %3787 = vmatmul.mubr.f32.gmra.mrb[16].mxu1 %v13596_v10 }
 0x411   :  { %7580 = vmatprep.mubr.msk.f32.mxu1 %vm3365_vm5, %v13597_v61 }
 0x414   :  { %3792 = vmatmul.mubr.f32.gmra.mrb[18].mxu1 %v13598_v44 }
 0x415   :  { %7581 = vmatprep.mubr.msk.f32.mxu1 %vm3365_vm5, %v13599_v15 }
 0x418   :  { %3797 = vmatmul.mubr.f32.gmra.mrb[20].mxu1 %v13600_v31 }
 0x419   :  { %7582 = vmatprep.mubr.msk.f32.mxu1 %vm3365_vm5, %v13601_v55  ;;  %v13605_v55 = vmov 0.0|0.0  }
 0x41c   :  { %3802 = vmatmul.mubr.f32.gmra.mrb[22].mxu1 %v13602_v51 }
 0x41d   :  { %7583 = vmatprep.mubr.msk.f32.mxu1 %vm3365_vm5, %v13603_v29 }
 0x420   :  { %3807 = vmatmul.mubr.f32.gmra.mrb[24].mxu1 %v13604_v46 }
 0x421   :  { %7584 = vmatprep.mubr.msk.f32.mxu1 %vm3365_vm5, %v3342_v49 }
 0x424   :  { %3812 = vmatmul.mubr.f32.gmra.mrb[26].mxu1 %v3341_v23 }
 0x425   :  { %7585 = vmatprep.mubr.msk.f32.mxu1 %vm3365_vm5, %v3344_v20 }
 0x428   :  { %3817 = vmatmul.mubr.f32.gmra.mrb[28].mxu1 %v3343_v13 }
 0x429   :  { %7586 = vmatprep.mubr.msk.f32.mxu1 %vm3365_vm5, %v3346_v27 }
 0x42c   :  { %3822 = vmatmul.mubr.f32.gmra.mrb[30].mxu1 %v3345_v48 }
 0x42d   :  { %7623 = vmatprep.mubr.msk.f32.mxu1 %vm3875_vm6, %v7600_v30 }
 0x443   :  { %v3504_v11 = vpop.f32.mrb[192].mxu1 }
 0x444   :  { %v3506_v50 = vpop.f32.mrb[193].mxu1 }
 0x447   :  { %v3509_v14 = vpop.f32.mrb[194].mxu1 }
 0x448   :  { %v3511_v40 = vpop.f32.mrb[195].mxu1 }
 0x44b   :  { %v12366_v41 = vpop.f32.mrb[196].mxu1 }
 0x44c   :  { %v3516_v4 = vpop.f32.mrb[197].mxu1 }
 0x44f   :  { %v12368_v60 = vpop.f32.mrb[198].mxu1 }
 0x450   :  { %v3521_v36 = vpop.f32.mrb[199].mxu1 }
 0x453   :  { %v12370_v57 = vpop.f32.mrb[200].mxu1 }
 0x454   :  { %v3526_v35 = vpop.f32.mrb[201].mxu1 }
 0x457   :  { %v12372_v59 = vpop.f32.mrb[202].mxu1 }
 0x458   :  { %v3531_v62 = vpop.f32.mrb[203].mxu1 }
 0x45b   :  { %v12374_v13 = vpop.f32.mrb[204].mxu1 }
 0x45c   :  { %v3536_v8 = vpop.f32.mrb[205].mxu1 }
 0x45f   :  { %v12376_v22 = vpop.f32.mrb[206].mxu1 }
 0x460   :  { %v3541_v12 = vpop.f32.mrb[207].mxu1 }
 0x463   :  { %v12378_v33 = vpop.f32.mrb[208].mxu1 }
 0x464   :  { %v3546_v17 = vpop.f32.mrb[209].mxu1 }
 0x467   :  { %v12380_v6 = vpop.f32.mrb[210].mxu1 }
 0x468   :  { %v3551_v0 = vpop.f32.mrb[211].mxu1 }
 0x46b   :  { %v12382_v16 = vpop.f32.mrb[212].mxu1 }
 0x46c   :  { %v3556_v23 = vpop.f32.mrb[213].mxu1 }
 0x46f   :  { %v12384_v39 = vpop.f32.mrb[214].mxu1 }
 0x470   :  { %v3561_v49 = vpop.f32.mrb[215].mxu1 }
 0x473   :  { %v12386_v1 = vpop.f32.mrb[216].mxu1 }
 0x474   :  { %v3566_v20 = vpop.f32.mrb[217].mxu1 }
 0x477   :  { %v12388_v27 = vpop.f32.mrb[218].mxu1 }
 0x478   :  { %v3571_v48 = vpop.f32.mrb[219].mxu1 }
 0x47b   :  { %v12390_v45 = vpop.f32.mrb[220].mxu1 }
 0x47c   :  { %v3576_v42 = vpop.f32.mrb[221].mxu1 }
 0x47f   :  { %v12392_v52 = vpop.f32.mrb[222].mxu1 }
 0x480   :  { %v3581_v56 = vpop.f32.mrb[223].mxu1 }
 0x483   :  { %v12394_v32 = vpop.f32.mrb[224].mxu1 }
 0x484   :  { %v3586_v58 = vpop.f32.mrb[225].mxu1 }
 0x487   :  { %v12404_v2 = vpop.f32.mrb[226].mxu1 }
 0x488   :  { %v3591_v7 = vpop.f32.mrb[227].mxu1 }
 0x48b   :  { %v12406_v5 = vpop.f32.mrb[228].mxu1 }
 0x48c   :  { %v3596_v19 = vpop.f32.mrb[229].mxu1 }
 0x48f   :  { %v12408_v9 = vpop.f32.mrb[230].mxu1 }
 0x490   :  { %v3601_v25 = vpop.f32.mrb[231].mxu1 }
 0x493   :  { %v12410_v34 = vpop.f32.mrb[232].mxu1 }
 0x494   :  { %v3606_v38 = vpop.f32.mrb[233].mxu1 }
 0x497   :  { %v12412_v43 = vpop.f32.mrb[234].mxu1 }
 0x498   :  { %v3611_v63 = vpop.f32.mrb[235].mxu1 }
 0x49b   :  { %v12414_v37 = vpop.f32.mrb[236].mxu1 }
 0x49c   :  { %v3616_v21 = vpop.f32.mrb[237].mxu1 }
 0x49f   :  { %v12416_v47 = vpop.f32.mrb[238].mxu1 }
 0x4a0   :  { %v3621_v53 = vpop.f32.mrb[239].mxu1 }
 0x4a3   :  { %v3708_v26 = vpop.f32.mrb[240].mxu1 }
 0x4a4   :  { %v3827_v54 = vmax.f32 %v3504_v11, %v3708_v26  ;;  %v3710_v28 = vpop.f32.mrb[241].mxu1 }
 0x4a7   :  { %v3713_v24 = vpop.f32.mrb[242].mxu1 }
 0x4a8   :  { %v3828_v3 = vmax.f32 %v3509_v14, %v3713_v24  ;;  %v3715_v10 = vpop.f32.mrb[243].mxu1 }
 0x4aa   :  { %v9228_v61 = vpack.c.bf16 %v3828_v3, %v3827_v54 }
 0x4ab   :  { %v3718_v44 = vpop.f32.mrb[244].mxu1 }
 0x4ac   :  { %v3829_v15 = vmax.f32 %v12366_v41, %v3718_v44  ;;  %v3720_v31 = vpop.f32.mrb[245].mxu1  ;;  %9229 = vmatpush1.bf16.msra.mxu0 %v9228_v61  ;;  %9265 = vmatpush1.bf16.msra.mxu1 %v9228_v61 }
 0x4ad   :  { %9230 = vmatprep.subr.bf16.mxu0 %v13605_v55  ;;  %9266 = vmatprep.subr.bf16.mxu1 %v13605_v55 }
 0x4af   :  { %v3723_v51 = vpop.f32.mrb[246].mxu1 }
 0x4b0   :  { %v3830_v29 = vmax.f32 %v12368_v60, %v3723_v51  ;;  %v3725_v46 = vpop.f32.mrb[247].mxu1 }
 0x4b2   :  { %v9231_v11 = vpack.c.bf16 %v3830_v29, %v3829_v15 }
 0x4b3   :  { %v3728_v50 = vpop.f32.mrb[248].mxu1 }
 0x4b4   :  { %v3831_v14 = vmax.f32 %v12370_v57, %v3728_v50  ;;  %v3730_v40 = vpop.f32.mrb[249].mxu1  ;;  %9232 = vmatpush1.bf16.msra.mxu0 %v9231_v11  ;;  %9268 = vmatpush1.bf16.msra.mxu1 %v9231_v11 }
 0x4b5   :  { %9233 = vmatprep.subr.bf16.mxu0 %v13605_v55  ;;  %9269 = vmatprep.subr.bf16.mxu1 %v13605_v55 }
 0x4b7   :  { %v3733_v41 = vpop.f32.mrb[250].mxu1 }
 0x4b8   :  { %v3832_v4 = vmax.f32 %v12372_v59, %v3733_v41  ;;  %v3735_v36 = vpop.f32.mrb[251].mxu1 }
 0x4ba   :  { %v9234_v35 = vpack.c.bf16 %v3832_v4, %v3831_v14 }
 0x4bb   :  { %v3738_v62 = vpop.f32.mrb[252].mxu1 }
 0x4bc   :  { %v3833_v60 = vmax.f32 %v12374_v13, %v3738_v62  ;;  %v3740_v8 = vpop.f32.mrb[253].mxu1  ;;  %9235 = vmatpush1.bf16.msra.mxu0 %v9234_v35  ;;  %9271 = vmatpush1.bf16.msra.mxu1 %v9234_v35 }
 0x4bd   :  { %9236 = vmatprep.subr.bf16.mxu0 %v13605_v55  ;;  %9272 = vmatprep.subr.bf16.mxu1 %v13605_v55 }
 0x4bf   :  { %v3743_v57 = vpop.f32.mrb[254].mxu1 }
 0x4c0   :  { %v3834_v12 = vmax.f32 %v12376_v22, %v3743_v57  ;;  %v3745_v17 = vpop.f32.mrb[255].mxu1  ;;  %v3854_v57 = vld [vmem:[%s13508_s5 + $0x18] sm:$0xff] }
 0x4c1   :  { %v7601_v17 = vld [vmem:[%s13508_s5 + $0xd0] sm:$0xff] }
 0x4c2   :  { %v9237_v0 = vpack.c.bf16 %v3834_v12, %v3833_v60  ;;  %v3853_v12 = vld [vmem:[%s13508_s5 + $0x10] sm:$0xff] }
 0x4c3   :  { %v3748_v23 = vpop.f32.mrb[0].mxu1 }
 0x4c4   :  { %v3835_v59 = vmax.f32 %v12378_v33, %v3748_v23  ;;  %v3750_v49 = vpop.f32.mrb[1].mxu1  ;;  %9238 = vmatpush1.bf16.msra.mxu0 %v9237_v0  ;;  %9274 = vmatpush1.bf16.msra.mxu1 %v9237_v0  ;;  %v3856_v0 = vld [vmem:[%s13508_s5 + $0x28] sm:$0xff] }
 0x4c5   :  { %9239 = vmatprep.subr.bf16.mxu0 %v13605_v55  ;;  %9275 = vmatprep.subr.bf16.mxu1 %v13605_v55  ;;  %v7604_v23 = vld [vmem:[%s13508_s5 + $0xe8] sm:$0xff]  ;;  %v7603_v49 = vld [vmem:[%s13508_s5 + $0xe0] sm:$0xff] }
 0x4c7   :  { %v3753_v13 = vpop.f32.mrb[2].mxu1 }
 0x4c8   :  { %v3836_v20 = vmax.f32 %v12380_v6, %v3753_v13  ;;  %v3755_v48 = vpop.f32.mrb[3].mxu1  ;;  %v3858_v13 = vld [vmem:[%s13508_s5 + $0x38] sm:$0xff] }
 0x4c9   :  { %v3857_v48 = vld [vmem:[%s13508_s5 + $0x30] sm:$0xff] }
 0x4ca   :  { %v9240_v42 = vpack.c.bf16 %v3836_v20, %v3835_v59  ;;  %v3855_v59 = vld [vmem:[%s13508_s5 + $0x20] sm:$0xff]  ;;  %v7606_v20 = vld [vmem:[%s13508_s5 + $0xf8] sm:$0xff] }
 0x4cb   :  { %v3758_v56 = vpop.f32.mrb[4].mxu1 }
 0x4cc   :  { %v3837_v22 = vmax.f32 %v12382_v16, %v3758_v56  ;;  %v3760_v58 = vpop.f32.mrb[5].mxu1  ;;  %9241 = vmatpush1.bf16.msra.mxu0 %v9240_v42  ;;  %9277 = vmatpush1.bf16.msra.mxu1 %v9240_v42  ;;  %v7605_v42 = vld [vmem:[%s13508_s5 + $0xf0] sm:$0xff]  ;;  %v3860_v56 = vld [vmem:[%s13508_s5 + $0x48] sm:$0xff] }
 0x4cd   :  { %9242 = vmatprep.subr.bf16.mxu0 %v13605_v55  ;;  %9278 = vmatprep.subr.bf16.mxu1 %v13605_v55  ;;  %v3859_v58 = vld [vmem:[%s13508_s5 + $0x40] sm:$0xff] }
 0x4cf   :  { %v3763_v33 = vpop.f32.mrb[6].mxu1 }
 0x4d0   :  { %v3838_v18 = vmax.f32 %v12384_v39, %v3763_v33  ;;  %v3765_v30 = vpop.f32.mrb[7].mxu1  ;;  %v7607_v33 = vld [vmem:[%s13508_s5 + $0x100] sm:$0xff] }
 0x4d1   :  { %v7610_v30 = vld [vmem:[%s13508_s5 + $0x118] sm:$0xff] }
 0x4d2   :  { %v9243_v7 = vpack.c.bf16 %v3838_v18, %v3837_v22  ;;  %v7608_v22 = vld [vmem:[%s13508_s5 + $0x108] sm:$0xff]  ;;  %v3862_v18 = vld [vmem:[%s13508_s5 + $0x58] sm:$0xff] }
 0x4d3   :  { %v3768_v19 = vpop.f32.mrb[8].mxu1 }
 0x4d4   :  { %v3839_v6 = vmax.f32 %v12386_v1, %v3768_v19  ;;  %v3770_v25 = vpop.f32.mrb[9].mxu1  ;;  %9244 = vmatpush1.bf16.msra.mxu0 %v9243_v7  ;;  %9280 = vmatpush1.bf16.msra.mxu1 %v9243_v7  ;;  %v3861_v7 = vld [vmem:[%s13508_s5 + $0x50] sm:$0xff] }
 0x4d5   :  { %9245 = vmatprep.subr.bf16.mxu0 %v13605_v55  ;;  %9281 = vmatprep.subr.bf16.mxu1 %v13605_v55  ;;  %v7609_v19 = vld [vmem:[%s13508_s5 + $0x110] sm:$0xff]  ;;  %v7612_v25 = vld [vmem:[%s13508_s5 + $0x128] sm:$0xff] }
 0x4d7   :  { %v3773_v16 = vpop.f32.mrb[10].mxu1 }
 0x4d8   :  { %v3840_v38 = vmax.f32 %v12388_v27, %v3773_v16  ;;  %v3775_v63 = vpop.f32.mrb[11].mxu1  ;;  %v3863_v16 = vld [vmem:[%s13508_s5 + $0x60] sm:$0xff] }
 0x4d9   :  { %v3866_v63 = vld [vmem:[%s13508_s5 + $0x78] sm:$0xff] }
 0x4da   :  { %v9246_v21 = vpack.c.bf16 %v3840_v38, %v3839_v6  ;;  %v3864_v6 = vld [vmem:[%s13508_s5 + $0x68] sm:$0xff]  ;;  %v7611_v38 = vld [vmem:[%s13508_s5 + $0x120] sm:$0xff] }
 0x4db   :  { %v3778_v53 = vpop.f32.mrb[12].mxu1 }
 0x4dc   :  { %v3841_v39 = vmax.f32 %v12390_v45, %v3778_v53  ;;  %v3780_v26 = vpop.f32.mrb[13].mxu1  ;;  %9247 = vmatpush1.bf16.msra.mxu0 %v9246_v21  ;;  %9283 = vmatpush1.bf16.msra.mxu1 %v9246_v21  ;;  %v7614_v21 = vld [vmem:[%s13508_s5 + $0x138] sm:$0xff]  ;;  %v3865_v53 = vld [vmem:[%s13508_s5 + $0x70] sm:$0xff] }
 0x4dd   :  { %9248 = vmatprep.subr.bf16.mxu0 %v13605_v55  ;;  %9284 = vmatprep.subr.bf16.mxu1 %v13605_v55  ;;  %v3868_v26 = vld [vmem:[%s13508_s5 + $0x88] sm:$0xff] }
 0x4df   :  { %v3783_v1 = vpop.f32.mrb[14].mxu1 }
 0x4e0   :  { %v3842_v54 = vmax.f32 %v12392_v52, %v3783_v1  ;;  %v3785_v28 = vpop.f32.mrb[15].mxu1  ;;  %v7616_v1 = vld [vmem:[%s13508_s5 + $0x148] sm:$0xff] }
 0x4e1   :  { %v7615_v28 = vld [vmem:[%s13508_s5 + $0x140] sm:$0xff] }
 0x4e2   :  { %v9249_v24 = vpack.c.bf16 %v3842_v54, %v3841_v39  ;;  %v7613_v39 = vld [vmem:[%s13508_s5 + $0x130] sm:$0xff]  ;;  %v3867_v54 = vld [vmem:[%s13508_s5 + $0x80] sm:$0xff] }
 0x4e3   :  { %v3788_v3 = vpop.f32.mrb[16].mxu1 }
 0x4e4   :  { %v3843_v27 = vmax.f32 %v12394_v32, %v3788_v3  ;;  %v3790_v10 = vpop.f32.mrb[17].mxu1  ;;  %9250 = vmatpush1.bf16.msra.mxu0 %v9249_v24  ;;  %9286 = vmatpush1.bf16.msra.mxu1 %v9249_v24  ;;  %v3870_v24 = vld [vmem:[%s13508_s5 + $0x98] sm:$0xff] }
 0x4e5   :  { %9251 = vmatprep.subr.bf16.mxu0 %v13605_v55  ;;  %9287 = vmatprep.subr.bf16.mxu1 %v13605_v55  ;;  %v7618_v3 = vld [vmem:[%s13508_s5 + $0x158] sm:$0xff]  ;;  %v7617_v10 = vld [vmem:[%s13508_s5 + $0x150] sm:$0xff] }
 0x4e7   :  { %v3793_v45 = vpop.f32.mrb[18].mxu1 }
 0x4e8   :  { %v3844_v61 = vmax.f32 %v12404_v2, %v3793_v45  ;;  %v3795_v44 = vpop.f32.mrb[19].mxu1  ;;  %v3872_v45 = vld [vmem:[%s13508_s5 + $0xa8] sm:$0xff] }
 0x4e9   :  { %v3871_v44 = vld [vmem:[%s13508_s5 + $0xa0] sm:$0xff] }
 0x4ea   :  { %v9252_v15 = vpack.c.bf16 %v3844_v61, %v3843_v27  ;;  %v3869_v27 = vld [vmem:[%s13508_s5 + $0x90] sm:$0xff]  ;;  %v7620_v61 = vld [vmem:[%s13508_s5 + $0x168] sm:$0xff] }
 0x4eb   :  { %v3798_v31 = vpop.f32.mrb[20].mxu1 }
 0x4ec   :  { %v3845_v52 = vmax.f32 %v12406_v5, %v3798_v31  ;;  %v3800_v51 = vpop.f32.mrb[21].mxu1  ;;  %9253 = vmatpush1.bf16.msra.mxu0 %v9252_v15  ;;  %9289 = vmatpush1.bf16.msra.mxu1 %v9252_v15  ;;  %v7619_v15 = vld [vmem:[%s13508_s5 + $0x160] sm:$0xff]  ;;  %v3874_v31 = vld [vmem:[%s13508_s5 + $0xb8] sm:$0xff] }
 0x4ed   :  { %9254 = vmatprep.subr.bf16.mxu0 %v13605_v55  ;;  %9290 = vmatprep.subr.bf16.mxu1 %v13605_v55  ;;  %v3873_v51 = vld [vmem:[%s13508_s5 + $0xb0] sm:$0xff] }
 0x4ef   :  { %v3803_v32 = vpop.f32.mrb[22].mxu1 }
 0x4f0   :  { %v3846_v29 = vmax.f32 %v12408_v9, %v3803_v32  ;;  %v3805_v46 = vpop.f32.mrb[23].mxu1  ;;  %v7621_v32 = vld [vmem:[%s13508_s5 + $0x170] sm:$0xff] }
 0x4f1   :  { %v4235_v46 = vld [vmem:[%s13509_s6] sm:$0xff] }
 0x4f2   :  { %v9255_v11 = vpack.c.bf16 %v3846_v29, %v3845_v52  ;;  %v7622_v52 = vld [vmem:[%s13508_s5 + $0x178] sm:$0xff]  ;;  %v7643_v29 = vld [vmem:[%s13509_s6 + $0x40] sm:$0xff] }
 0x4f3   :  { %v3808_v50 = vpop.f32.mrb[24].mxu1 }
 0x4f4   :  { %v3847_v2 = vmax.f32 %v12410_v34, %v3808_v50  ;;  %v3810_v14 = vpop.f32.mrb[25].mxu1  ;;  %9256 = vmatpush1.bf16.msra.mxu0 %v9255_v11  ;;  %9292 = vmatpush1.bf16.msra.mxu1 %v9255_v11 }
 0x4f5   :  { %9257 = vmatprep.subr.bf16.mxu0 %v13605_v55  ;;  %9293 = vmatprep.subr.bf16.mxu1 %v13605_v55 }
 0x4f7   :  { %v3813_v5 = vpop.f32.mrb[26].mxu1 }
 0x4f8   :  { %v3848_v40 = vmax.f32 %v12412_v43, %v3813_v5  ;;  %v3815_v41 = vpop.f32.mrb[27].mxu1  ;;  %v3851_v43 = vld [vmem:[%s13508_s5] sm:$0xff] }
 0x4fa   :  { %v9258_v4 = vpack.c.bf16 %v3848_v40, %v3847_v2 }
 0x4fb   :  { %v3818_v36 = vpop.f32.mrb[28].mxu1 }
 0x4fc   :  { %v3849_v9 = vmax.f32 %v12414_v37, %v3818_v36  ;;  %v3820_v35 = vpop.f32.mrb[29].mxu1  ;;  %9259 = vmatpush1.bf16.msra.mxu0 %v9258_v4  ;;  %9295 = vmatpush1.bf16.msra.mxu1 %v9258_v4  ;;  %v7599_v37 = vld [vmem:[%s13508_s5 + $0xc0] sm:$0xff] }
 0x4fd   :  { %9260 = vmatprep.subr.bf16.mxu0 %v13605_v55  ;;  %9296 = vmatprep.subr.bf16.mxu1 %v13605_v55 }
 0x4ff   :  { %v3823_v34 = vpop.f32.mrb[30].mxu1 }
 0x500   :  { %v3850_v62 = vmax.f32 %v12416_v47, %v3823_v34  ;;  %v3825_v60 = vpop.f32.mrb[31].mxu1  ;;  %v7602_v47 = vld [vmem:[%s13508_s5 + $0xd8] sm:$0xff] }
 0x502   :  { %v9261_v8 = vpack.c.bf16 %v3850_v62, %v3849_v9 }
 0x504   :  { %9262 = vmatpush1.bf16.msra.mxu0 %v9261_v8  ;;  %9298 = vmatpush1.bf16.msra.mxu1 %v9261_v8 }
 0x507   :  { %3977 = vmatmul.mubr.f32.vlgmr.msra.gmra.mrb[96].mxu0 %v3851_v43  ;;  %4163 = vmatmul.mubr.f32.vlgmr.msra.gmra.mrb[32].mxu1 %v7599_v37 }
 0x508   :  { %7588 = vmatprep.mubr.msk.f32.mxu0 %vm3875_vm6, %v3854_v57  ;;  %7624 = vmatprep.mubr.msk.f32.mxu1 %vm3875_vm6, %v7602_v47 }
 0x50b   :  { %3982 = vmatmul.mubr.f32.gmra.mrb[98].mxu0 %v3853_v12  ;;  %4168 = vmatmul.mubr.f32.gmra.mrb[34].mxu1 %v7601_v17 }
 0x50c   :  { %7589 = vmatprep.mubr.msk.f32.mxu0 %vm3875_vm6, %v3856_v0  ;;  %7625 = vmatprep.mubr.msk.f32.mxu1 %vm3875_vm6, %v7604_v23 }
 0x50f   :  { %3987 = vmatmul.mubr.f32.gmra.mrb[100].mxu0 %v3855_v59  ;;  %4173 = vmatmul.mubr.f32.gmra.mrb[36].mxu1 %v7603_v49 }
 0x510   :  { %7590 = vmatprep.mubr.msk.f32.mxu0 %vm3875_vm6, %v3858_v13  ;;  %7626 = vmatprep.mubr.msk.f32.mxu1 %vm3875_vm6, %v7606_v20 }
 0x513   :  { %3992 = vmatmul.mubr.f32.gmra.mrb[102].mxu0 %v3857_v48  ;;  %4178 = vmatmul.mubr.f32.gmra.mrb[38].mxu1 %v7605_v42 }
 0x514   :  { %7591 = vmatprep.mubr.msk.f32.mxu0 %vm3875_vm6, %v3860_v56  ;;  %7627 = vmatprep.mubr.msk.f32.mxu1 %vm3875_vm6, %v7608_v22 }
 0x517   :  { %3997 = vmatmul.mubr.f32.gmra.mrb[104].mxu0 %v3859_v58  ;;  %4183 = vmatmul.mubr.f32.gmra.mrb[40].mxu1 %v7607_v33 }
 0x518   :  { %7592 = vmatprep.mubr.msk.f32.mxu0 %vm3875_vm6, %v3862_v18  ;;  %7628 = vmatprep.mubr.msk.f32.mxu1 %vm3875_vm6, %v7610_v30 }
 0x51b   :  { %4002 = vmatmul.mubr.f32.gmra.mrb[106].mxu0 %v3861_v7  ;;  %4188 = vmatmul.mubr.f32.gmra.mrb[42].mxu1 %v7609_v19 }
 0x51c   :  { %7593 = vmatprep.mubr.msk.f32.mxu0 %vm3875_vm6, %v3864_v6  ;;  %7629 = vmatprep.mubr.msk.f32.mxu1 %vm3875_vm6, %v7612_v25 }
 0x51f   :  { %4007 = vmatmul.mubr.f32.gmra.mrb[108].mxu0 %v3863_v16  ;;  %4193 = vmatmul.mubr.f32.gmra.mrb[44].mxu1 %v7611_v38 }
 0x520   :  { %7594 = vmatprep.mubr.msk.f32.mxu0 %vm3875_vm6, %v3866_v63  ;;  %7630 = vmatprep.mubr.msk.f32.mxu1 %vm3875_vm6, %v7614_v21 }
 0x523   :  { %4012 = vmatmul.mubr.f32.gmra.mrb[110].mxu0 %v3865_v53  ;;  %4198 = vmatmul.mubr.f32.gmra.mrb[46].mxu1 %v7613_v39 }
 0x524   :  { %7595 = vmatprep.mubr.msk.f32.mxu0 %vm3875_vm6, %v3868_v26  ;;  %7631 = vmatprep.mubr.msk.f32.mxu1 %vm3875_vm6, %v7616_v1 }
 0x527   :  { %4017 = vmatmul.mubr.f32.gmra.mrb[112].mxu0 %v3867_v54  ;;  %4203 = vmatmul.mubr.f32.gmra.mrb[48].mxu1 %v7615_v28 }
 0x528   :  { %7596 = vmatprep.mubr.msk.f32.mxu0 %vm3875_vm6, %v3870_v24  ;;  %7632 = vmatprep.mubr.msk.f32.mxu1 %vm3875_vm6, %v7618_v3 }
 0x52b   :  { %4022 = vmatmul.mubr.f32.gmra.mrb[114].mxu0 %v3869_v27  ;;  %4208 = vmatmul.mubr.f32.gmra.mrb[50].mxu1 %v7617_v10 }
 0x52c   :  { %7597 = vmatprep.mubr.msk.f32.mxu0 %vm3875_vm6, %v3872_v45  ;;  %7633 = vmatprep.mubr.msk.f32.mxu1 %vm3875_vm6, %v7620_v61 }
 0x52f   :  { %4027 = vmatmul.mubr.f32.gmra.mrb[116].mxu0 %v3871_v44  ;;  %4213 = vmatmul.mubr.f32.gmra.mrb[52].mxu1 %v7619_v15 }
 0x530   :  { %7598 = vmatprep.mubr.msk.f32.mxu0 %vm3875_vm6, %v3874_v31  ;;  %7634 = vmatprep.mubr.msk.f32.mxu1 %vm3875_vm6, %v7622_v52 }
 0x533   :  { %4032 = vmatmul.mubr.f32.gmra.mrb[118].mxu0 %v3873_v51  ;;  %4218 = vmatmul.mubr.f32.gmra.mrb[54].mxu1 %v7621_v32 }
 0x534   :  { %8257 = vmatprep.mubr.msk.f32.mxu1 %vm132_vm0, %v7643_v29  ;;  %8221 = vmatprep.mubr.msk.f32.mxu0 %vm132_vm0, %v4235_v46  ;;  %v7659_v46 = vld [vmem:[%s13510_s7 + $0x48] sm:$0xff] }
 0x5da   :  { %v3978_v11 = vpop.f32.mrb[96].mxu0  ;;  %v4164_v50 = vpop.f32.mrb[32].mxu1 }
 0x5db   :  { %v4223_v2 = vmax.f32 %v3978_v11, %v4164_v50  ;;  %v3980_v14 = vpop.f32.mrb[97].mxu0  ;;  %v4166_v5 = vpop.f32.mrb[33].mxu1  ;;  %v7660_v11 = vld [vmem:[%s13510_s7 + $0x50] sm:$0xff] }
 0x5de   :  { %v3983_v40 = vpop.f32.mrb[98].mxu0  ;;  %v4169_v41 = vpop.f32.mrb[34].mxu1 }
 0x5df   :  { %v4224_v4 = vmax.f32 %v3983_v40, %v4169_v41  ;;  %v3985_v36 = vpop.f32.mrb[99].mxu0  ;;  %v4171_v9 = vpop.f32.mrb[35].mxu1  ;;  %v9347_v40 = vpack.c.bf16 %v7660_v11, %v7659_v46  ;;  %v7644_v41 = vld [vmem:[%s13509_s6 + $0x48] sm:$0xff]  ;;  %v5670_v11 = vld [vmem:[%s13511_s9 + $0x20] sm:$0xff] }
 0x5e0   :  { %v7645_v36 = vld [vmem:[%s13509_s6 + $0x50] sm:$0xff] }
 0x5e1   :  { %v12630_v35 = vpack.c.bf16 %v4224_v4, %v4223_v2  ;;  %v4236_v4 = vld [vmem:[%s13509_s6 + $0x8] sm:$0xff]  ;;  %v4237_v9 = vld [vmem:[%s13509_s6 + $0x10] sm:$0xff] }
 0x5e2   :  { %v3988_v34 = vpop.f32.mrb[100].mxu0  ;;  %v4174_v62 = vpop.f32.mrb[36].mxu1 }
 0x5e3   :  { %v4225_v60 = vmax.f32 %v3988_v34, %v4174_v62  ;;  %v3990_v8 = vpop.f32.mrb[101].mxu0  ;;  %v4176_v43 = vpop.f32.mrb[37].mxu1  ;;  %9300 = vmatprep.subr.bf16.mxu0 %v12630_v35  ;;  %9324 = vmatprep.subr.bf16.mxu1 %v12630_v35  ;;  %v7661_v34 = vld [vmem:[%s13510_s7 + $0x58] sm:$0xff]  ;;  %v7662_v62 = vld [vmem:[%s13510_s7 + $0x60] sm:$0xff] }
 0x5e4   :  { %9302 = vmatpush3.bf16.msra.mxu0 %v12630_v35  ;;  %9326 = vmatpush3.bf16.msra.mxu1 %v12630_v35  ;;  %v4238_v8 = vld [vmem:[%s13509_s6 + $0x18] sm:$0xff]  ;;  %v7647_v43 = vld [vmem:[%s13509_s6 + $0x60] sm:$0xff] }
 0x5e6   :  { %v3993_v37 = vpop.f32.mrb[102].mxu0  ;;  %v4179_v57 = vpop.f32.mrb[38].mxu1 }
 0x5e7   :  { %v4226_v47 = vmax.f32 %v3993_v37, %v4179_v57  ;;  %v3995_v12 = vpop.f32.mrb[103].mxu0  ;;  %v4181_v17 = vpop.f32.mrb[39].mxu1  ;;  %v4239_v37 = vld [vmem:[%s13509_s6 + $0x20] sm:$0xff]  ;;  %v9351_v57 = vpack.c.bf16 %v7662_v62, %v7661_v34  ;;  %v5677_v34 = vld [vmem:[%s13511_s9 + $0x58] sm:$0xff] }
 0x5e8   :  { %v4240_v12 = vld [vmem:[%s13509_s6 + $0x28] sm:$0xff]  ;;  %v7649_v17 = vld [vmem:[%s13509_s6 + $0x70] sm:$0xff] }
 0x5e9   :  { %v12636_v0 = vpack.c.bf16 %v4226_v47, %v4225_v60  ;;  %v7646_v60 = vld [vmem:[%s13509_s6 + $0x58] sm:$0xff]  ;;  %v7648_v47 = vld [vmem:[%s13509_s6 + $0x68] sm:$0xff] }
 0x5ea   :  { %v3998_v23 = vpop.f32.mrb[104].mxu0  ;;  %v4184_v59 = vpop.f32.mrb[40].mxu1 }
 0x5eb   :  { %v4227_v49 = vmax.f32 %v3998_v23, %v4184_v59  ;;  %v4000_v13 = vpop.f32.mrb[105].mxu0  ;;  %v4186_v20 = vpop.f32.mrb[41].mxu1  ;;  %9304 = vmatprep.subr.bf16.mxu0 %v12636_v0  ;;  %9328 = vmatprep.subr.bf16.mxu1 %v12636_v0  ;;  %v4241_v23 = vld [vmem:[%s13509_s6 + $0x30] sm:$0xff]  ;;  %v7663_v59 = vld [vmem:[%s13510_s7 + $0x68] sm:$0xff] }
 0x5ec   :  { %9306 = vmatpush3.bf16.msra.mxu0 %v12636_v0  ;;  %9330 = vmatpush3.bf16.msra.mxu1 %v12636_v0  ;;  %v7650_v13 = vld [vmem:[%s13509_s6 + $0x78] sm:$0xff] }
 0x5ed   :  { %v4242_v20 = vld [vmem:[%s13509_s6 + $0x38] sm:$0xff] }
 0x5ee   :  { %v4003_v48 = vpop.f32.mrb[106].mxu0  ;;  %v4189_v42 = vpop.f32.mrb[42].mxu1 }
 0x5ef   :  { %v4228_v56 = vmax.f32 %v4003_v48, %v4189_v42  ;;  %v4005_v22 = vpop.f32.mrb[107].mxu0  ;;  %v4191_v58 = vpop.f32.mrb[43].mxu1  ;;  %v7665_v48 = vld [vmem:[%s13510_s7 + $0x78] sm:$0xff]  ;;  %v7666_v42 = vld [vmem:[%s13510_s7 + $0x80] sm:$0xff] }
 0x5f0   :  { %v9359_v58 = vpack.c.bf16 %v7666_v42, %v7665_v48 }
 0x5f1   :  { %v12642_v33 = vpack.c.bf16 %v4228_v56, %v4227_v49  ;;  %v7664_v49 = vld [vmem:[%s13510_s7 + $0x70] sm:$0xff]  ;;  %v7684_v56 = vld [vmem:[%s13509_s6 + $0x80] sm:$0xff] }
 0x5f2   :  { %v4008_v18 = vpop.f32.mrb[108].mxu0  ;;  %v4194_v30 = vpop.f32.mrb[44].mxu1  ;;  %v9355_v22 = vpack.c.bf16 %v7664_v49, %v7663_v59  ;;  %v4376_v49 = vld [vmem:[%s13510_s7 + $0x20] sm:$0xff] }
 0x5f3   :  { %v4229_v7 = vmax.f32 %v4008_v18, %v4194_v30  ;;  %v4010_v19 = vpop.f32.mrb[109].mxu0  ;;  %v4196_v6 = vpop.f32.mrb[45].mxu1  ;;  %9308 = vmatprep.subr.bf16.mxu0 %v12642_v33  ;;  %9332 = vmatprep.subr.bf16.mxu1 %v12642_v33  ;;  %v7685_v18 = vld [vmem:[%s13509_s6 + $0x88] sm:$0xff]  ;;  %v7686_v30 = vld [vmem:[%s13509_s6 + $0x90] sm:$0xff] }
 0x5f4   :  { %9310 = vmatpush3.bf16.msra.mxu0 %v12642_v33  ;;  %9334 = vmatpush3.bf16.msra.mxu1 %v12642_v33  ;;  %v7688_v19 = vld [vmem:[%s13509_s6 + $0xa0] sm:$0xff]  ;;  %v7689_v6 = vld [vmem:[%s13509_s6 + $0xa8] sm:$0xff] }
 0x5f6   :  { %v4013_v25 = vpop.f32.mrb[110].mxu0  ;;  %v4199_v16 = vpop.f32.mrb[46].mxu1 }
 0x5f7   :  { %v4230_v38 = vmax.f32 %v4013_v25, %v4199_v16  ;;  %v4015_v63 = vpop.f32.mrb[111].mxu0  ;;  %v4201_v21 = vpop.f32.mrb[47].mxu1  ;;  %v7690_v25 = vld [vmem:[%s13509_s6 + $0xb0] sm:$0xff]  ;;  %v7691_v16 = vld [vmem:[%s13509_s6 + $0xb8] sm:$0xff] }
 0x5f8   :  { %v7718_v63 = vld [vmem:[%s13509_s6 + $0xc8] sm:$0xff]  ;;  %v7719_v21 = vld [vmem:[%s13509_s6 + $0xd0] sm:$0xff] }
 0x5f9   :  { %v12648_v53 = vpack.c.bf16 %v4230_v38, %v4229_v7  ;;  %v7687_v7 = vld [vmem:[%s13509_s6 + $0x98] sm:$0xff]  ;;  %v7717_v38 = vld [vmem:[%s13509_s6 + $0xc0] sm:$0xff] }
 0x5fa   :  { %v4018_v39 = vpop.f32.mrb[112].mxu0  ;;  %v4204_v26 = vpop.f32.mrb[48].mxu1 }
 0x5fb   :  { %v4231_v1 = vmax.f32 %v4018_v39, %v4204_v26  ;;  %v4020_v54 = vpop.f32.mrb[113].mxu0  ;;  %v4206_v28 = vpop.f32.mrb[49].mxu1  ;;  %9312 = vmatprep.subr.bf16.mxu0 %v12648_v53  ;;  %9336 = vmatprep.subr.bf16.mxu1 %v12648_v53  ;;  %v7720_v39 = vld [vmem:[%s13509_s6 + $0xd8] sm:$0xff]  ;;  %v7721_v26 = vld [vmem:[%s13509_s6 + $0xe0] sm:$0xff] }
 0x5fc   :  { %9314 = vmatpush3.bf16.msra.mxu0 %v12648_v53  ;;  %9338 = vmatpush3.bf16.msra.mxu1 %v12648_v53  ;;  %v7750_v54 = vld [vmem:[%s13509_s6 + $0x100] sm:$0xff]  ;;  %v7752_v28 = vld [vmem:[%s13509_s6 + $0x110] sm:$0xff] }
 0x5fe   :  { %v4023_v24 = vpop.f32.mrb[114].mxu0  ;;  %v4209_v3 = vpop.f32.mrb[50].mxu1 }
 0x5ff   :  { %v4232_v27 = vmax.f32 %v4023_v24, %v4209_v3  ;;  %v4025_v10 = vpop.f32.mrb[115].mxu0  ;;  %v4211_v45 = vpop.f32.mrb[51].mxu1  ;;  %v7754_v24 = vld [vmem:[%s13509_s6 + $0x120] sm:$0xff]  ;;  %v7755_v3 = vld [vmem:[%s13509_s6 + $0x128] sm:$0xff] }
 0x600   :  { %v7757_v10 = vld [vmem:[%s13509_s6 + $0x138] sm:$0xff]  ;;  %v7667_v45 = vld [vmem:[%s13510_s7 + $0x88] sm:$0xff] }
 0x601   :  { %v12654_v61 = vpack.c.bf16 %v4232_v27, %v4231_v1  ;;  %v7723_v1 = vld [vmem:[%s13509_s6 + $0xf0] sm:$0xff] }
 0x602   :  { %v4028_v44 = vpop.f32.mrb[116].mxu0  ;;  %v4214_v15 = vpop.f32.mrb[52].mxu1  ;;  %v7756_v27 = vld [vmem:[%s13509_s6 + $0x130] sm:$0xff] }
 0x603   :  { %v4233_v31 = vmax.f32 %v4028_v44, %v4214_v15  ;;  %v4030_v52 = vpop.f32.mrb[117].mxu0  ;;  %v4216_v51 = vpop.f32.mrb[53].mxu1  ;;  %9316 = vmatprep.subr.bf16.mxu0 %v12654_v61  ;;  %9340 = vmatprep.subr.bf16.mxu1 %v12654_v61  ;;  %v4373_v44 = vld [vmem:[%s13510_s7 + $0x8] sm:$0xff] }
 0x604   :  { %9318 = vmatpush3.bf16.msra.mxu0 %v12654_v61  ;;  %9342 = vmatpush3.bf16.msra.mxu1 %v12654_v61  ;;  %v5667_v52 = vld [vmem:[%s13511_s9 + $0x8] sm:$0xff] }
 0x606   :  { %v4033_v32 = vpop.f32.mrb[118].mxu0  ;;  %v4219_v29 = vpop.f32.mrb[54].mxu1 }
 0x607   :  { %v4234_v50 = vmax.f32 %v4033_v32, %v4219_v29  ;;  %v4035_v2 = vpop.f32.mrb[119].mxu0  ;;  %v4221_v14 = vpop.f32.mrb[55].mxu1  ;;  %v5668_v32 = vld [vmem:[%s13511_s9 + $0x10] sm:$0xff]  ;;  %v5669_v29 = vld [vmem:[%s13511_s9 + $0x18] sm:$0xff] }
 0x608   :  { %v9503_v46 = vpack.c.bf16 %v5669_v29, %v5668_v32  ;;  %v5672_v14 = vld [vmem:[%s13511_s9 + $0x30] sm:$0xff] }
 0x609   :  { %v12666_v5 = vpack.c.bf16 %v4234_v50, %v4233_v31  ;;  %v5666_v31 = vld [vmem:[%s13511_s9] sm:$0xff]  ;;  %v5671_v50 = vld [vmem:[%s13511_s9 + $0x28] sm:$0xff] }
 0x60a   :  { %v9499_v51 = vpack.c.bf16 %v5667_v52, %v5666_v31  ;;  %v9507_v2 = vpack.c.bf16 %v5671_v50, %v5670_v11  ;;  %v7708_v31 = vld [vmem:[%s13510_s7 + $0xd0] sm:$0xff]  ;;  %v7733_v52 = vld [vmem:[%s13510_s7 + $0xd8] sm:$0xff] }
 0x60b   :  { %9320 = vmatprep.subr.bf16.mxu0 %v12666_v5  ;;  %9344 = vmatprep.subr.bf16.mxu1 %v12666_v5  ;;  %v7736_v11 = vld [vmem:[%s13510_s7 + $0xf0] sm:$0xff] }
 0x60c   :  { %9322 = vmatpush3.bf16.msra.mxu0 %v12666_v5  ;;  %9346 = vmatpush3.bf16.msra.mxu1 %v12666_v5 }
 0x60d   :  { %9380 = vmatprep.subr.bf16.mxu1 %v12630_v35  ;;  %9348 = vmatprep.subr.bf16.mxu0 %v9347_v40 }
 0x60f   :  { %8258 = vmatmul.mubr.msk.f32.vlgmr.msra.gmra.mrb[56].mxu1 %vm132_vm0, %v7644_v41  ;;  %8222 = vmatmul.mubr.msk.f32.vlgmr.msra.gmra.mrb[120].mxu0 %vm132_vm0, %v4236_v4  ;;  %v5674_v41 = vld [vmem:[%s13511_s9 + $0x40] sm:$0xff]  ;;  %v5675_v4 = vld [vmem:[%s13511_s9 + $0x48] sm:$0xff] }
 0x610   :  { %9382 = vmatpush3.bf16.msra.mxu1 %v12630_v35  ;;  %8260 = vmatprep.mubr.msk.f32.mxu1 %vm132_vm0, %v7645_v36  ;;  %v9515_v36 = vpack.c.bf16 %v5675_v4, %v5674_v41  ;;  %v7738_v41 = vld [vmem:[%s13510_s7 + $0x100] sm:$0xff] }
 0x611   :  { %9384 = vmatprep.subr.bf16.mxu1 %v12636_v0  ;;  %8224 = vmatprep.mubr.msk.f32.mxu0 %vm132_vm0, %v4237_v9  ;;  %v5676_v9 = vld [vmem:[%s13511_s9 + $0x50] sm:$0xff] }
 0x612   :  { %9350 = vmatpush3.bf16.msra.mxu0 %v9347_v40  ;;  %v9519_v62 = vpack.c.bf16 %v5677_v34, %v5676_v9  ;;  %v7740_v9 = vld [vmem:[%s13510_s7 + $0x110] sm:$0xff] }
 0x613   :  { %8261 = vmatmul.mubr.msk.f32.gmra.mrb[58].mxu1 %vm132_vm0, %v7646_v60  ;;  %8225 = vmatmul.mubr.msk.f32.gmra.mrb[122].mxu0 %vm132_vm0, %v4238_v8  ;;  %v5678_v60 = vld [vmem:[%s13511_s9 + $0x60] sm:$0xff]  ;;  %v5679_v8 = vld [vmem:[%s13511_s9 + $0x68] sm:$0xff] }
 0x614   :  { %9386 = vmatpush3.bf16.msra.mxu1 %v12636_v0  ;;  %8263 = vmatprep.mubr.msk.f32.mxu1 %vm132_vm0, %v7647_v43  ;;  %v9523_v43 = vpack.c.bf16 %v5679_v8, %v5678_v60  ;;  %v7741_v8 = vld [vmem:[%s13510_s7 + $0x118] sm:$0xff] }
 0x615   :  { %9388 = vmatprep.subr.bf16.mxu1 %v12642_v33  ;;  %8227 = vmatprep.mubr.msk.f32.mxu0 %vm132_vm0, %v4239_v37  ;;  %v4374_v37 = vld [vmem:[%s13510_s7 + $0x10] sm:$0xff] }
 0x616   :  { %9352 = vmatprep.subr.bf16.mxu0 %v9351_v57 }
 0x617   :  { %8264 = vmatmul.mubr.msk.f32.gmra.mrb[60].mxu1 %vm132_vm0, %v7648_v47  ;;  %8228 = vmatmul.mubr.msk.f32.gmra.mrb[124].mxu0 %vm132_vm0, %v4240_v12 }
 0x618   :  { %9390 = vmatpush3.bf16.msra.mxu1 %v12642_v33  ;;  %8266 = vmatprep.mubr.msk.f32.mxu1 %vm132_vm0, %v7649_v17 }
 0x619   :  { %9392 = vmatprep.subr.bf16.mxu1 %v12648_v53  ;;  %8230 = vmatprep.mubr.msk.f32.mxu0 %vm132_vm0, %v4241_v23 }
 0x61a   :  { %9354 = vmatpush3.bf16.msra.mxu0 %v9351_v57  ;;  %v4375_v57 = vld [vmem:[%s13510_s7 + $0x18] sm:$0xff] }
 0x61b   :  { %8267 = vmatmul.mubr.msk.f32.gmra.mrb[62].mxu1 %vm132_vm0, %v7650_v13  ;;  %8231 = vmatmul.mubr.msk.f32.gmra.mrb[126].mxu0 %vm132_vm0, %v4242_v20  ;;  %v9367_v23 = vpack.c.bf16 %v4375_v57, %v4374_v37  ;;  %v4377_v13 = vld [vmem:[%s13510_s7 + $0x28] sm:$0xff] }
 0x61c   :  { %9394 = vmatpush3.bf16.msra.mxu1 %v12648_v53  ;;  %8353 = vmatprep.mubr.msk.f32.mxu1 %vm132_vm0, %v7684_v56  ;;  %v9371_v56 = vpack.c.bf16 %v4377_v13, %v4376_v49  ;;  %v7767_v37 = vld [vmem:[%s13510_s7 + $0x128] sm:$0xff]  ;;  %v7770_v13 = vld [vmem:[%s13510_s7 + $0x140] sm:$0xff] }
 0x61d   :  { %9396 = vmatprep.subr.bf16.mxu1 %v12654_v61  ;;  %9356 = vmatprep.subr.bf16.mxu0 %v9355_v22 }
 0x61e   :  { %9358 = vmatpush3.bf16.msra.mxu0 %v9355_v22 }
 0x61f   :  { %9360 = vmatprep.subr.bf16.mxu0 %v9359_v58 }
 0x620   :  { %9398 = vmatpush3.bf16.msra.mxu1 %v12654_v61 }
 0x621   :  { %9400 = vmatprep.subr.bf16.mxu1 %v12666_v5 }
 0x622   :  { %9362 = vmatpush3.bf16.msra.mxu0 %v9359_v58  ;;  %v4378_v58 = vld [vmem:[%s13510_s7 + $0x30] sm:$0xff] }
 0x623   :  { %8285 = vmatprep.subr.mxu0 %v7667_v45 }
 0x624   :  { %9402 = vmatpush3.bf16.msra.mxu1 %v12666_v5 }
 0x625   :  { %9420 = vmatprep.subr.bf16.mxu1 %v12630_v35 }
 0x626   :  { %8286 = vmatpush3.msra.mxu0 %v7667_v45 }
 0x627   :  { %8354 = vmatmul.mubr.msk.f32.vlgmr.msra.gmra.mrb[64].mxu1 %vm132_vm0, %v7685_v18  ;;  %v4379_v18 = vld [vmem:[%s13510_s7 + $0x38] sm:$0xff] }
 0x628   :  { %9422 = vmatpush3.bf16.msra.mxu1 %v12630_v35  ;;  %8356 = vmatprep.mubr.msk.f32.mxu1 %vm132_vm0, %v7686_v30 }
 0x629   :  { %9424 = vmatprep.subr.bf16.mxu1 %v12636_v0 }
 0x62b   :  { %8357 = vmatmul.mubr.msk.f32.gmra.mrb[66].mxu1 %vm132_vm0, %v7687_v7 }
 0x62c   :  { %9426 = vmatpush3.bf16.msra.mxu1 %v12636_v0  ;;  %8359 = vmatprep.mubr.msk.f32.mxu1 %vm132_vm0, %v7688_v19 }
 0x62d   :  { %9428 = vmatprep.subr.bf16.mxu1 %v12642_v33 }
 0x62f   :  { %8360 = vmatmul.mubr.msk.f32.gmra.mrb[68].mxu1 %vm132_vm0, %v7689_v6  ;;  %v9375_v6 = vpack.c.bf16 %v4379_v18, %v4378_v58  ;;  %v7773_v58 = vld [vmem:[%s13510_s7 + $0x158] sm:$0xff] }
 0x630   :  { %9430 = vmatpush3.bf16.msra.mxu1 %v12642_v33  ;;  %8362 = vmatprep.mubr.msk.f32.mxu1 %vm132_vm0, %v7690_v25 }
 0x631   :  { %9432 = vmatprep.subr.bf16.mxu1 %v12648_v53 }
 0x633   :  { %8363 = vmatmul.mubr.msk.f32.gmra.mrb[70].mxu1 %vm132_vm0, %v7691_v16 }
 0x634   :  { %9434 = vmatpush3.bf16.msra.mxu1 %v12648_v53  ;;  %8419 = vmatprep.mubr.msk.f32.mxu1 %vm132_vm0, %v7717_v38 }
 0x635   :  { %9436 = vmatprep.subr.bf16.mxu1 %v12654_v61 }
 0x638   :  { %9438 = vmatpush3.bf16.msra.mxu1 %v12654_v61 }
 0x639   :  { %9440 = vmatprep.subr.bf16.mxu1 %v12666_v5 }
 0x63c   :  { %9442 = vmatpush3.bf16.msra.mxu1 %v12666_v5 }
 0x63d   :  { %9460 = vmatprep.subr.bf16.mxu1 %v12630_v35 }
 0x63f   :  { %8420 = vmatmul.mubr.msk.f32.vlgmr.msra.gmra.mrb[72].mxu1 %vm132_vm0, %v7718_v63 }
 0x640   :  { %9462 = vmatpush3.bf16.msra.mxu1 %v12630_v35  ;;  %8422 = vmatprep.mubr.msk.f32.mxu1 %vm132_vm0, %v7719_v21  ;;  %v7722_v35 = vld [vmem:[%s13509_s6 + $0xe8] sm:$0xff] }
 0x641   :  { %9464 = vmatprep.subr.bf16.mxu1 %v12636_v0 }
 0x643   :  { %8423 = vmatmul.mubr.msk.f32.gmra.mrb[74].mxu1 %vm132_vm0, %v7720_v39  ;;  %v4380_v39 = vld [vmem:[%s13510_s7 + $0x40] sm:$0xff] }
 0x644   :  { %9466 = vmatpush3.bf16.msra.mxu1 %v12636_v0  ;;  %8425 = vmatprep.mubr.msk.f32.mxu1 %vm132_vm0, %v7721_v26  ;;  %v7724_v0 = vld [vmem:[%s13509_s6 + $0xf8] sm:$0xff]  ;;  %v7700_v26 = vld [vmem:[%s13510_s7 + $0x90] sm:$0xff] }
 0x645   :  { %9468 = vmatprep.subr.bf16.mxu1 %v12642_v33 }
 0x647   :  { %8426 = vmatmul.mubr.msk.f32.gmra.mrb[76].mxu1 %vm132_vm0, %v7722_v35  ;;  %v7701_v35 = vld [vmem:[%s13510_s7 + $0x98] sm:$0xff] }
 0x648   :  { %9470 = vmatpush3.bf16.msra.mxu1 %v12642_v33  ;;  %8428 = vmatprep.mubr.msk.f32.mxu1 %vm132_vm0, %v7723_v1  ;;  %v7751_v33 = vld [vmem:[%s13509_s6 + $0x108] sm:$0xff]  ;;  %v7702_v1 = vld [vmem:[%s13510_s7 + $0xa0] sm:$0xff] }
 0x649   :  { %9472 = vmatprep.subr.bf16.mxu1 %v12648_v53 }
 0x64b   :  { %8429 = vmatmul.mubr.msk.f32.gmra.mrb[78].mxu1 %vm132_vm0, %v7724_v0  ;;  %v7703_v0 = vld [vmem:[%s13510_s7 + $0xa8] sm:$0xff] }
 0x64c   :  { %9474 = vmatpush3.bf16.msra.mxu1 %v12648_v53  ;;  %8485 = vmatprep.mubr.msk.f32.mxu1 %vm132_vm0, %v7750_v54  ;;  %v7753_v53 = vld [vmem:[%s13509_s6 + $0x118] sm:$0xff]  ;;  %v9403_v54 = vpack.c.bf16 %v7701_v35, %v7700_v26  ;;  %v7788_v26 = vld [vmem:[%s13511_s9 + $0xa0] sm:$0xff]  ;;  %v7789_v35 = vld [vmem:[%s13511_s9 + $0xa8] sm:$0xff] }
 0x64d   :  { %9476 = vmatprep.subr.bf16.mxu1 %v12654_v61 }
 0x650   :  { %9478 = vmatpush3.bf16.msra.mxu1 %v12654_v61  ;;  %v4372_v61 = vld [vmem:[%s13510_s7] sm:$0xff] }
 0x651   :  { %9480 = vmatprep.subr.bf16.mxu1 %v12666_v5  ;;  %v9363_v15 = vpack.c.bf16 %v4373_v44, %v4372_v61 }
 0x653   :  { %9364 = vmatprep.subr.bf16.mxu0 %v9363_v15 }
 0x654   :  { %9482 = vmatpush3.bf16.msra.mxu1 %v12666_v5  ;;  %v5673_v5 = vld [vmem:[%s13511_s9 + $0x38] sm:$0xff] }
 0x655   :  { %9500 = vmatprep.subr.bf16.mxu1 %v9499_v51  ;;  %v9511_v40 = vpack.c.bf16 %v5673_v5, %v5672_v14 }
 0x657   :  { %8486 = vmatmul.mubr.msk.f32.vlgmr.msra.gmra.mrb[80].mxu1 %vm132_vm0, %v7751_v33  ;;  %v9407_v33 = vpack.c.bf16 %v7703_v0, %v7702_v1 }
 0x658   :  { %8488 = vmatprep.mubr.msk.f32.mxu1 %vm132_vm0, %v7752_v28  ;;  %9502 = vmatpush3.bf16.msra.mxu1 %v9499_v51  ;;  %v7704_v28 = vld [vmem:[%s13510_s7 + $0xb0] sm:$0xff]  ;;  %v7734_v51 = vld [vmem:[%s13510_s7 + $0xe0] sm:$0xff] }
 0x659   :  { %9504 = vmatprep.subr.bf16.mxu1 %v9503_v46  ;;  %v9443_v50 = vpack.c.bf16 %v7734_v51, %v7733_v52  ;;  %v7796_v51 = vld [vmem:[%s13511_s9 + $0xe0] sm:$0xff] }
 0x65b   :  { %8489 = vmatmul.mubr.msk.f32.gmra.mrb[82].mxu1 %vm132_vm0, %v7753_v53  ;;  %v7705_v53 = vld [vmem:[%s13510_s7 + $0xb8] sm:$0xff] }
 0x65c   :  { %8491 = vmatprep.mubr.msk.f32.mxu1 %vm132_vm0, %v7754_v24  ;;  %9506 = vmatpush3.bf16.msra.mxu1 %v9503_v46  ;;  %v9411_v24 = vpack.c.bf16 %v7705_v53, %v7704_v28  ;;  %v7735_v46 = vld [vmem:[%s13510_s7 + $0xe8] sm:$0xff]  ;;  %v7791_v28 = vld [vmem:[%s13511_s9 + $0xb8] sm:$0xff] }
 0x65d   :  { %9508 = vmatprep.subr.bf16.mxu1 %v9507_v2  ;;  %v9447_v14 = vpack.c.bf16 %v7736_v11, %v7735_v46  ;;  %v5680_v46 = vld [vmem:[%s13511_s9 + $0x70] sm:$0xff]  ;;  %v5681_v11 = vld [vmem:[%s13511_s9 + $0x78] sm:$0xff] }
 0x65f   :  { %8492 = vmatmul.mubr.msk.f32.gmra.mrb[84].mxu1 %vm132_vm0, %v7755_v3 }
 0x660   :  { %8494 = vmatprep.mubr.msk.f32.mxu1 %vm132_vm0, %v7756_v27  ;;  %9510 = vmatpush3.bf16.msra.mxu1 %v9507_v2  ;;  %v7706_v27 = vld [vmem:[%s13510_s7 + $0xc0] sm:$0xff] }
 0x661   :  { %9512 = vmatprep.subr.bf16.mxu1 %v9511_v40 }
 0x663   :  { %8495 = vmatmul.mubr.msk.f32.gmra.mrb[86].mxu1 %vm132_vm0, %v7757_v10  ;;  %v7707_v10 = vld [vmem:[%s13510_s7 + $0xc8] sm:$0xff] }
 0x664   :  { %9514 = vmatpush3.bf16.msra.mxu1 %v9511_v40  ;;  %v9415_v61 = vpack.c.bf16 %v7707_v10, %v7706_v27  ;;  %v7737_v40 = vld [vmem:[%s13510_s7 + $0xf8] sm:$0xff]  ;;  %v7792_v27 = vld [vmem:[%s13511_s9 + $0xc0] sm:$0xff]  ;;  %v7793_v10 = vld [vmem:[%s13511_s9 + $0xc8] sm:$0xff] }
 0x665   :  { %9516 = vmatprep.subr.bf16.mxu1 %v9515_v36  ;;  %v9451_v4 = vpack.c.bf16 %v7738_v41, %v7737_v40  ;;  %v7783_v40 = vld [vmem:[%s13512_s8] ss:$0 sm:$0xff] }
 0x668   :  { %9518 = vmatpush3.bf16.msra.mxu1 %v9515_v36  ;;  %v7739_v36 = vld [vmem:[%s13510_s7 + $0x108] sm:$0xff] }
 0x669   :  { %9520 = vmatprep.subr.bf16.mxu1 %v9519_v62  ;;  %v9455_v34 = vpack.c.bf16 %v7740_v9, %v7739_v36 }
 0x66c   :  { %9522 = vmatpush3.bf16.msra.mxu1 %v9519_v62 }
 0x66d   :  { %9524 = vmatprep.subr.bf16.mxu1 %v9523_v43 }
 0x670   :  { %9526 = vmatpush3.bf16.msra.mxu1 %v9523_v43  ;;  %v7766_v43 = vld [vmem:[%s13510_s7 + $0x120] sm:$0xff] }
 0x6e2   :  { %v8259_v47 = vpop.f32.mrb[56].mxu1  ;;  %v8223_v12 = vpop.f32.mrb[120].mxu0 }
 0x6e3   :  { %v4480_v17 = vpop.f32.mrb[57].mxu1  ;;  %v4333_v59 = vpop.f32.mrb[121].mxu0 }
 0x6e4   :  { %8287 = vmatprep.mubr.msk.f32.mxu0 %vm4529_vm7, %v4480_v17  ;;  %v9483_v17 = vpack.c.bf16 %v7767_v37, %v7766_v43 }
 0x6e5   :  { %8288 = vmatmul.mubr.msk.f32.vlgmr.msra.gmra.mrb[128].mxu0 %vm4529_vm7, %v8259_v47  ;;  %v7768_v47 = vld [vmem:[%s13510_s7 + $0x130] sm:$0xff] }
 0x6e6   :  { %9366 = vmatpush3.bf16.msra.mxu0 %v9363_v15  ;;  %v8262_v20 = vpop.f32.mrb[58].mxu1  ;;  %v8226_v48 = vpop.f32.mrb[122].mxu0 }
 0x6e7   :  { %v4490_v42 = vpop.f32.mrb[59].mxu1  ;;  %9368 = vmatprep.subr.bf16.mxu0 %v9367_v23  ;;  %v4343_v22 = vpop.f32.mrb[123].mxu0 }
 0x6e8   :  { %8290 = vmatprep.mubr.msk.f32.mxu0 %vm4529_vm7, %v4490_v42 }
 0x6e9   :  { %8291 = vmatmul.mubr.msk.f32.gmra.mrb[130].mxu0 %vm4529_vm7, %v8262_v20  ;;  %v7771_v20 = vld [vmem:[%s13510_s7 + $0x148] sm:$0xff] }
 0x6ea   :  { %9370 = vmatpush3.bf16.msra.mxu0 %v9367_v23  ;;  %v8265_v30 = vpop.f32.mrb[60].mxu1  ;;  %v8229_v7 = vpop.f32.mrb[124].mxu0  ;;  %v9491_v42 = vpack.c.bf16 %v7771_v20, %v7770_v13 }
 0x6eb   :  { %v4500_v19 = vpop.f32.mrb[61].mxu1  ;;  %9372 = vmatprep.subr.bf16.mxu0 %v9371_v56  ;;  %v4353_v25 = vpop.f32.mrb[125].mxu0 }
 0x6ec   :  { %8293 = vmatprep.mubr.msk.f32.mxu0 %vm4529_vm7, %v4500_v19  ;;  %v7784_v19 = vld [vmem:[%s13511_s9 + $0x80] sm:$0xff] }
 0x6ed   :  { %8294 = vmatmul.mubr.msk.f32.gmra.mrb[132].mxu0 %vm4529_vm7, %v8265_v30 }
 0x6ee   :  { %9374 = vmatpush3.bf16.msra.mxu0 %v9371_v56  ;;  %v8268_v16 = vpop.f32.mrb[62].mxu1  ;;  %v8232_v38 = vpop.f32.mrb[126].mxu0 }
 0x6ef   :  { %v4510_v63 = vpop.f32.mrb[63].mxu1  ;;  %9376 = vmatprep.subr.bf16.mxu0 %v9375_v6  ;;  %v4363_v21 = vpop.f32.mrb[127].mxu0 }
 0x6f0   :  { %8296 = vmatprep.mubr.msk.f32.mxu0 %vm4529_vm7, %v4510_v63 }
 0x6f1   :  { %8297 = vmatmul.mubr.msk.f32.gmra.mrb[134].mxu0 %vm4529_vm7, %v8268_v16  ;;  %v7787_v16 = vld [vmem:[%s13511_s9 + $0x98] sm:$0xff] }
 0x6f2   :  { %9378 = vmatpush3.bf16.msra.mxu0 %v9375_v6  ;;  %8317 = vmatprep.mubr.msk.f32.mxu0 %vm4529_vm7, %v4333_v59  ;;  %v7785_v6 = vld [vmem:[%s13511_s9 + $0x88] sm:$0xff] }
 0x6f3   :  { %8315 = vmatprep.subr.mxu0 %v4380_v39 }
 0x6f6   :  { %8316 = vmatpush3.msra.mxu0 %v4380_v39 }
 0x6f7   :  { %8318 = vmatmul.mubr.msk.f32.vlgmr.msra.gmra.mrb[128].mxu0 %vm4529_vm7, %v8223_v12  ;;  %9404 = vmatprep.subr.bf16.mxu0 %v9403_v54  ;;  %v7769_v12 = vld [vmem:[%s13510_s7 + $0x138] sm:$0xff] }
 0x6f8   :  { %9406 = vmatpush3.bf16.msra.mxu0 %v9403_v54  ;;  %8320 = vmatprep.mubr.msk.f32.mxu0 %vm4529_vm7, %v4343_v22  ;;  %v9487_v59 = vpack.c.bf16 %v7769_v12, %v7768_v47  ;;  %v7772_v22 = vld [vmem:[%s13510_s7 + $0x150] sm:$0xff]  ;;  %v9539_v54 = vpack.c.bf16 %v7789_v35, %v7788_v26 }
 0x6f9   :  { %9408 = vmatprep.subr.bf16.mxu0 %v9407_v33  ;;  %v9495_v30 = vpack.c.bf16 %v7773_v58, %v7772_v22 }
 0x6fa   :  { %v8355_v3 = vpop.f32.mrb[64].mxu1 }
 0x6fb   :  { %8321 = vmatmul.mubr.msk.f32.gmra.mrb[130].mxu0 %vm4529_vm7, %v8226_v48  ;;  %v4887_v45 = vpop.f32.mrb[65].mxu1 }
 0x6fc   :  { %9410 = vmatpush3.bf16.msra.mxu0 %v9407_v33  ;;  %8323 = vmatprep.mubr.msk.f32.mxu0 %vm4529_vm7, %v4353_v25  ;;  %v7786_v25 = vld [vmem:[%s13511_s9 + $0x90] sm:$0xff] }
 0x6fd   :  { %9412 = vmatprep.subr.bf16.mxu0 %v9411_v24  ;;  %v9535_v39 = vpack.c.bf16 %v7787_v16, %v7786_v25  ;;  %v7790_v33 = vld [vmem:[%s13511_s9 + $0xb0] sm:$0xff] }
 0x6fe   :  { %v8358_v44 = vpop.f32.mrb[66].mxu1 }
 0x6ff   :  { %8324 = vmatmul.mubr.msk.f32.gmra.mrb[132].mxu0 %vm4529_vm7, %v8229_v7  ;;  %v4897_v15 = vpop.f32.mrb[67].mxu1  ;;  %v7774_v7 = vld [vmem:[%s13510_s7 + $0x160] sm:$0xff] }
 0x700   :  { %9414 = vmatpush3.bf16.msra.mxu0 %v9411_v24  ;;  %8326 = vmatprep.mubr.msk.f32.mxu0 %vm4529_vm7, %v4363_v21 }
 0x701   :  { %9416 = vmatprep.subr.bf16.mxu0 %v9415_v61 }
 0x702   :  { %v8361_v32 = vpop.f32.mrb[68].mxu1 }
 0x703   :  { %8327 = vmatmul.mubr.msk.f32.gmra.mrb[134].mxu0 %vm4529_vm7, %v8232_v38  ;;  %v4907_v29 = vpop.f32.mrb[69].mxu1  ;;  %v9531_v38 = vpack.c.bf16 %v7785_v6, %v7784_v19 }
 0x704   :  { %9418 = vmatpush3.bf16.msra.mxu0 %v9415_v61  ;;  %8383 = vmatprep.mubr.msk.f32.mxu0 %vm4529_vm7, %v4887_v45 }
 0x705   :  { %8381 = vmatprep.subr.mxu0 %v7708_v31 }
 0x706   :  { %v8364_v2 = vpop.f32.mrb[70].mxu1 }
 0x707   :  { %v4917_v5 = vpop.f32.mrb[71].mxu1 }
 0x708   :  { %8382 = vmatpush3.msra.mxu0 %v7708_v31  ;;  %v7795_v31 = vld [vmem:[%s13511_s9 + $0xd8] sm:$0xff] }
 0x709   :  { %8384 = vmatmul.mubr.msk.f32.vlgmr.msra.gmra.mrb[128].mxu0 %vm4529_vm7, %v8355_v3  ;;  %9444 = vmatprep.subr.bf16.mxu0 %v9443_v50  ;;  %v9543_v3 = vpack.c.bf16 %v7791_v28, %v7790_v33 }
 0x70a   :  { %9446 = vmatpush3.bf16.msra.mxu0 %v9443_v50  ;;  %8386 = vmatprep.mubr.msk.f32.mxu0 %vm4529_vm7, %v4897_v15  ;;  %v7794_v15 = vld [vmem:[%s13511_s9 + $0xd0] sm:$0xff] }
 0x70b   :  { %9448 = vmatprep.subr.bf16.mxu0 %v9447_v14  ;;  %v9551_v52 = vpack.c.bf16 %v7795_v31, %v7794_v15  ;;  %v7798_v50 = vld [vmem:[%s13511_s9 + $0xf0] sm:$0xff] }
 0x70d   :  { %8387 = vmatmul.mubr.msk.f32.gmra.mrb[130].mxu0 %vm4529_vm7, %v8358_v44  ;;  %v9547_v44 = vpack.c.bf16 %v7793_v10, %v7792_v27 }
 0x70e   :  { %9450 = vmatpush3.bf16.msra.mxu0 %v9447_v14  ;;  %8389 = vmatprep.mubr.msk.f32.mxu0 %vm4529_vm7, %v4907_v29  ;;  %v7799_v14 = vld [vmem:[%s13511_s9 + $0xf8] sm:$0xff] }
 0x70f   :  { %9452 = vmatprep.subr.bf16.mxu0 %v9451_v4 }
 0x711   :  { %8390 = vmatmul.mubr.msk.f32.gmra.mrb[132].mxu0 %vm4529_vm7, %v8361_v32  ;;  %v7797_v32 = vld [vmem:[%s13511_s9 + $0xe8] sm:$0xff] }
 0x712   :  { %9454 = vmatpush3.bf16.msra.mxu0 %v9451_v4  ;;  %8392 = vmatprep.mubr.msk.f32.mxu0 %vm4529_vm7, %v4917_v5  ;;  %v8421_v62 = vpop.f32.mrb[72].mxu1  ;;  %v9555_v29 = vpack.c.bf16 %v7797_v32, %v7796_v51  ;;  %v9559_v5 = vpack.c.bf16 %v7799_v14, %v7798_v50  ;;  %v5917_v51 = vld [vmem:[%s13513_s10] sm:$0xff]  ;;  %v7803_v32 = vld [vmem:[%s13513_s10 + $0x10] sm:$0xff]  ;;  %v7805_v50 = vld [vmem:[%s13513_s10 + $0x18] sm:$0xff] }
 0x713   :  { %9456 = vmatprep.subr.bf16.mxu0 %v9455_v34  ;;  %v5172_v60 = vpop.f32.mrb[73].mxu1  ;;  %v6069_v14 = vld [vmem:[%s13514_s11 + $0x10] sm:$0xff] }
 0x715   :  { %8393 = vmatmul.mubr.msk.f32.gmra.mrb[134].mxu0 %vm4529_vm7, %v8364_v2  ;;  %v9527_v2 = vpack.c.bf16 %v5681_v11, %v5680_v46  ;;  %v6067_v46 = vld [vmem:[%s13514_s11] sm:$0xff]  ;;  %v6068_v11 = vld [vmem:[%s13514_s11 + $0x8] sm:$0xff] }
 0x716   :  { %9458 = vmatpush3.bf16.msra.mxu0 %v9455_v34  ;;  %8449 = vmatprep.mubr.msk.f32.mxu0 %vm4529_vm7, %v5172_v60  ;;  %v8424_v57 = vpop.f32.mrb[74].mxu1 }
 0x717   :  { %8447 = vmatprep.subr.mxu0 %v7741_v8  ;;  %v5182_v23 = vpop.f32.mrb[75].mxu1  ;;  %9528 = vmatprep.subr.bf16.mxu1 %v9527_v2 }
 0x718   :  { %9530 = vmatpush3.bf16.msra.mxu1 %v9527_v2  ;;  %v9624_v2 = vpack.c.bf16 %v6068_v11, %v6067_v46 }
 0x719   :  { %9563 = vmatprep.subr.bf16.mxu1 %v13605_v55 }
 0x71a   :  { %8448 = vmatpush3.msra.mxu0 %v7741_v8  ;;  %v8427_v49 = vpop.f32.mrb[76].mxu1 }
 0x71b   :  { %8450 = vmatmul.mubr.msk.f32.vlgmr.msra.gmra.mrb[128].mxu0 %vm4529_vm7, %v8421_v62  ;;  %9484 = vmatprep.subr.bf16.mxu0 %v9483_v17  ;;  %v5192_v48 = vpop.f32.mrb[77].mxu1 }
 0x71c   :  { %9486 = vmatpush3.bf16.msra.mxu0 %v9483_v17  ;;  %8452 = vmatprep.mubr.msk.f32.mxu0 %vm4529_vm7, %v5182_v23 }
 0x71d   :  { %9488 = vmatprep.subr.bf16.mxu0 %v9487_v59 }
 0x71e   :  { %v8430_v56 = vpop.f32.mrb[78].mxu1 }
 0x71f   :  { %8453 = vmatmul.mubr.msk.f32.gmra.mrb[130].mxu0 %vm4529_vm7, %v8424_v57  ;;  %v5202_v18 = vpop.f32.mrb[79].mxu1 }
 0x720   :  { %9490 = vmatpush3.bf16.msra.mxu0 %v9487_v59  ;;  %8455 = vmatprep.mubr.msk.f32.mxu0 %vm4529_vm7, %v5192_v48 }
 0x721   :  { %9492 = vmatprep.subr.bf16.mxu0 %v9491_v42 }
 0x723   :  { %8456 = vmatmul.mubr.msk.f32.gmra.mrb[132].mxu0 %vm4529_vm7, %v8427_v49 }
 0x724   :  { %9494 = vmatpush3.bf16.msra.mxu0 %v9491_v42  ;;  %8458 = vmatprep.mubr.msk.f32.mxu0 %vm4529_vm7, %v5202_v18  ;;  %v13606_v18 = vmov 0.0  }
 0x725   :  { %9496 = vmatprep.subr.bf16.mxu0 %v9495_v30 }
 0x727   :  { %8459 = vmatmul.mubr.msk.f32.gmra.mrb[134].mxu0 %vm4529_vm7, %v8430_v56 }
 0x728   :  { %9498 = vmatpush3.bf16.msra.mxu0 %v9495_v30 }
 0x729   :  { %8513 = vmatprep.subr.mxu0 %v7774_v7 }
 0x72a   :  { %v8487_v63 = vpop.f32.mrb[80].mxu1 }
 0x72b   :  { %v5457_v21 = vpop.f32.mrb[81].mxu1 }
 0x72c   :  { %8514 = vmatpush3.msra.mxu0 %v7774_v7  ;;  %8515 = vmatprep.mubr.msk.f32.mxu0 %vm4529_vm7, %v5457_v21 }
 0x72d   :  { %8516 = vmatmul.mubr.msk.f32.vlgmr.msra.gmra.mrb[128].mxu0 %vm4529_vm7, %v8487_v63  ;;  %9532 = vmatprep.subr.bf16.mxu0 %v9531_v38 }
 0x72e   :  { %v8490_v1 = vpop.f32.mrb[82].mxu1  ;;  %9534 = vmatpush3.bf16.msra.mxu0 %v9531_v38 }
 0x72f   :  { %v5467_v0 = vpop.f32.mrb[83].mxu1  ;;  %9536 = vmatprep.subr.bf16.mxu0 %v9535_v39 }
 0x730   :  { %8518 = vmatprep.mubr.msk.f32.mxu0 %vm4529_vm7, %v5467_v0 }
 0x731   :  { %8519 = vmatmul.mubr.msk.f32.gmra.mrb[130].mxu0 %vm4529_vm7, %v8490_v1 }
 0x732   :  { %v8493_v53 = vpop.f32.mrb[84].mxu1  ;;  %9538 = vmatpush3.bf16.msra.mxu0 %v9535_v39 }
 0x733   :  { %v5477_v24 = vpop.f32.mrb[85].mxu1  ;;  %9540 = vmatprep.subr.bf16.mxu0 %v9539_v54 }
 0x734   :  { %8521 = vmatprep.mubr.msk.f32.mxu0 %vm4529_vm7, %v5477_v24 }
 0x735   :  { %8522 = vmatmul.mubr.msk.f32.gmra.mrb[132].mxu0 %vm4529_vm7, %v8493_v53 }
 0x736   :  { %v8496_v45 = vpop.f32.mrb[86].mxu1  ;;  %9542 = vmatpush3.bf16.msra.mxu0 %v9539_v54 }
 0x737   :  { %v5487_v61 = vpop.f32.mrb[87].mxu1  ;;  %9544 = vmatprep.subr.bf16.mxu0 %v9543_v3 }
 0x738   :  { %8524 = vmatprep.mubr.msk.f32.mxu0 %vm4529_vm7, %v5487_v61 }
 0x739   :  { %8525 = vmatmul.mubr.msk.f32.gmra.mrb[134].mxu0 %vm4529_vm7, %v8496_v45 }
 0x73a   :  { %9546 = vmatpush3.bf16.msra.mxu0 %v9543_v3 }
 0x73b   :  { %9548 = vmatprep.subr.bf16.mxu0 %v9547_v44 }
 0x73e   :  { %9550 = vmatpush3.bf16.msra.mxu0 %v9547_v44 }
 0x73f   :  { %9552 = vmatprep.subr.bf16.mxu0 %v9551_v52 }
 0x742   :  { %9554 = vmatpush3.bf16.msra.mxu0 %v9551_v52 }
 0x743   :  { %9556 = vmatprep.subr.bf16.mxu0 %v9555_v29 }
 0x746   :  { %9558 = vmatpush3.bf16.msra.mxu0 %v9555_v29  ;;  %v7801_v29 = vld [vmem:[%s13513_s10 + $0x8] sm:$0xff] }
 0x747   :  { %9560 = vmatprep.subr.bf16.mxu0 %v9559_v5 }
 0x74a   :  { %9562 = vmatpush3.bf16.msra.mxu0 %v9559_v5  ;;  %v6070_v5 = vld [vmem:[%s13514_s11 + $0x18] sm:$0xff] }
 0x74b   :  { %9587 = vmatprep.subr.bf16.mxu0 %v13605_v55 }
 0x800   :  { %v8517_v41 = vpop.f32.mrb[128].mxu0 }
 0x801   :  { %v5651_v4 = vadd.f32 %v8517_v41, %v7783_v40  ;;  %v5596_v36 = vpop.f32.mrb[129].mxu0  ;;  %v9627_v41 = vpack.c.bf16 %v6070_v5, %v6069_v14  ;;  %v6768_v5 = vld [vmem:[%s13514_s11 + $0xe0] sm:$0xff] }
 0x802   :  { %v5650_v9 = vadd.f32 %v7783_v40, %v5596_v36 }
 0x803   :  { %v5659_v60 = vmax.f32 %v5651_v4, 0.0  ;;  %v6072_v4 = vld [vmem:[%s13514_s11 + $0x28] sm:$0xff] }
 0x804   :  { %v5658_v34 = vmax.f32 %v5650_v9, 0.0  ;;  %v8520_v62 = vpop.f32.mrb[130].mxu0  ;;  %v6073_v9 = vld [vmem:[%s13514_s11 + $0x30] sm:$0xff] }
 0x805   :  { %v5653_v8 = vadd.f32 %v8520_v62, %v7783_v40  ;;  %v5606_v43 = vpop.f32.mrb[131].mxu0 }
 0x806   :  { %v5652_v37 = vadd.f32 %v7783_v40, %v5606_v43  ;;  %8559 = vmatprep.mubr.f32.mxu1 %v5658_v34  ;;  %8603 = vmatprep.mubr.f32.mxu0 %v5658_v34  ;;  %v6074_v34 = vld [vmem:[%s13514_s11 + $0x38] sm:$0xff] }
 0x807   :  { %8560 = vmatmul.mubr.f32.vlgmr.msra.gmra.mrb[88].mxu1 %v5659_v60  ;;  %8604 = vmatmul.mubr.f32.vlgmr.msra.gmra.mrb[136].mxu0 %v5659_v60  ;;  %v5661_v12 = vmax.f32 %v5653_v8, 0.0  ;;  %v9633_v62 = vpack.c.bf16 %v6074_v34, %v6073_v9  ;;  %v6226_v60 = vld [vmem:[%s13514_s11 + $0x40] sm:$0xff]  ;;  %v6227_v8 = vld [vmem:[%s13514_s11 + $0x48] sm:$0xff] }
 0x808   :  { %v5660_v57 = vmax.f32 %v5652_v37, 0.0  ;;  %v8523_v47 = vpop.f32.mrb[132].mxu0  ;;  %v9612_v43 = vpack.c.bf16 %v6227_v8, %v6226_v60  ;;  %v6228_v37 = vld [vmem:[%s13514_s11 + $0x50] sm:$0xff]  ;;  %v6855_v60 = vld [vmem:[%s13515_s13] sm:$0xff]  ;;  %v6856_v8 = vld [vmem:[%s13515_s13 + $0x8] sm:$0xff] }
 0x809   :  { %v5655_v17 = vadd.f32 %v8523_v47, %v7783_v40  ;;  %v5616_v23 = vpop.f32.mrb[133].mxu0 }
 0x80a   :  { %v5654_v59 = vadd.f32 %v7783_v40, %v5616_v23  ;;  %8562 = vmatprep.mubr.f32.mxu1 %v5660_v57  ;;  %8606 = vmatprep.mubr.f32.mxu0 %v5660_v57  ;;  %v6229_v57 = vld [vmem:[%s13514_s11 + $0x58] sm:$0xff] }
 0x80b   :  { %8563 = vmatmul.mubr.f32.gmra.mrb[90].mxu1 %v5661_v12  ;;  %8607 = vmatmul.mubr.f32.gmra.mrb[138].mxu0 %v5661_v12  ;;  %v5663_v20 = vmax.f32 %v5655_v17, 0.0  ;;  %v9615_v47 = vpack.c.bf16 %v6229_v57, %v6228_v37  ;;  %v6230_v12 = vld [vmem:[%s13514_s11 + $0x60] sm:$0xff]  ;;  %v6231_v17 = vld [vmem:[%s13514_s11 + $0x68] sm:$0xff]  ;;  %v9708_v37 = vpack.c.bf16 %v6856_v8, %v6855_v60  ;;  %v6858_v57 = vld [vmem:[%s13515_s13 + $0x18] sm:$0xff] }
 0x80c   :  { %v5662_v49 = vmax.f32 %v5654_v59, 0.0  ;;  %v8526_v13 = vpop.f32.mrb[134].mxu0  ;;  %v9618_v23 = vpack.c.bf16 %v6231_v17, %v6230_v12  ;;  %v6232_v59 = vld [vmem:[%s13514_s11 + $0x70] sm:$0xff]  ;;  %v6859_v12 = vld [vmem:[%s13515_s13 + $0x20] sm:$0xff]  ;;  %v6860_v17 = vld [vmem:[%s13515_s13 + $0x28] sm:$0xff] }
 0x80d   :  { %v5657_v48 = vadd.f32 %v8526_v13, %v7783_v40  ;;  %v5626_v42 = vpop.f32.mrb[135].mxu0  ;;  %v7821_v8 = vld [vmem:[%s13519_s16] ss:$0 sm:$0xff] }
 0x80e   :  { %v5656_v56 = vadd.f32 %v7783_v40, %v5626_v42  ;;  %8565 = vmatprep.mubr.f32.mxu1 %v5662_v49  ;;  %8609 = vmatprep.mubr.f32.mxu0 %v5662_v49  ;;  %v6071_v40 = vld [vmem:[%s13514_s11 + $0x20] sm:$0xff]  ;;  %v6233_v49 = vld [vmem:[%s13514_s11 + $0x78] sm:$0xff] }
 0x80f   :  { %8566 = vmatmul.mubr.f32.gmra.mrb[92].mxu1 %v5663_v20  ;;  %8610 = vmatmul.mubr.f32.gmra.mrb[140].mxu0 %v5663_v20  ;;  %v5665_v58 = vmax.f32 %v5657_v48, 0.0  ;;  %v9630_v36 = vpack.c.bf16 %v6072_v4, %v6071_v40  ;;  %v9621_v13 = vpack.c.bf16 %v6233_v49, %v6232_v59  ;;  %v6769_v40 = vld [vmem:[%s13514_s11 + $0xe8] sm:$0xff]  ;;  %v6770_v4 = vld [vmem:[%s13514_s11 + $0xf0] sm:$0xff]  ;;  %v6862_v49 = vld [vmem:[%s13515_s13 + $0x38] sm:$0xff] }
 0x810   :  { %v5664_v22 = vmax.f32 %v5656_v56, 0.0  ;;  %v6861_v59 = vld [vmem:[%s13515_s13 + $0x30] sm:$0xff] }
 0x812   :  { %8568 = vmatprep.mubr.f32.mxu1 %v5664_v22  ;;  %8612 = vmatprep.mubr.f32.mxu0 %v5664_v22 }
 0x813   :  { %8569 = vmatmul.mubr.f32.gmra.mrb[94].mxu1 %v5665_v58  ;;  %8613 = vmatmul.mubr.f32.gmra.mrb[142].mxu0 %v5665_v58 }
 0x814   :  { %8631 = vmatprep.mubr.msk.f32.mxu1 %vm9986_vm8, %v13606_v18  ;;  %8669 = vmatprep.mubr.msk.f32.mxu0 %vm9986_vm8, %v13606_v18 }
 0x8da   :  { %v8561_v30 = vpop.f32.mrb[88].mxu1  ;;  %v8605_v7 = vpop.f32.mrb[136].mxu0 }
 0x8db   :  { %v5910_v19 = vmax.f32 %v8561_v30, %v8605_v7  ;;  %v5748_v6 = vpop.f32.mrb[89].mxu1  ;;  %v5870_v25 = vpop.f32.mrb[137].mxu0 }
 0x8dc   :  { %v5909_v16 = vmax.f32 %v5748_v6, %v5870_v25 }
 0x8de   :  { %v13134_v38 = vpack.c.bf16 %v5910_v19, %v5909_v16  ;;  %v8564_v63 = vpop.f32.mrb[90].mxu1  ;;  %v8608_v21 = vpop.f32.mrb[138].mxu0  ;;  %v7811_v19 = vld [vmem:[%s13513_s10 + $0x28] sm:$0xff]  ;;  %v7809_v16 = vld [vmem:[%s13513_s10 + $0x20] sm:$0xff] }
 0x8df   :  { %v5912_v39 = vmax.f32 %v8564_v63, %v8608_v21  ;;  %v5758_v26 = vpop.f32.mrb[91].mxu1  ;;  %v5880_v35 = vpop.f32.mrb[139].mxu0  ;;  %v6531_v63 = vld [vmem:[%s13514_s11 + $0x80] sm:$0xff]  ;;  %v6532_v21 = vld [vmem:[%s13514_s11 + $0x88] sm:$0xff] }
 0x8e0   :  { %v5911_v1 = vmax.f32 %v5758_v26, %v5880_v35  ;;  %9565 = vmatpush3.bf16.msra.mxu1 %v13134_v38  ;;  %9589 = vmatpush3.bf16.msra.mxu0 %v13134_v38  ;;  %v6533_v26 = vld [vmem:[%s13514_s11 + $0x90] sm:$0xff]  ;;  %v6534_v35 = vld [vmem:[%s13514_s11 + $0x98] sm:$0xff] }
 0x8e1   :  { %9566 = vmatprep.subr.bf16.mxu1 %v13605_v55  ;;  %9590 = vmatprep.subr.bf16.mxu0 %v13605_v55 }
 0x8e2   :  { %v13140_v0 = vpack.c.bf16 %v5912_v39, %v5911_v1  ;;  %v8567_v54 = vpop.f32.mrb[92].mxu1  ;;  %v8611_v33 = vpop.f32.mrb[140].mxu0  ;;  %v9660_v39 = vpack.c.bf16 %v6532_v21, %v6531_v63  ;;  %v9663_v1 = vpack.c.bf16 %v6534_v35, %v6533_v26  ;;  %v6867_v63 = vld [vmem:[%s13515_s13 + $0x60] sm:$0xff]  ;;  %v6868_v21 = vld [vmem:[%s13515_s13 + $0x68] sm:$0xff]  ;;  %v6869_v26 = vld [vmem:[%s13515_s13 + $0x70] sm:$0xff] }
 0x8e3   :  { %v5914_v28 = vmax.f32 %v8567_v54, %v8611_v33  ;;  %v5768_v53 = vpop.f32.mrb[93].mxu1  ;;  %v5890_v24 = vpop.f32.mrb[141].mxu0  ;;  %v6535_v54 = vld [vmem:[%s13514_s11 + $0xa0] sm:$0xff]  ;;  %v6536_v33 = vld [vmem:[%s13514_s11 + $0xa8] sm:$0xff] }
 0x8e4   :  { %v5913_v3 = vmax.f32 %v5768_v53, %v5890_v24  ;;  %9568 = vmatpush3.bf16.msra.mxu1 %v13140_v0  ;;  %9592 = vmatpush3.bf16.msra.mxu0 %v13140_v0  ;;  %v6537_v53 = vld [vmem:[%s13514_s11 + $0xb0] sm:$0xff]  ;;  %v6538_v24 = vld [vmem:[%s13514_s11 + $0xb8] sm:$0xff] }
 0x8e5   :  { %9569 = vmatprep.subr.bf16.mxu1 %v13605_v55  ;;  %9593 = vmatprep.subr.bf16.mxu0 %v13605_v55 }
 0x8e6   :  { %v13146_v27 = vpack.c.bf16 %v5914_v28, %v5913_v3  ;;  %v8570_v10 = vpop.f32.mrb[94].mxu1  ;;  %v8614_v45 = vpop.f32.mrb[142].mxu0  ;;  %v9666_v28 = vpack.c.bf16 %v6536_v33, %v6535_v54  ;;  %v9669_v3 = vpack.c.bf16 %v6538_v24, %v6537_v53  ;;  %v6950_v54 = vld [vmem:[%s13516_s15 + $0x8] sm:$0xff]  ;;  %v6951_v33 = vld [vmem:[%s13516_s15 + $0x10] sm:$0xff]  ;;  %v6952_v53 = vld [vmem:[%s13516_s15 + $0x18] sm:$0xff] }
 0x8e7   :  { %v5916_v61 = vmax.f32 %v8570_v10, %v8614_v45  ;;  %v5778_v44 = vpop.f32.mrb[95].mxu1  ;;  %v5900_v15 = vpop.f32.mrb[143].mxu0  ;;  %v7814_v10 = vld [vmem:[%s13513_s10 + $0x30] sm:$0xff]  ;;  %v9735_v24 = vpack.c.bf16 %v6952_v53, %v6951_v33 }
 0x8e8   :  { %v5915_v31 = vmax.f32 %v5778_v44, %v5900_v15  ;;  %9571 = vmatpush3.bf16.msra.mxu1 %v13146_v27  ;;  %9595 = vmatpush3.bf16.msra.mxu0 %v13146_v27 }
 0x8e9   :  { %9572 = vmatprep.subr.bf16.mxu1 %v13605_v55  ;;  %9596 = vmatprep.subr.bf16.mxu0 %v13605_v55 }
 0x8ea   :  { %v13152_v52 = vpack.c.bf16 %v5916_v61, %v5915_v31 }
 0x8ec   :  { %9574 = vmatpush3.bf16.msra.mxu1 %v13152_v52  ;;  %9598 = vmatpush3.bf16.msra.mxu0 %v13152_v52 }
 0x8ed   :  { %9575 = vmatprep.subr.bf16.mxu1 %v13605_v55  ;;  %9611 = vmatprep.subr.bf16.mxu0 %v13605_v55 }
 0x8ef   :  { %8632 = vmatmul.mubr.msk.f32.vlgmr.msra.gmra.mrb[96].mxu1 %vm3875_vm6, %v5917_v51  ;;  %8670 = vmatmul.mubr.msk.f32.vlgmr.msra.gmra.mrb[144].mxu0 %vm3875_vm6, %v7803_v32 }
 0x8f0   :  { %9577 = vmatpush3.bf16.msra.mxu1 %v13134_v38  ;;  %8650 = vmatprep.mubr.msk.f32.mxu1 %vm9986_vm8, %v13606_v18 }
 0x8f1   :  { %9578 = vmatprep.subr.bf16.mxu1 %v13605_v55  ;;  %8707 = vmatprep.mubr.msk.f32.mxu0 %vm9986_vm8, %v13606_v18 }
 0x8f2   :  { %9613 = vmatpush3.bf16.msra.mxu0 %v9612_v43  ;;  %v6857_v43 = vld [vmem:[%s13515_s13 + $0x10] sm:$0xff] }
 0x8f3   :  { %9614 = vmatprep.subr.bf16.mxu0 %v13605_v55 }
 0x8f4   :  { %9580 = vmatpush3.bf16.msra.mxu1 %v13140_v0 }
 0x8f5   :  { %9581 = vmatprep.subr.bf16.mxu1 %v13605_v55 }
 0x8f6   :  { %9616 = vmatpush3.bf16.msra.mxu0 %v9615_v47  ;;  %v9711_v47 = vpack.c.bf16 %v6858_v57, %v6857_v43 }
 0x8f7   :  { %9617 = vmatprep.subr.bf16.mxu0 %v13605_v55 }
 0x8f8   :  { %9583 = vmatpush3.bf16.msra.mxu1 %v13146_v27 }
 0x8f9   :  { %9584 = vmatprep.subr.bf16.mxu1 %v13605_v55 }
 0x8fa   :  { %9619 = vmatpush3.bf16.msra.mxu0 %v9618_v23  ;;  %v9714_v23 = vpack.c.bf16 %v6860_v17, %v6859_v12 }
 0x8fb   :  { %9620 = vmatprep.subr.bf16.mxu0 %v13605_v55 }
 0x8fc   :  { %9586 = vmatpush3.bf16.msra.mxu1 %v13152_v52 }
 0x8fd   :  { %9599 = vmatprep.subr.bf16.mxu1 %v13605_v55 }
 0x8fe   :  { %9622 = vmatpush3.bf16.msra.mxu0 %v9621_v13  ;;  %v9717_v13 = vpack.c.bf16 %v6862_v49, %v6861_v59 }
 0x8ff   :  { %8651 = vmatmul.mubr.msk.f32.vlgmr.msra.gmra.mrb[98].mxu1 %vm3875_vm6, %v7801_v29  ;;  %9635 = vmatprep.subr.bf16.mxu0 %v13605_v55 }
 0x900   :  { %9601 = vmatpush3.bf16.msra.mxu1 %v13134_v38  ;;  %8688 = vmatprep.mubr.msk.f32.mxu1 %vm9986_vm8, %v13606_v18 }
 0x901   :  { %9602 = vmatprep.subr.bf16.mxu1 %v13605_v55 }
 0x904   :  { %9604 = vmatpush3.bf16.msra.mxu1 %v13140_v0 }
 0x905   :  { %9605 = vmatprep.subr.bf16.mxu1 %v13605_v55 }
 0x908   :  { %9607 = vmatpush3.bf16.msra.mxu1 %v13146_v27 }
 0x909   :  { %9608 = vmatprep.subr.bf16.mxu1 %v13605_v55 }
 0x90c   :  { %9610 = vmatpush3.bf16.msra.mxu1 %v13152_v52 }
 0x90d   :  { %9623 = vmatprep.subr.bf16.mxu1 %v13605_v55 }
 0x90f   :  { %8689 = vmatmul.mubr.msk.f32.vlgmr.msra.gmra.mrb[100].mxu1 %vm3875_vm6, %v7805_v50  ;;  %v7816_v50 = vld [vmem:[%s13513_s10 + $0x38] sm:$0xff] }
 0x910   :  { %9625 = vmatpush3.bf16.msra.mxu1 %v9624_v2  ;;  %8726 = vmatprep.mubr.msk.f32.mxu1 %vm9986_vm8, %v13606_v18  ;;  %v6767_v2 = vld [vmem:[%s13514_s11 + $0xd8] sm:$0xff] }
 0x911   :  { %9626 = vmatprep.subr.bf16.mxu1 %v13605_v55 }
 0x914   :  { %9628 = vmatpush3.bf16.msra.mxu1 %v9627_v41  ;;  %v9702_v41 = vpack.c.bf16 %v6769_v40, %v6768_v5 }
 0x915   :  { %9629 = vmatprep.subr.bf16.mxu1 %v13605_v55 }
 0x918   :  { %9631 = vmatpush3.bf16.msra.mxu1 %v9630_v36  ;;  %v6771_v36 = vld [vmem:[%s13514_s11 + $0xf8] sm:$0xff] }
 0x919   :  { %9632 = vmatprep.subr.bf16.mxu1 %v13605_v55  ;;  %v9705_v34 = vpack.c.bf16 %v6771_v36, %v6770_v4  ;;  %v6964_v4 = vld [vmem:[%s13516_s15 + $0x78] sm:$0xff] }
 0x91c   :  { %9634 = vmatpush3.bf16.msra.mxu1 %v9633_v62 }
 0x91d   :  { %9647 = vmatprep.subr.bf16.mxu1 %v13605_v55 }
 0x9c2   :  { %v5987_v20 = vpop.f32.mrb[96].mxu1  ;;  %v6146_v48 = vpop.f32.mrb[144].mxu0 }
 0x9c3   :  { %v8633_v42 = vpop.f32.mrb[97].mxu1  ;;  %v8671_v56 = vpop.f32.mrb[145].mxu0 }
 0x9c4   :  { %v6865_v56 = vld [vmem:[%s13515_s13 + $0x50] sm:$0xff] }
 0x9d2   :  { %v6062_v22 = vpop.f32.mrb[98].mxu1 }
 0x9d3   :  { %v6066_v58 = vmax.f32 %v5987_v20, %v6062_v22  ;;  %v8652_v30 = vpop.f32.mrb[99].mxu1  ;;  %v6863_v20 = vld [vmem:[%s13515_s13 + $0x40] sm:$0xff]  ;;  %v6866_v22 = vld [vmem:[%s13515_s13 + $0x58] sm:$0xff] }
 0x9d5   :  { %8727 = vmatmul.mubr.msk.f32.vlgmr.msra.gmra.mrb[102].mxu1 %vm3875_vm6, %v6066_v58  ;;  %v9723_v58 = vpack.c.bf16 %v6866_v22, %v6865_v56 }
 0x9d6   :  { %9649 = vmatpush3.bf16.msra.mxu1 %v13134_v38  ;;  %8764 = vmatprep.mubr.msk.f32.mxu1 %vm9986_vm8, %v13606_v18 }
 0x9d7   :  { %9650 = vmatprep.subr.bf16.mxu1 %v13605_v55 }
 0x9da   :  { %9652 = vmatpush3.bf16.msra.mxu1 %v13140_v0 }
 0x9db   :  { %9653 = vmatprep.subr.bf16.mxu1 %v13605_v55 }
 0x9de   :  { %9655 = vmatpush3.bf16.msra.mxu1 %v13146_v27 }
 0x9df   :  { %9656 = vmatprep.subr.bf16.mxu1 %v13605_v55 }
 0x9e2   :  { %9658 = vmatpush3.bf16.msra.mxu1 %v13152_v52  ;;  %v6221_v7 = vpop.f32.mrb[100].mxu1 }
 0x9e3   :  { %v6225_v6 = vmax.f32 %v6146_v48, %v6221_v7  ;;  %9671 = vmatprep.subr.bf16.mxu1 %v13605_v55  ;;  %v8690_v25 = vpop.f32.mrb[101].mxu1  ;;  %v6864_v48 = vld [vmem:[%s13515_s13 + $0x48] sm:$0xff] }
 0x9e4   :  { %v9720_v42 = vpack.c.bf16 %v6864_v48, %v6863_v20 }
 0x9e5   :  { %8708 = vmatmul.mubr.msk.f32.vlgmr.msra.gmra.mrb[146].mxu0 %vm3875_vm6, %v6225_v6  ;;  %8765 = vmatmul.mubr.msk.f32.vlgmr.msra.gmra.mrb[104].mxu1 %vm3875_vm6, %v7811_v19 }
 0x9e6   :  { %9637 = vmatpush3.bf16.msra.mxu0 %v13134_v38  ;;  %9673 = vmatpush3.bf16.msra.mxu1 %v13134_v38 }
 0x9e7   :  { %9638 = vmatprep.subr.bf16.mxu0 %v13605_v55  ;;  %9674 = vmatprep.subr.bf16.mxu1 %v13605_v55 }
 0x9e8   :  { %8745 = vmatprep.mubr.msk.f32.mxu0 %vm9986_vm8, %v13606_v18  ;;  %8802 = vmatprep.mubr.msk.f32.mxu1 %vm9986_vm8, %v13606_v18 }
 0x9ea   :  { %9640 = vmatpush3.bf16.msra.mxu0 %v13140_v0  ;;  %9676 = vmatpush3.bf16.msra.mxu1 %v13140_v0 }
 0x9eb   :  { %9641 = vmatprep.subr.bf16.mxu0 %v13605_v55  ;;  %9677 = vmatprep.subr.bf16.mxu1 %v13605_v55 }
 0x9ee   :  { %9643 = vmatpush3.bf16.msra.mxu0 %v13146_v27  ;;  %9679 = vmatpush3.bf16.msra.mxu1 %v13146_v27 }
 0x9ef   :  { %9644 = vmatprep.subr.bf16.mxu0 %v13605_v55  ;;  %9680 = vmatprep.subr.bf16.mxu1 %v13605_v55 }
 0x9f2   :  { %9646 = vmatpush3.bf16.msra.mxu0 %v13152_v52  ;;  %9682 = vmatpush3.bf16.msra.mxu1 %v13152_v52 }
 0x9f3   :  { %9659 = vmatprep.subr.bf16.mxu0 %v13605_v55  ;;  %9695 = vmatprep.subr.bf16.mxu1 %v13605_v55 }
 0x9f5   :  { %8746 = vmatmul.mubr.msk.f32.vlgmr.msra.gmra.mrb[148].mxu0 %vm3875_vm6, %v7809_v16  ;;  %8803 = vmatmul.mubr.msk.f32.vlgmr.msra.gmra.mrb[106].mxu1 %vm3875_vm6, %v7814_v10  ;;  %v6954_v10 = vld [vmem:[%s13516_s15 + $0x28] sm:$0xff] }
 0x9f6   :  { %8783 = vmatprep.mubr.msk.f32.mxu0 %vm9986_vm8, %v13606_v18  ;;  %9661 = vmatpush3.bf16.msra.mxu0 %v9660_v39  ;;  %v9726_v39 = vpack.c.bf16 %v6868_v21, %v6867_v63 }
 0x9f7   :  { %9662 = vmatprep.subr.bf16.mxu0 %v13605_v55  ;;  %8840 = vmatprep.mubr.msk.f32.mxu1 %vm9986_vm8, %v13606_v18 }
 0x9fa   :  { %9664 = vmatpush3.bf16.msra.mxu0 %v9663_v1  ;;  %v6949_v1 = vld [vmem:[%s13516_s15] sm:$0xff] }
 0x9fb   :  { %9665 = vmatprep.subr.bf16.mxu0 %v13605_v55 }
 0x9fe   :  { %9667 = vmatpush3.bf16.msra.mxu0 %v9666_v28  ;;  %v9732_v28 = vpack.c.bf16 %v6950_v54, %v6949_v1 }
 0x9ff   :  { %9668 = vmatprep.subr.bf16.mxu0 %v13605_v55 }
 0xa02   :  { %9670 = vmatpush3.bf16.msra.mxu0 %v9669_v3  ;;  %v6953_v3 = vld [vmem:[%s13516_s15 + $0x20] sm:$0xff] }
 0xa03   :  { %9683 = vmatprep.subr.bf16.mxu0 %v13605_v55 }
 0xaa8   :  { %v6376_v45 = vpop.f32.mrb[102].mxu1 }
 0xaa9   :  { %v8728_v61 = vpop.f32.mrb[103].mxu1 }
 0xaaa   :  { %v6955_v61 = vld [vmem:[%s13516_s15 + $0x30] sm:$0xff] }
 0xab8   :  { %v6303_v44 = vpop.f32.mrb[146].mxu0  ;;  %v6526_v15 = vpop.f32.mrb[104].mxu1 }
 0xab9   :  { %v13330_v31 = vadd.f32 %v6376_v45, %v6303_v44  ;;  %v8709_v51 = vpop.f32.mrb[147].mxu0  ;;  %v8766_v32 = vpop.f32.mrb[105].mxu1  ;;  %v9738_v45 = vpack.c.bf16 %v6954_v10, %v6953_v3  ;;  %v6956_v44 = vld [vmem:[%s13516_s15 + $0x38] sm:$0xff] }
 0xaba   :  { %v6958_v51 = vld [vmem:[%s13516_s15 + $0x48] sm:$0xff] }
 0xac8   :  { %v6451_v29 = vpop.f32.mrb[148].mxu0  ;;  %v6684_v9 = vpop.f32.mrb[106].mxu1 }
 0xac9   :  { %v6530_v46 = vmax.f32 %v6451_v29, %v6526_v15  ;;  %v8747_v11 = vpop.f32.mrb[149].mxu0  ;;  %v8804_v62 = vpop.f32.mrb[107].mxu1  ;;  %v9741_v15 = vpack.c.bf16 %v6956_v44, %v6955_v61  ;;  %v6959_v29 = vld [vmem:[%s13516_s15 + $0x50] sm:$0xff] }
 0xacb   :  { %8784 = vmatmul.mubr.msk.f32.vlgmr.msra.gmra.mrb[150].mxu0 %vm3875_vm6, %v6530_v46  ;;  %v6960_v46 = vld [vmem:[%s13516_s15 + $0x58] sm:$0xff] }
 0xacc   :  { %9685 = vmatpush3.bf16.msra.mxu0 %v13134_v38  ;;  %8821 = vmatprep.mubr.msk.f32.mxu0 %vm9986_vm8, %v13606_v18  ;;  %v6764_v38 = vld [vmem:[%s13514_s11 + $0xc0] sm:$0xff]  ;;  %v9747_v11 = vpack.c.bf16 %v6960_v46, %v6959_v29 }
 0xacd   :  { %9686 = vmatprep.subr.bf16.mxu0 %v13605_v55 }
 0xad0   :  { %9688 = vmatpush3.bf16.msra.mxu0 %v13140_v0  ;;  %v6765_v0 = vld [vmem:[%s13514_s11 + $0xc8] sm:$0xff] }
 0xad1   :  { %9689 = vmatprep.subr.bf16.mxu0 %v13605_v55 }
 0xad4   :  { %9691 = vmatpush3.bf16.msra.mxu0 %v13146_v27  ;;  %v6766_v27 = vld [vmem:[%s13514_s11 + $0xd0] sm:$0xff] }
 0xad5   :  { %9692 = vmatprep.subr.bf16.mxu0 %v13605_v55  ;;  %v9699_v14 = vpack.c.bf16 %v6767_v2, %v6766_v27 }
 0xad8   :  { %9694 = vmatpush3.bf16.msra.mxu0 %v13152_v52  ;;  %v9696_v52 = vpack.c.bf16 %v6765_v0, %v6764_v38  ;;  %v6962_v38 = vld [vmem:[%s13516_s15 + $0x68] sm:$0xff] }
 0xad9   :  { %9707 = vmatprep.subr.bf16.mxu0 %v13605_v55 }
 0xada   :  { %9697 = vmatpush3.bf16.msra.mxu1 %v9696_v52  ;;  %v7819_v52 = vld [vmem:[%s13517_s12] ss:$0 sm:$0xff] }
 0xadb   :  { %8822 = vmatmul.mubr.msk.f32.vlgmr.msra.gmra.mrb[152].mxu0 %vm3875_vm6, %v7816_v50  ;;  %9698 = vmatprep.subr.bf16.mxu1 %v13605_v55  ;;  %v6961_v50 = vld [vmem:[%s13516_s15 + $0x60] sm:$0xff] }
 0xadc   :  { %8875 = vmatprep.mubr.msk.f32.mxu0 %vm9986_vm8, %v13606_v18  ;;  %9709 = vmatpush3.bf16.msra.mxu0 %v9708_v37  ;;  %v9750_v0 = vpack.c.bf16 %v6962_v38, %v6961_v50 }
 0xadd   :  { %9710 = vmatprep.subr.bf16.mxu0 %v13605_v55 }
 0xade   :  { %9700 = vmatpush3.bf16.msra.mxu1 %v9699_v14 }
 0xadf   :  { %9701 = vmatprep.subr.bf16.mxu1 %v13605_v55 }
 0xae0   :  { %9712 = vmatpush3.bf16.msra.mxu0 %v9711_v47 }
 0xae1   :  { %9713 = vmatprep.subr.bf16.mxu0 %v13605_v55 }
 0xae2   :  { %9703 = vmatpush3.bf16.msra.mxu1 %v9702_v41  ;;  %v6963_v41 = vld [vmem:[%s13516_s15 + $0x70] sm:$0xff] }
 0xae3   :  { %9704 = vmatprep.subr.bf16.mxu1 %v13605_v55  ;;  %v9753_v36 = vpack.c.bf16 %v6964_v4, %v6963_v41 }
 0xae4   :  { %9715 = vmatpush3.bf16.msra.mxu0 %v9714_v23 }
 0xae5   :  { %9716 = vmatprep.subr.bf16.mxu0 %v13605_v55 }
 0xae6   :  { %9706 = vmatpush3.bf16.msra.mxu1 %v9705_v34 }
 0xae7   :  { %9731 = vmatprep.subr.bf16.mxu1 %v13605_v55 }
 0xae8   :  { %9718 = vmatpush3.bf16.msra.mxu0 %v9717_v13 }
 0xae9   :  { %9719 = vmatprep.subr.bf16.mxu0 %v13605_v55 }
 0xaec   :  { %9721 = vmatpush3.bf16.msra.mxu0 %v9720_v42 }
 0xaed   :  { %9722 = vmatprep.subr.bf16.mxu0 %v13605_v55 }
 0xaf0   :  { %9724 = vmatpush3.bf16.msra.mxu0 %v9723_v58 }
 0xaf1   :  { %9725 = vmatprep.subr.bf16.mxu0 %v13605_v55 }
 0xaf4   :  { %9727 = vmatpush3.bf16.msra.mxu0 %v9726_v39 }
 0xaf5   :  { %9728 = vmatprep.subr.bf16.mxu0 %v13605_v55 }
 0xb9e   :  { %v6608_v30 = vpop.f32.mrb[150].mxu0 }
 0xb9f   :  { %v6612_v7 = vadd.f32 %v6608_v30, %v13330_v31  ;;  %v8785_v19 = vpop.f32.mrb[151].mxu0  ;;  %v6957_v31 = vld [vmem:[%s13516_s15 + $0x40] sm:$0xff] }
 0xba0   :  { %v9744_v32 = vpack.c.bf16 %v6958_v51, %v6957_v31 }
 0xbae   :  { %v6759_v6 = vpop.f32.mrb[152].mxu0 }
 0xbaf   :  { %v6763_v25 = vmax.f32 %v6684_v9, %v6759_v6  ;;  %v8823_v16 = vpop.f32.mrb[153].mxu0 }
 0xbb1   :  { %8841 = vmatmul.mubr.msk.f32.vlgmr.msra.gmra.mrb[108].mxu1 %vm3875_vm6, %v6763_v25 }
 0xbb2   :  { %8910 = vmatprep.mubr.msk.f32.mxu1 %vm9986_vm8, %v13606_v18  ;;  %v6870_v18 = vld [vmem:[%s13515_s13 + $0x78] sm:$0xff]  ;;  %9733 = vmatpush3.bf16.msra.mxu1 %v9732_v28 }
 0xbb3   :  { %v9729_v35 = vpack.c.bf16 %v6870_v18, %v6869_v26  ;;  %9734 = vmatprep.subr.bf16.mxu1 %v13605_v55 }
 0xbb5   :  { %9730 = vmatpush3.bf16.msra.mxu0 %v9729_v35 }
 0xbb6   :  { %9736 = vmatpush3.bf16.msra.mxu1 %v9735_v24 }
 0xbb7   :  { %9737 = vmatprep.subr.bf16.mxu1 %v13605_v55 }
 0xbba   :  { %9739 = vmatpush3.bf16.msra.mxu1 %v9738_v45 }
 0xbbb   :  { %9740 = vmatprep.subr.bf16.mxu1 %v13605_v55 }
 0xbbe   :  { %9742 = vmatpush3.bf16.msra.mxu1 %v9741_v15 }
 0xbbf   :  { %9743 = vmatprep.subr.bf16.mxu1 %v13605_v55 }
 0xbc2   :  { %9745 = vmatpush3.bf16.msra.mxu1 %v9744_v32 }
 0xbc3   :  { %9746 = vmatprep.subr.bf16.mxu1 %v13605_v55 }
 0xbc6   :  { %9748 = vmatpush3.bf16.msra.mxu1 %v9747_v11 }
 0xbc7   :  { %9749 = vmatprep.subr.bf16.mxu1 %v13605_v55 }
 0xbca   :  { %9751 = vmatpush3.bf16.msra.mxu1 %v9750_v0 }
 0xbcb   :  { %9752 = vmatprep.subr.bf16.mxu1 %v13605_v55  ;;  %v7820_v55 = vld [vmem:[%s13518_s14] ss:$0 sm:$0xff] }
 0xbce   :  { %9754 = vmatpush3.bf16.msra.mxu1 %v9753_v36 }
 0xc84   :  { %v6841_v27 = vpop.f32.mrb[108].mxu1 }
 0xc85   :  { %v6845_v2 = vadd.f32 %v6841_v27, %v6612_v7  ;;  %v8842_v14 = vpop.f32.mrb[109].mxu1 }
 0xc87   :  { %v6853_v5 = vadd.f32 %v7819_v52, %v6845_v2 }
 0xc89   :  { %v6854_v40 = vmax.f32 %v6853_v5, 0.0 }
 0xc8b   :  { %8876 = vmatmul.mubr.f32.vlgmr.msra.gmra.mrb[154].mxu0 %v6854_v40 }
 0xd5e   :  { %v6944_v9 = vpop.f32.mrb[154].mxu0 }
 0xd5f   :  { %v6945_v34 = vadd.f32 %v7820_v55, %v6944_v9  ;;  %v8877_v62 = vpop.f32.mrb[155].mxu0 }
 0xd61   :  { %v6948_v60 = vmax.f32 %v6945_v34, 0.0 }
 0xd63   :  { %8911 = vmatmul.mubr.f32.vlgmr.msra.gmra.mrb[110].mxu1 %v6948_v60 }
 0xe36   :  { %v7038_v43 = vpop.f32.mrb[110].mxu1 }
 0xe37   :  { %v7039_v37 = vadd.f32 %v7821_v8, %v7038_v43  ;;  %v8912_v57 = vpop.f32.mrb[111].mxu1 }
 0xe39   :  { %7042 = vst [vmem:[%s13520_s17] sm:$0xff] %v7039_v37 }

</bundles_post_ra>
